<compile_context>
chip_gen: v7x
topology: tpu7x:2x2x1
jax: 0.10.0
libtpu: 0.0.40
codegen_flags: <defaults>
</compile_context>

<pallas_src>
import numpy as np
import jax
import jax.numpy as jnp
from jax.experimental import pallas as pl
from jax.experimental.pallas import tpu as pltpu

BN_EPS = 1e-5
KSZ = 3  # every conv in the module is 3x3


def _conv_out(size, stride, pad):
    return (size + 2 * pad - KSZ) // stride + 1


# ----------------------------- Pallas kernel ---------------------------------

def _encoder_kernel(
        p1_ref, w1_ref,            # conv1: im2col patches (N, 144, 27), weight (27, 32)   [bf16]
        s2_ref, w2_ref,            # conv2: gather (9, 36, 144), weight (288, 64)          [bf16]
        s3_ref, w3_ref,            # conv3: gather (9, 9, 36),   weight (576, 128)         [bf16]
        w4_ref,                    # conv4 as FC:                weight (1152, 256)        [bf16]
        fcw_ref, fcb_ref,          # fc_out: (256, latent) bf16, bias (1, 1, latent) f32
        gb_ref,                    # BN gamma/beta packed: (8, 256) f32 (g1,b1,g2,b2,...)
        alpha_ref,                 # PReLU alphas packed:  (4,) f32 in SMEM
        out_ref):                  # (N, 1, latent) f32
    """Entire Encoder forward fused into one kernel.

    Activation layout everywhere: (batch, spatial positions, channels); channels on
    lanes.  Matmul operands bf16, accumulation/BN/PReLU in f32.  Intermediates never
    leave VMEM/vregs.
    """
    n = p1_ref.shape[0]
    f32 = jnp.float32
    bf16 = jnp.bfloat16

    def bcast(w2d):
        # Broadcast a (K, C) weight over the batch for a standard batched matmul.
        return jnp.broadcast_to(w2d, (n,) + w2d.shape)

    def bn_prelu(y, layer):
        # Training-mode BatchNorm2d (batch stats, biased variance) + shared-alpha PReLU.
        c = y.shape[-1]
        gamma = gb_ref[2 * layer:2 * layer + 1, :c]          # (1, c)
        beta = gb_ref[2 * layer + 1:2 * layer + 2, :c]       # (1, c)
        mean = jnp.mean(jnp.mean(y, axis=1, keepdims=True), axis=0, keepdims=True)
        diff = y - mean
        var = jnp.mean(jnp.mean(diff * diff, axis=1, keepdims=True),
                       axis=0, keepdims=True)
        z = diff * (gamma * jax.lax.rsqrt(var + BN_EPS)) + beta
        alpha = alpha_ref[layer]
        return jnp.where(z > 0, z, alpha * z)

    def gather_conv(act, s_ref, w_ref):
        # act: (n, P_in, Cin) f32.  s_ref[k]: (P_out, P_in) 0/1 tap-gather shared across
        # the batch (O(N) work, tiny constant).  The 9 gathered taps are concatenated on
        # the lane axis into an (n, P_out, 9*Cin) im2col block and hit the MXU with ONE
        # large-K weight matmul.  Conv bias omitted: it cancels exactly against the
        # batch-mean subtraction of training-mode BatchNorm.
        p_out, p_in = s_ref.shape[1], act.shape[1]
        a16 = act.astype(bf16)
        taps = []
        for k in range(KSZ * KSZ):
            sk = jnp.broadcast_to(s_ref[k], (n, p_out, p_in))
            taps.append(jnp.einsum('nop,npc->noc', sk, a16,
                                   preferred_element_type=f32))
        patches = jnp.concatenate(taps, axis=-1).astype(bf16)        # (n, P_out, 9*Cin)
        return jnp.einsum('nok,nkc->noc', patches, bcast(w_ref[...]),
                          preferred_element_type=f32)

    # conv1: the tiny 3-channel input was im2col'ed wrapper-side -> one matmul here.
    y1 = jnp.einsum('npk,nkc->npc', p1_ref[...], bcast(w1_ref[...]),
                    preferred_element_type=f32)
    act = bn_prelu(y1, 0)                                            # (n, 144, 32)
    act = bn_prelu(gather_conv(act, s2_ref, w2_ref), 1)              # (n, 36, 64)
    act = bn_prelu(gather_conv(act, s3_ref, w3_ref), 2)              # (n, 9, 128)
    # TODO(synk): x.register_hook(activations_hook) is an autograd-only side effect; no forward-math equivalent.

    # conv4: 3x3 input, 1x1 output, stride 1, no pad == a plain FC over the flattened
    # 3x3x128 map (K = 1152); no gather needed at all.
    a16 = act.astype(bf16)
    flat = jnp.concatenate([a16[:, k:k + 1, :] for k in range(KSZ * KSZ)],
                           axis=-1)                                   # (n, 1, 1152)
    y4 = jnp.einsum('nok,nkc->noc', flat, bcast(w4_ref[...]),
                    preferred_element_type=f32)                       # (n, 1, 256)
    act = bn_prelu(y4, 3)

    # fc_out fused into the same kernel (lane-dense (n, 1, 128) store).
    out_ref[...] = jnp.einsum('nok,nkc->noc', act.astype(bf16), bcast(fcw_ref[...]),
                              preferred_element_type=f32) + fcb_ref[...]


# ------------------------- host-side operand builders -------------------------

def _build_sel(h, w, oh, ow, stride, pad):
    """sel[k] (k = kh*3+kw): (oh*ow, h*w) 0/1 matrix shared across the batch.
    sel[k] @ A gathers tap (kh, kw) of a stride-`stride`, zero-padded 3x3 conv from a
    single sample's (h*w, C) activation (rows ordered (h, w) row-major)."""
    sel = np.zeros((KSZ * KSZ, oh * ow, h * w), np.float32)
    for kh in range(KSZ):
        for kw in range(KSZ):
            k = kh * KSZ + kw
            for i in range(oh):
                hh = stride * i + kh - pad
                if hh < 0 or hh >= h:
                    continue
                for j in range(ow):
                    ww = stride * j + kw - pad
                    if ww < 0 or ww >= w:
                        continue
                    sel[k, i * ow + j, hh * w + ww] = 1.0
    return sel


def _weight_mat(w):
    # (Cout, Cin, 3, 3) -> (9*Cin, Cout), row index = (kh*3 + kw)*Cin + cin.
    cout, cin, kh, kw = w.shape
    return jnp.transpose(w, (2, 3, 1, 0)).reshape(kh * kw * cin, cout)


def _im2col_first(x_nchw, stride, pad):
    # NCHW -> NHWC, zero-pad, gather 3x3 stride-2 patches for the first conv only.
    # Rows ordered (n, oh, ow); columns ordered (kh, kw, ci) to match _weight_mat.
    n, c, h, w = x_nchw.shape
    oh, ow = _conv_out(h, stride, pad), _conv_out(w, stride, pad)
    xh = jnp.transpose(x_nchw, (0, 2, 3, 1))
    xp = jnp.pad(xh, ((0, 0), (pad, pad), (pad, pad), (0, 0)))
    slabs = [xp[:, kh:kh + stride * oh:stride, kw:kw + stride * ow:stride, :]
             for kh in range(KSZ) for kw in range(KSZ)]
    return jnp.stack(slabs, axis=3).reshape(n, oh * ow, KSZ * KSZ * c)


# --------------------------------- forward ------------------------------------

def encoder_forward(x, params):
    n, cin, h, w = x.shape
    assert h == w, "square inputs expected"
    o1 = _conv_out(h, 2, 1)
    o2 = _conv_out(o1, 2, 1)
    o3 = _conv_out(o2, 2, 1)
    o4 = _conv_out(o3, 1, 0)
    assert o4 == 1, "fc_out expects a 1x1x256 feature map (use e.g. a 24x24 input)"
    latent = params["fc"]["w"].shape[0]
    c1 = params["conv1"]["w"].shape[0]
    c2 = params["conv2"]["w"].shape[0]
    c3 = params["conv3"]["w"].shape[0]
    c4 = params["conv4"]["w"].shape[0]
    bf16 = jnp.bfloat16

    # Matmul operands in bf16 (MXU path); BN / PReLU / accumulation stay in f32.
    p1 = _im2col_first(x, stride=2, pad=1).astype(bf16)               # (n, 144, 27)
    w1 = _weight_mat(params["conv1"]["w"]).astype(bf16)               # (27, 32)
    w2 = _weight_mat(params["conv2"]["w"]).astype(bf16)               # (288, 64)
    w3 = _weight_mat(params["conv3"]["w"]).astype(bf16)               # (576, 128)
    w4 = _weight_mat(params["conv4"]["w"]).astype(bf16)               # (1152, 256)
    s2 = jnp.asarray(_build_sel(o1, o1, o2, o2, 2, 1), bf16)          # (9, 36, 144)
    s3 = jnp.asarray(_build_sel(o2, o2, o3, o3, 2, 1), bf16)          # (9, 9, 36)
    fcw = params["fc"]["w"].T.astype(bf16)                            # (256, latent)
    fcb = params["fc"]["b"].reshape(1, 1, -1).astype(jnp.float32)     # (1, 1, latent)

    # BN gamma/beta packed into one (8, c4) f32 operand; PReLU alphas into SMEM (4,).
    rows = []
    for name in ("conv1", "conv2", "conv3", "conv4"):
        for key in ("gamma", "beta"):
            v = params[name][key].astype(jnp.float32)
            rows.append(jnp.pad(v, (0, c4 - v.shape[0])).reshape(1, c4))
    gb = jnp.concatenate(rows, axis=0)                                # (8, 256)
    alphas = jnp.stack([params[nm]["alpha"]
                        for nm in ("conv1", "conv2", "conv3", "conv4")]).astype(jnp.float32)

    operands = (p1, w1, s2, w2, s3, w3, w4, fcw, fcb, gb, alphas)

    flops = 2 * n * (o1 * o1 * 9 * cin * c1             # conv1
                     + 9 * o2 * o2 * o1 * o1 * c1       # conv2 tap gathers
                     + o2 * o2 * 9 * c1 * c2            # conv2 weights (K = 288)
                     + 9 * o3 * o3 * o2 * o2 * c2       # conv3 tap gathers
                     + o3 * o3 * 9 * c2 * c3            # conv3 weights (K = 576)
                     + 9 * c3 * c4                      # conv4 as plain FC (K = 1152)
                     + c4 * latent)                     # fc_out
    bytes_accessed = sum(int(a.size) * a.dtype.itemsize for a in operands) + n * latent * 4

    vmem = pl.BlockSpec(memory_space=pltpu.MemorySpace.VMEM)
    smem = pl.BlockSpec(memory_space=pltpu.MemorySpace.SMEM)

    out = pl.pallas_call(
        _encoder_kernel,
        out_shape=jax.ShapeDtypeStruct((n, 1, latent), jnp.float32),
        in_specs=[vmem] * 10 + [smem],
        out_specs=vmem,
        compiler_params=pltpu.CompilerParams(
            # Explicit budget: total resident operands + intermediates are < 2 MiB at
            # these shapes; 32 MiB fits within v7x's 64 MiB physical VMEM and raises
            # the v5e 16 MiB default scoped limit.
            vmem_limit_bytes=32 * 1024 * 1024),
        cost_estimate=pl.CostEstimate(flops=flops,
                                      transcendentals=c1 + c2 + c3 + c4,
                                      bytes_accessed=bytes_accessed),
    )(*operands)
    return out.reshape(n, latent)


# ------------------------------ parameters ------------------------------------

def init_params(key, latent_space_dim=128):
    ks = jax.random.split(key, 12)

    def conv_p(kw_key, kb_key, cout, cin, ksz):
        fan_in = cin * ksz * ksz
        bound = 1.0 / jnp.sqrt(fan_in)
        return {
            "w": jax.random.uniform(kw_key, (cout, cin, ksz, ksz), jnp.float32, -bound, bound),
            # Conv bias exists in the module but is mathematically inert: training-mode
            # BatchNorm subtracts the per-channel batch mean right after, so it is not
            # passed to the kernel (kept here only for parameter-structure fidelity).
            "b": jax.random.uniform(kb_key, (cout,), jnp.float32, -bound, bound),
            # PyTorch defaults: BN gamma=1, beta=0; PReLU alpha=0.25 (shared).
            "gamma": jnp.ones((cout,), jnp.float32),
            "beta": jnp.zeros((cout,), jnp.float32),
            "alpha": jnp.array(0.25, jnp.float32),
        }

    fc_bound = 1.0 / jnp.sqrt(256.0)
    return {
        "conv1": conv_p(ks[0], ks[1], 32, 3, 3),
        "conv2": conv_p(ks[2], ks[3], 64, 32, 3),
        "conv3": conv_p(ks[4], ks[5], 128, 64, 3),
        "conv4": conv_p(ks[6], ks[7], 256, 128, 3),
        "fc": {
            "w": jax.random.uniform(ks[8], (latent_space_dim, 256), jnp.float32, -fc_bound, fc_bound),
            "b": jax.random.uniform(ks[9], (latent_space_dim,), jnp.float32, -fc_bound, fc_bound),
        },
    }


# -------------------------- pure-JAX reference --------------------------------

def _reference_forward(x, params, matmul_dtype=jnp.float32):
    """Reference forward.  matmul_dtype=jnp.bfloat16 emulates the kernel's numerics
    (bf16 matmul operands, f32 accumulation); jnp.float32 is the exact module math."""

    def conv(x, w, b, stride, pad):
        y = jax.lax.conv_general_dilated(
            x.astype(matmul_dtype), w.astype(matmul_dtype),
            window_strides=(stride, stride),
            padding=((pad, pad), (pad, pad)),
            dimension_numbers=("NCHW", "OIHW", "NCHW"),
            preferred_element_type=jnp.float32)
        return y + b.reshape(1, -1, 1, 1)

    def bn_prelu(y, gamma, beta, alpha):
        mean = y.mean(axis=(0, 2, 3), keepdims=True)
        var = ((y - mean) ** 2).mean(axis=(0, 2, 3), keepdims=True)
        z = ((y - mean) * jax.lax.rsqrt(var + BN_EPS) * gamma.reshape(1, -1, 1, 1)
             + beta.reshape(1, -1, 1, 1))
        return jnp.where(z > 0, z, alpha * z)

    strides, pads = (2, 2, 2, 1), (1, 1, 1, 0)
    h = x
    for i, name in enumerate(("conv1", "conv2", "conv3", "conv4")):
        p = params[name]
        h = bn_prelu(conv(h, p["w"], p["b"], strides[i], pads[i]),
                     p["gamma"], p["beta"], p["alpha"])
    h = h.reshape(h.shape[0], -1)
    return (jnp.dot(h.astype(matmul_dtype), params["fc"]["w"].T.astype(matmul_dtype),
                    preferred_element_type=jnp.float32)
            + params["fc"]["b"])


# --------------------------------- main ----------------------------------------

if __name__ == "__main__":
    key = jax.random.PRNGKey(0)
    pkey, xkey = jax.random.split(key)
    params = init_params(pkey, latent_space_dim=128)
    # 24x24 input -> 12 -> 6 -> 3 -> 1, so the flatten feeds exactly 256 features to fc_out.
    x = jax.random.normal(xkey, (2, 3, 24, 24), jnp.float32)

    out = jax.jit(encoder_forward)(x, params)
    out = jax.block_until_ready(out)
    assert out.shape == (2, 128), out.shape
    assert bool(jnp.all(jnp.isfinite(out)))

    # Tight check vs a reference using the same numerics (bf16 matmul operands, f32 accum).
    ref16 = _reference_forward(x, params, matmul_dtype=jnp.bfloat16)
    err16 = float(jnp.max(jnp.abs(out - ref16)))
    assert err16 < 5e-3, f"mismatch vs bf16-matmul reference: max abs err = {err16}"

    # Sanity check vs the exact f32 reference (bounds the bf16 quantization error).
    ref32 = _reference_forward(x, params, matmul_dtype=jnp.float32)
    err32 = float(jnp.max(jnp.abs(out - ref32)))
    assert err32 < 2.5e-1, f"mismatch vs f32 reference: max abs err = {err32}"

    print("KERNEL_OK")
</pallas_src>

<mosaic_0001>
module attributes {stable_mosaic.version = 11 : i64} {
  func.func @_encoder_kernel(%arg0: memref<2x144x27xbf16, #tpu.memory_space<vmem>>, %arg1: memref<27x32xbf16, #tpu.memory_space<vmem>>, %arg2: memref<9x36x144xbf16, #tpu.memory_space<vmem>>, %arg3: memref<288x64xbf16, #tpu.memory_space<vmem>>, %arg4: memref<9x9x36xbf16, #tpu.memory_space<vmem>>, %arg5: memref<576x128xbf16, #tpu.memory_space<vmem>>, %arg6: memref<1152x256xbf16, #tpu.memory_space<vmem>>, %arg7: memref<256x128xbf16, #tpu.memory_space<vmem>>, %arg8: memref<1x1x128xf32, #tpu.memory_space<vmem>>, %arg9: memref<8x256xf32, #tpu.memory_space<vmem>>, %arg10: memref<4xf32, #tpu.memory_space<smem>>, %arg11: memref<2x1x128xf32, #tpu.memory_space<vmem>>) attributes {dimension_semantics = [], scalar_prefetch = 0 : i64, scratch_operands = 0 : i64, tpu.core_type = #tpu.core_type<tc>} {
    %c0 = arith.constant 0 : index
    %c0_0 = arith.constant 0 : index
    %c0_1 = arith.constant 0 : index
    %0 = vector.load %arg0[%c0, %c0_0, %c0_1] : memref<2x144x27xbf16, #tpu.memory_space<vmem>>, vector<2x144x27xbf16>
    %c0_2 = arith.constant 0 : index
    %c0_3 = arith.constant 0 : index
    %1 = vector.load %arg1[%c0_2, %c0_3] : memref<27x32xbf16, #tpu.memory_space<vmem>>, vector<27x32xbf16>
    %2 = vector.shape_cast %1 : vector<27x32xbf16> to vector<1x27x32xbf16>
    %3 = vector.broadcast %2 : vector<1x27x32xbf16> to vector<2x27x32xbf16>
    "tpu.trace_start"() <{level = 10 : i32, message = "npk,nkc->npc"}> : () -> ()
    %cst = arith.constant dense<0.000000e+00> : vector<2x144x32xf32>
    %4 = tpu.matmul %0, %3, %cst {dimension_numbers = #tpu.dot_dimension_numbers<[2], [1], [1], [2], [0, 0, 0, 1, 1, 2], [0], [0]>} : vector<2x144x27xbf16>, vector<2x27x32xbf16>, vector<2x144x32xf32> -> vector<2x144x32xf32>
    "tpu.trace_stop"() : () -> ()
    %c0_4 = arith.constant 0 : index
    %c0_5 = arith.constant 0 : index
    %5 = vector.load %arg9[%c0_4, %c0_5] : memref<8x256xf32, #tpu.memory_space<vmem>>, vector<1x32xf32>
    %c1 = arith.constant 1 : index
    %c0_6 = arith.constant 0 : index
    %6 = vector.load %arg9[%c1, %c0_6] : memref<8x256xf32, #tpu.memory_space<vmem>>, vector<1x32xf32>
    %cst_7 = arith.constant dense<0.000000e+00> : vector<2x32xf32>
    %7 = vector.multi_reduction <add>, %4, %cst_7 [1] : vector<2x144x32xf32> to vector<2x32xf32>
    %8 = vector.shape_cast %7 : vector<2x32xf32> to vector<2x1x32xf32>
    %cst_8 = arith.constant 1.440000e+02 : f32
    %9 = vector.broadcast %cst_8 : f32 to vector<2x1x32xf32>
    %10 = arith.divf %8, %9 : vector<2x1x32xf32>
    %cst_9 = arith.constant dense<0.000000e+00> : vector<1x32xf32>
    %11 = vector.multi_reduction <add>, %10, %cst_9 [0] : vector<2x1x32xf32> to vector<1x32xf32>
    %12 = vector.shape_cast %11 : vector<1x32xf32> to vector<1x1x32xf32>
    %cst_10 = arith.constant 2.000000e+00 : f32
    %13 = vector.broadcast %cst_10 : f32 to vector<1x1x32xf32>
    %14 = arith.divf %12, %13 : vector<1x1x32xf32>
    %15 = vector.broadcast %14 : vector<1x1x32xf32> to vector<2x144x32xf32>
    %16 = arith.subf %4, %15 : vector<2x144x32xf32>
    %17 = arith.mulf %16, %16 : vector<2x144x32xf32>
    %cst_11 = arith.constant dense<0.000000e+00> : vector<2x32xf32>
    %18 = vector.multi_reduction <add>, %17, %cst_11 [1] : vector<2x144x32xf32> to vector<2x32xf32>
    %19 = vector.shape_cast %18 : vector<2x32xf32> to vector<2x1x32xf32>
    %cst_12 = arith.constant 1.440000e+02 : f32
    %20 = vector.broadcast %cst_12 : f32 to vector<2x1x32xf32>
    %21 = arith.divf %19, %20 : vector<2x1x32xf32>
    %cst_13 = arith.constant dense<0.000000e+00> : vector<1x32xf32>
    %22 = vector.multi_reduction <add>, %21, %cst_13 [0] : vector<2x1x32xf32> to vector<1x32xf32>
    %23 = vector.shape_cast %22 : vector<1x32xf32> to vector<1x1x32xf32>
    %cst_14 = arith.constant 2.000000e+00 : f32
    %24 = vector.broadcast %cst_14 : f32 to vector<1x1x32xf32>
    %25 = arith.divf %23, %24 : vector<1x1x32xf32>
    %cst_15 = arith.constant 9.99999974E-6 : f32
    %26 = vector.broadcast %cst_15 : f32 to vector<1x1x32xf32>
    %27 = arith.addf %25, %26 : vector<1x1x32xf32>
    %28 = math.rsqrt %27 : vector<1x1x32xf32>
    %29 = vector.shape_cast %5 : vector<1x32xf32> to vector<1x1x32xf32>
    %30 = arith.mulf %29, %28 : vector<1x1x32xf32>
    %31 = vector.broadcast %30 : vector<1x1x32xf32> to vector<2x144x32xf32>
    %32 = arith.mulf %16, %31 : vector<2x144x32xf32>
    %33 = vector.shape_cast %6 : vector<1x32xf32> to vector<1x1x32xf32>
    %34 = vector.broadcast %33 : vector<1x1x32xf32> to vector<2x144x32xf32>
    %35 = arith.addf %32, %34 : vector<2x144x32xf32>
    %c0_16 = arith.constant 0 : index
    %36 = memref.load %arg10[%c0_16] : memref<4xf32, #tpu.memory_space<smem>>
    %cst_17 = arith.constant 0.000000e+00 : f32
    %37 = vector.broadcast %cst_17 : f32 to vector<2x144x32xf32>
    %38 = arith.cmpf ogt, %35, %37 : vector<2x144x32xf32>
    %39 = vector.broadcast %36 : f32 to vector<2x144x32xf32>
    %40 = arith.mulf %39, %35 : vector<2x144x32xf32>
    %41 = arith.select %38, %35, %40 : vector<2x144x32xi1>, vector<2x144x32xf32>
    %42 = arith.truncf %41 : vector<2x144x32xf32> to vector<2x144x32xbf16>
    %c0_18 = arith.constant 0 : index
    %c0_19 = arith.constant 0 : index
    %c0_20 = arith.constant 0 : index
    %43 = vector.load %arg2[%c0_18, %c0_19, %c0_20] : memref<9x36x144xbf16, #tpu.memory_space<vmem>>, vector<1x36x144xbf16>
    %44 = vector.shape_cast %43 : vector<1x36x144xbf16> to vector<36x144xbf16>
    %45 = vector.shape_cast %44 : vector<36x144xbf16> to vector<1x36x144xbf16>
    %46 = vector.broadcast %45 : vector<1x36x144xbf16> to vector<2x36x144xbf16>
    "tpu.trace_start"() <{level = 10 : i32, message = "nop,npc->noc"}> : () -> ()
    %cst_21 = arith.constant dense<0.000000e+00> : vector<2x36x32xf32>
    %47 = tpu.matmul %46, %42, %cst_21 {dimension_numbers = #tpu.dot_dimension_numbers<[2], [1], [1], [2], [0, 0, 0, 1, 1, 2], [0], [0]>} : vector<2x36x144xbf16>, vector<2x144x32xbf16>, vector<2x36x32xf32> -> vector<2x36x32xf32>
    "tpu.trace_stop"() : () -> ()
    %c1_22 = arith.constant 1 : index
    %c0_23 = arith.constant 0 : index
    %c0_24 = arith.constant 0 : index
    %48 = vector.load %arg2[%c1_22, %c0_23, %c0_24] : memref<9x36x144xbf16, #tpu.memory_space<vmem>>, vector<1x36x144xbf16>
    %49 = vector.shape_cast %48 : vector<1x36x144xbf16> to vector<36x144xbf16>
    %50 = vector.shape_cast %49 : vector<36x144xbf16> to vector<1x36x144xbf16>
    %51 = vector.broadcast %50 : vector<1x36x144xbf16> to vector<2x36x144xbf16>
    "tpu.trace_start"() <{level = 10 : i32, message = "nop,npc->noc"}> : () -> ()
    %cst_25 = arith.constant dense<0.000000e+00> : vector<2x36x32xf32>
    %52 = tpu.matmul %51, %42, %cst_25 {dimension_numbers = #tpu.dot_dimension_numbers<[2], [1], [1], [2], [0, 0, 0, 1, 1, 2], [0], [0]>} : vector<2x36x144xbf16>, vector<2x144x32xbf16>, vector<2x36x32xf32> -> vector<2x36x32xf32>
    "tpu.trace_stop"() : () -> ()
    %c2 = arith.constant 2 : index
    %c0_26 = arith.constant 0 : index
    %c0_27 = arith.constant 0 : index
    %53 = vector.load %arg2[%c2, %c0_26, %c0_27] : memref<9x36x144xbf16, #tpu.memory_space<vmem>>, vector<1x36x144xbf16>
    %54 = vector.shape_cast %53 : vector<1x36x144xbf16> to vector<36x144xbf16>
    %55 = vector.shape_cast %54 : vector<36x144xbf16> to vector<1x36x144xbf16>
    %56 = vector.broadcast %55 : vector<1x36x144xbf16> to vector<2x36x144xbf16>
    "tpu.trace_start"() <{level = 10 : i32, message = "nop,npc->noc"}> : () -> ()
    %cst_28 = arith.constant dense<0.000000e+00> : vector<2x36x32xf32>
    %57 = tpu.matmul %56, %42, %cst_28 {dimension_numbers = #tpu.dot_dimension_numbers<[2], [1], [1], [2], [0, 0, 0, 1, 1, 2], [0], [0]>} : vector<2x36x144xbf16>, vector<2x144x32xbf16>, vector<2x36x32xf32> -> vector<2x36x32xf32>
    "tpu.trace_stop"() : () -> ()
    %c3 = arith.constant 3 : index
    %c0_29 = arith.constant 0 : index
    %c0_30 = arith.constant 0 : index
    %58 = vector.load %arg2[%c3, %c0_29, %c0_30] : memref<9x36x144xbf16, #tpu.memory_space<vmem>>, vector<1x36x144xbf16>
    %59 = vector.shape_cast %58 : vector<1x36x144xbf16> to vector<36x144xbf16>
    %60 = vector.shape_cast %59 : vector<36x144xbf16> to vector<1x36x144xbf16>
    %61 = vector.broadcast %60 : vector<1x36x144xbf16> to vector<2x36x144xbf16>
    "tpu.trace_start"() <{level = 10 : i32, message = "nop,npc->noc"}> : () -> ()
    %cst_31 = arith.constant dense<0.000000e+00> : vector<2x36x32xf32>
    %62 = tpu.matmul %61, %42, %cst_31 {dimension_numbers = #tpu.dot_dimension_numbers<[2], [1], [1], [2], [0, 0, 0, 1, 1, 2], [0], [0]>} : vector<2x36x144xbf16>, vector<2x144x32xbf16>, vector<2x36x32xf32> -> vector<2x36x32xf32>
    "tpu.trace_stop"() : () -> ()
    %c4 = arith.constant 4 : index
    %c0_32 = arith.constant 0 : index
    %c0_33 = arith.constant 0 : index
    %63 = vector.load %arg2[%c4, %c0_32, %c0_33] : memref<9x36x144xbf16, #tpu.memory_space<vmem>>, vector<1x36x144xbf16>
    %64 = vector.shape_cast %63 : vector<1x36x144xbf16> to vector<36x144xbf16>
    %65 = vector.shape_cast %64 : vector<36x144xbf16> to vector<1x36x144xbf16>
    %66 = vector.broadcast %65 : vector<1x36x144xbf16> to vector<2x36x144xbf16>
    "tpu.trace_start"() <{level = 10 : i32, message = "nop,npc->noc"}> : () -> ()
    %cst_34 = arith.constant dense<0.000000e+00> : vector<2x36x32xf32>
    %67 = tpu.matmul %66, %42, %cst_34 {dimension_numbers = #tpu.dot_dimension_numbers<[2], [1], [1], [2], [0, 0, 0, 1, 1, 2], [0], [0]>} : vector<2x36x144xbf16>, vector<2x144x32xbf16>, vector<2x36x32xf32> -> vector<2x36x32xf32>
    "tpu.trace_stop"() : () -> ()
    %c5 = arith.constant 5 : index
    %c0_35 = arith.constant 0 : index
    %c0_36 = arith.constant 0 : index
    %68 = vector.load %arg2[%c5, %c0_35, %c0_36] : memref<9x36x144xbf16, #tpu.memory_space<vmem>>, vector<1x36x144xbf16>
    %69 = vector.shape_cast %68 : vector<1x36x144xbf16> to vector<36x144xbf16>
    %70 = vector.shape_cast %69 : vector<36x144xbf16> to vector<1x36x144xbf16>
    %71 = vector.broadcast %70 : vector<1x36x144xbf16> to vector<2x36x144xbf16>
    "tpu.trace_start"() <{level = 10 : i32, message = "nop,npc->noc"}> : () -> ()
    %cst_37 = arith.constant dense<0.000000e+00> : vector<2x36x32xf32>
    %72 = tpu.matmul %71, %42, %cst_37 {dimension_numbers = #tpu.dot_dimension_numbers<[2], [1], [1], [2], [0, 0, 0, 1, 1, 2], [0], [0]>} : vector<2x36x144xbf16>, vector<2x144x32xbf16>, vector<2x36x32xf32> -> vector<2x36x32xf32>
    "tpu.trace_stop"() : () -> ()
    %c6 = arith.constant 6 : index
    %c0_38 = arith.constant 0 : index
    %c0_39 = arith.constant 0 : index
    %73 = vector.load %arg2[%c6, %c0_38, %c0_39] : memref<9x36x144xbf16, #tpu.memory_space<vmem>>, vector<1x36x144xbf16>
    %74 = vector.shape_cast %73 : vector<1x36x144xbf16> to vector<36x144xbf16>
    %75 = vector.shape_cast %74 : vector<36x144xbf16> to vector<1x36x144xbf16>
    %76 = vector.broadcast %75 : vector<1x36x144xbf16> to vector<2x36x144xbf16>
    "tpu.trace_start"() <{level = 10 : i32, message = "nop,npc->noc"}> : () -> ()
    %cst_40 = arith.constant dense<0.000000e+00> : vector<2x36x32xf32>
    %77 = tpu.matmul %76, %42, %cst_40 {dimension_numbers = #tpu.dot_dimension_numbers<[2], [1], [1], [2], [0, 0, 0, 1, 1, 2], [0], [0]>} : vector<2x36x144xbf16>, vector<2x144x32xbf16>, vector<2x36x32xf32> -> vector<2x36x32xf32>
    "tpu.trace_stop"() : () -> ()
    %c7 = arith.constant 7 : index
    %c0_41 = arith.constant 0 : index
    %c0_42 = arith.constant 0 : index
    %78 = vector.load %arg2[%c7, %c0_41, %c0_42] : memref<9x36x144xbf16, #tpu.memory_space<vmem>>, vector<1x36x144xbf16>
    %79 = vector.shape_cast %78 : vector<1x36x144xbf16> to vector<36x144xbf16>
    %80 = vector.shape_cast %79 : vector<36x144xbf16> to vector<1x36x144xbf16>
    %81 = vector.broadcast %80 : vector<1x36x144xbf16> to vector<2x36x144xbf16>
    "tpu.trace_start"() <{level = 10 : i32, message = "nop,npc->noc"}> : () -> ()
    %cst_43 = arith.constant dense<0.000000e+00> : vector<2x36x32xf32>
    %82 = tpu.matmul %81, %42, %cst_43 {dimension_numbers = #tpu.dot_dimension_numbers<[2], [1], [1], [2], [0, 0, 0, 1, 1, 2], [0], [0]>} : vector<2x36x144xbf16>, vector<2x144x32xbf16>, vector<2x36x32xf32> -> vector<2x36x32xf32>
    "tpu.trace_stop"() : () -> ()
    %c8 = arith.constant 8 : index
    %c0_44 = arith.constant 0 : index
    %c0_45 = arith.constant 0 : index
    %83 = vector.load %arg2[%c8, %c0_44, %c0_45] : memref<9x36x144xbf16, #tpu.memory_space<vmem>>, vector<1x36x144xbf16>
    %84 = vector.shape_cast %83 : vector<1x36x144xbf16> to vector<36x144xbf16>
    %85 = vector.shape_cast %84 : vector<36x144xbf16> to vector<1x36x144xbf16>
    %86 = vector.broadcast %85 : vector<1x36x144xbf16> to vector<2x36x144xbf16>
    "tpu.trace_start"() <{level = 10 : i32, message = "nop,npc->noc"}> : () -> ()
    %cst_46 = arith.constant dense<0.000000e+00> : vector<2x36x32xf32>
    %87 = tpu.matmul %86, %42, %cst_46 {dimension_numbers = #tpu.dot_dimension_numbers<[2], [1], [1], [2], [0, 0, 0, 1, 1, 2], [0], [0]>} : vector<2x36x144xbf16>, vector<2x144x32xbf16>, vector<2x36x32xf32> -> vector<2x36x32xf32>
    "tpu.trace_stop"() : () -> ()
    %88 = tpu.concatenate %47, %52, %57, %62, %67, %72, %77, %82, %87 in 2 : vector<2x36x32xf32>, vector<2x36x32xf32>, vector<2x36x32xf32>, vector<2x36x32xf32>, vector<2x36x32xf32>, vector<2x36x32xf32>, vector<2x36x32xf32>, vector<2x36x32xf32>, vector<2x36x32xf32> -> vector<2x36x288xf32>
    %89 = arith.truncf %88 : vector<2x36x288xf32> to vector<2x36x288xbf16>
    %c0_47 = arith.constant 0 : index
    %c0_48 = arith.constant 0 : index
    %90 = vector.load %arg3[%c0_47, %c0_48] : memref<288x64xbf16, #tpu.memory_space<vmem>>, vector<288x64xbf16>
    %91 = vector.shape_cast %90 : vector<288x64xbf16> to vector<1x288x64xbf16>
    %92 = vector.broadcast %91 : vector<1x288x64xbf16> to vector<2x288x64xbf16>
    "tpu.trace_start"() <{level = 10 : i32, message = "nok,nkc->noc"}> : () -> ()
    %cst_49 = arith.constant dense<0.000000e+00> : vector<2x36x64xf32>
    %93 = tpu.matmul %89, %92, %cst_49 {dimension_numbers = #tpu.dot_dimension_numbers<[2], [1], [1], [2], [0, 0, 0, 1, 1, 2], [0], [0]>} : vector<2x36x288xbf16>, vector<2x288x64xbf16>, vector<2x36x64xf32> -> vector<2x36x64xf32>
    "tpu.trace_stop"() : () -> ()
    %c2_50 = arith.constant 2 : index
    %c0_51 = arith.constant 0 : index
    %94 = vector.load %arg9[%c2_50, %c0_51] : memref<8x256xf32, #tpu.memory_space<vmem>>, vector<1x64xf32>
    %c3_52 = arith.constant 3 : index
    %c0_53 = arith.constant 0 : index
    %95 = vector.load %arg9[%c3_52, %c0_53] : memref<8x256xf32, #tpu.memory_space<vmem>>, vector<1x64xf32>
    %cst_54 = arith.constant dense<0.000000e+00> : vector<2x64xf32>
    %96 = vector.multi_reduction <add>, %93, %cst_54 [1] : vector<2x36x64xf32> to vector<2x64xf32>
    %97 = vector.shape_cast %96 : vector<2x64xf32> to vector<2x1x64xf32>
    %cst_55 = arith.constant 3.600000e+01 : f32
    %98 = vector.broadcast %cst_55 : f32 to vector<2x1x64xf32>
    %99 = arith.divf %97, %98 : vector<2x1x64xf32>
    %cst_56 = arith.constant dense<0.000000e+00> : vector<1x64xf32>
    %100 = vector.multi_reduction <add>, %99, %cst_56 [0] : vector<2x1x64xf32> to vector<1x64xf32>
    %101 = vector.shape_cast %100 : vector<1x64xf32> to vector<1x1x64xf32>
    %cst_57 = arith.constant 2.000000e+00 : f32
    %102 = vector.broadcast %cst_57 : f32 to vector<1x1x64xf32>
    %103 = arith.divf %101, %102 : vector<1x1x64xf32>
    %104 = vector.broadcast %103 : vector<1x1x64xf32> to vector<2x36x64xf32>
    %105 = arith.subf %93, %104 : vector<2x36x64xf32>
    %106 = arith.mulf %105, %105 : vector<2x36x64xf32>
    %cst_58 = arith.constant dense<0.000000e+00> : vector<2x64xf32>
    %107 = vector.multi_reduction <add>, %106, %cst_58 [1] : vector<2x36x64xf32> to vector<2x64xf32>
    %108 = vector.shape_cast %107 : vector<2x64xf32> to vector<2x1x64xf32>
    %cst_59 = arith.constant 3.600000e+01 : f32
    %109 = vector.broadcast %cst_59 : f32 to vector<2x1x64xf32>
    %110 = arith.divf %108, %109 : vector<2x1x64xf32>
    %cst_60 = arith.constant dense<0.000000e+00> : vector<1x64xf32>
    %111 = vector.multi_reduction <add>, %110, %cst_60 [0] : vector<2x1x64xf32> to vector<1x64xf32>
    %112 = vector.shape_cast %111 : vector<1x64xf32> to vector<1x1x64xf32>
    %cst_61 = arith.constant 2.000000e+00 : f32
    %113 = vector.broadcast %cst_61 : f32 to vector<1x1x64xf32>
    %114 = arith.divf %112, %113 : vector<1x1x64xf32>
    %cst_62 = arith.constant 9.99999974E-6 : f32
    %115 = vector.broadcast %cst_62 : f32 to vector<1x1x64xf32>
    %116 = arith.addf %114, %115 : vector<1x1x64xf32>
    %117 = math.rsqrt %116 : vector<1x1x64xf32>
    %118 = vector.shape_cast %94 : vector<1x64xf32> to vector<1x1x64xf32>
    %119 = arith.mulf %118, %117 : vector<1x1x64xf32>
    %120 = vector.broadcast %119 : vector<1x1x64xf32> to vector<2x36x64xf32>
    %121 = arith.mulf %105, %120 : vector<2x36x64xf32>
    %122 = vector.shape_cast %95 : vector<1x64xf32> to vector<1x1x64xf32>
    %123 = vector.broadcast %122 : vector<1x1x64xf32> to vector<2x36x64xf32>
    %124 = arith.addf %121, %123 : vector<2x36x64xf32>
    %c1_63 = arith.constant 1 : index
    %125 = memref.load %arg10[%c1_63] : memref<4xf32, #tpu.memory_space<smem>>
    %cst_64 = arith.constant 0.000000e+00 : f32
    %126 = vector.broadcast %cst_64 : f32 to vector<2x36x64xf32>
    %127 = arith.cmpf ogt, %124, %126 : vector<2x36x64xf32>
    %128 = vector.broadcast %125 : f32 to vector<2x36x64xf32>
    %129 = arith.mulf %128, %124 : vector<2x36x64xf32>
    %130 = arith.select %127, %124, %129 : vector<2x36x64xi1>, vector<2x36x64xf32>
    %131 = arith.truncf %130 : vector<2x36x64xf32> to vector<2x36x64xbf16>
    %c0_65 = arith.constant 0 : index
    %c0_66 = arith.constant 0 : index
    %c0_67 = arith.constant 0 : index
    %132 = vector.load %arg4[%c0_65, %c0_66, %c0_67] : memref<9x9x36xbf16, #tpu.memory_space<vmem>>, vector<1x9x36xbf16>
    %133 = vector.shape_cast %132 : vector<1x9x36xbf16> to vector<9x36xbf16>
    %134 = vector.shape_cast %133 : vector<9x36xbf16> to vector<1x9x36xbf16>
    %135 = vector.broadcast %134 : vector<1x9x36xbf16> to vector<2x9x36xbf16>
    "tpu.trace_start"() <{level = 10 : i32, message = "nop,npc->noc"}> : () -> ()
    %cst_68 = arith.constant dense<0.000000e+00> : vector<2x9x64xf32>
    %136 = tpu.matmul %135, %131, %cst_68 {dimension_numbers = #tpu.dot_dimension_numbers<[2], [1], [1], [2], [0, 0, 0, 1, 1, 2], [0], [0]>} : vector<2x9x36xbf16>, vector<2x36x64xbf16>, vector<2x9x64xf32> -> vector<2x9x64xf32>
    "tpu.trace_stop"() : () -> ()
    %c1_69 = arith.constant 1 : index
    %c0_70 = arith.constant 0 : index
    %c0_71 = arith.constant 0 : index
    %137 = vector.load %arg4[%c1_69, %c0_70, %c0_71] : memref<9x9x36xbf16, #tpu.memory_space<vmem>>, vector<1x9x36xbf16>
    %138 = vector.shape_cast %137 : vector<1x9x36xbf16> to vector<9x36xbf16>
    %139 = vector.shape_cast %138 : vector<9x36xbf16> to vector<1x9x36xbf16>
    %140 = vector.broadcast %139 : vector<1x9x36xbf16> to vector<2x9x36xbf16>
    "tpu.trace_start"() <{level = 10 : i32, message = "nop,npc->noc"}> : () -> ()
    %cst_72 = arith.constant dense<0.000000e+00> : vector<2x9x64xf32>
    %141 = tpu.matmul %140, %131, %cst_72 {dimension_numbers = #tpu.dot_dimension_numbers<[2], [1], [1], [2], [0, 0, 0, 1, 1, 2], [0], [0]>} : vector<2x9x36xbf16>, vector<2x36x64xbf16>, vector<2x9x64xf32> -> vector<2x9x64xf32>
    "tpu.trace_stop"() : () -> ()
    %c2_73 = arith.constant 2 : index
    %c0_74 = arith.constant 0 : index
    %c0_75 = arith.constant 0 : index
    %142 = vector.load %arg4[%c2_73, %c0_74, %c0_75] : memref<9x9x36xbf16, #tpu.memory_space<vmem>>, vector<1x9x36xbf16>
    %143 = vector.shape_cast %142 : vector<1x9x36xbf16> to vector<9x36xbf16>
    %144 = vector.shape_cast %143 : vector<9x36xbf16> to vector<1x9x36xbf16>
    %145 = vector.broadcast %144 : vector<1x9x36xbf16> to vector<2x9x36xbf16>
    "tpu.trace_start"() <{level = 10 : i32, message = "nop,npc->noc"}> : () -> ()
    %cst_76 = arith.constant dense<0.000000e+00> : vector<2x9x64xf32>
    %146 = tpu.matmul %145, %131, %cst_76 {dimension_numbers = #tpu.dot_dimension_numbers<[2], [1], [1], [2], [0, 0, 0, 1, 1, 2], [0], [0]>} : vector<2x9x36xbf16>, vector<2x36x64xbf16>, vector<2x9x64xf32> -> vector<2x9x64xf32>
    "tpu.trace_stop"() : () -> ()
    %c3_77 = arith.constant 3 : index
    %c0_78 = arith.constant 0 : index
    %c0_79 = arith.constant 0 : index
    %147 = vector.load %arg4[%c3_77, %c0_78, %c0_79] : memref<9x9x36xbf16, #tpu.memory_space<vmem>>, vector<1x9x36xbf16>
    %148 = vector.shape_cast %147 : vector<1x9x36xbf16> to vector<9x36xbf16>
    %149 = vector.shape_cast %148 : vector<9x36xbf16> to vector<1x9x36xbf16>
    %150 = vector.broadcast %149 : vector<1x9x36xbf16> to vector<2x9x36xbf16>
    "tpu.trace_start"() <{level = 10 : i32, message = "nop,npc->noc"}> : () -> ()
    %cst_80 = arith.constant dense<0.000000e+00> : vector<2x9x64xf32>
    %151 = tpu.matmul %150, %131, %cst_80 {dimension_numbers = #tpu.dot_dimension_numbers<[2], [1], [1], [2], [0, 0, 0, 1, 1, 2], [0], [0]>} : vector<2x9x36xbf16>, vector<2x36x64xbf16>, vector<2x9x64xf32> -> vector<2x9x64xf32>
    "tpu.trace_stop"() : () -> ()
    %c4_81 = arith.constant 4 : index
    %c0_82 = arith.constant 0 : index
    %c0_83 = arith.constant 0 : index
    %152 = vector.load %arg4[%c4_81, %c0_82, %c0_83] : memref<9x9x36xbf16, #tpu.memory_space<vmem>>, vector<1x9x36xbf16>
    %153 = vector.shape_cast %152 : vector<1x9x36xbf16> to vector<9x36xbf16>
    %154 = vector.shape_cast %153 : vector<9x36xbf16> to vector<1x9x36xbf16>
    %155 = vector.broadcast %154 : vector<1x9x36xbf16> to vector<2x9x36xbf16>
    "tpu.trace_start"() <{level = 10 : i32, message = "nop,npc->noc"}> : () -> ()
    %cst_84 = arith.constant dense<0.000000e+00> : vector<2x9x64xf32>
    %156 = tpu.matmul %155, %131, %cst_84 {dimension_numbers = #tpu.dot_dimension_numbers<[2], [1], [1], [2], [0, 0, 0, 1, 1, 2], [0], [0]>} : vector<2x9x36xbf16>, vector<2x36x64xbf16>, vector<2x9x64xf32> -> vector<2x9x64xf32>
    "tpu.trace_stop"() : () -> ()
    %c5_85 = arith.constant 5 : index
    %c0_86 = arith.constant 0 : index
    %c0_87 = arith.constant 0 : index
    %157 = vector.load %arg4[%c5_85, %c0_86, %c0_87] : memref<9x9x36xbf16, #tpu.memory_space<vmem>>, vector<1x9x36xbf16>
    %158 = vector.shape_cast %157 : vector<1x9x36xbf16> to vector<9x36xbf16>
    %159 = vector.shape_cast %158 : vector<9x36xbf16> to vector<1x9x36xbf16>
    %160 = vector.broadcast %159 : vector<1x9x36xbf16> to vector<2x9x36xbf16>
    "tpu.trace_start"() <{level = 10 : i32, message = "nop,npc->noc"}> : () -> ()
    %cst_88 = arith.constant dense<0.000000e+00> : vector<2x9x64xf32>
    %161 = tpu.matmul %160, %131, %cst_88 {dimension_numbers = #tpu.dot_dimension_numbers<[2], [1], [1], [2], [0, 0, 0, 1, 1, 2], [0], [0]>} : vector<2x9x36xbf16>, vector<2x36x64xbf16>, vector<2x9x64xf32> -> vector<2x9x64xf32>
    "tpu.trace_stop"() : () -> ()
    %c6_89 = arith.constant 6 : index
    %c0_90 = arith.constant 0 : index
    %c0_91 = arith.constant 0 : index
    %162 = vector.load %arg4[%c6_89, %c0_90, %c0_91] : memref<9x9x36xbf16, #tpu.memory_space<vmem>>, vector<1x9x36xbf16>
    %163 = vector.shape_cast %162 : vector<1x9x36xbf16> to vector<9x36xbf16>
    %164 = vector.shape_cast %163 : vector<9x36xbf16> to vector<1x9x36xbf16>
    %165 = vector.broadcast %164 : vector<1x9x36xbf16> to vector<2x9x36xbf16>
    "tpu.trace_start"() <{level = 10 : i32, message = "nop,npc->noc"}> : () -> ()
    %cst_92 = arith.constant dense<0.000000e+00> : vector<2x9x64xf32>
    %166 = tpu.matmul %165, %131, %cst_92 {dimension_numbers = #tpu.dot_dimension_numbers<[2], [1], [1], [2], [0, 0, 0, 1, 1, 2], [0], [0]>} : vector<2x9x36xbf16>, vector<2x36x64xbf16>, vector<2x9x64xf32> -> vector<2x9x64xf32>
    "tpu.trace_stop"() : () -> ()
    %c7_93 = arith.constant 7 : index
    %c0_94 = arith.constant 0 : index
    %c0_95 = arith.constant 0 : index
    %167 = vector.load %arg4[%c7_93, %c0_94, %c0_95] : memref<9x9x36xbf16, #tpu.memory_space<vmem>>, vector<1x9x36xbf16>
    %168 = vector.shape_cast %167 : vector<1x9x36xbf16> to vector<9x36xbf16>
    %169 = vector.shape_cast %168 : vector<9x36xbf16> to vector<1x9x36xbf16>
    %170 = vector.broadcast %169 : vector<1x9x36xbf16> to vector<2x9x36xbf16>
    "tpu.trace_start"() <{level = 10 : i32, message = "nop,npc->noc"}> : () -> ()
    %cst_96 = arith.constant dense<0.000000e+00> : vector<2x9x64xf32>
    %171 = tpu.matmul %170, %131, %cst_96 {dimension_numbers = #tpu.dot_dimension_numbers<[2], [1], [1], [2], [0, 0, 0, 1, 1, 2], [0], [0]>} : vector<2x9x36xbf16>, vector<2x36x64xbf16>, vector<2x9x64xf32> -> vector<2x9x64xf32>
    "tpu.trace_stop"() : () -> ()
    %c8_97 = arith.constant 8 : index
    %c0_98 = arith.constant 0 : index
    %c0_99 = arith.constant 0 : index
    %172 = vector.load %arg4[%c8_97, %c0_98, %c0_99] : memref<9x9x36xbf16, #tpu.memory_space<vmem>>, vector<1x9x36xbf16>
    %173 = vector.shape_cast %172 : vector<1x9x36xbf16> to vector<9x36xbf16>
    %174 = vector.shape_cast %173 : vector<9x36xbf16> to vector<1x9x36xbf16>
    %175 = vector.broadcast %174 : vector<1x9x36xbf16> to vector<2x9x36xbf16>
    "tpu.trace_start"() <{level = 10 : i32, message = "nop,npc->noc"}> : () -> ()
    %cst_100 = arith.constant dense<0.000000e+00> : vector<2x9x64xf32>
    %176 = tpu.matmul %175, %131, %cst_100 {dimension_numbers = #tpu.dot_dimension_numbers<[2], [1], [1], [2], [0, 0, 0, 1, 1, 2], [0], [0]>} : vector<2x9x36xbf16>, vector<2x36x64xbf16>, vector<2x9x64xf32> -> vector<2x9x64xf32>
    "tpu.trace_stop"() : () -> ()
    %177 = tpu.concatenate %136, %141, %146, %151, %156, %161, %166, %171, %176 in 2 : vector<2x9x64xf32>, vector<2x9x64xf32>, vector<2x9x64xf32>, vector<2x9x64xf32>, vector<2x9x64xf32>, vector<2x9x64xf32>, vector<2x9x64xf32>, vector<2x9x64xf32>, vector<2x9x64xf32> -> vector<2x9x576xf32>
    %178 = arith.truncf %177 : vector<2x9x576xf32> to vector<2x9x576xbf16>
    %c0_101 = arith.constant 0 : index
    %c0_102 = arith.constant 0 : index
    %179 = vector.load %arg5[%c0_101, %c0_102] : memref<576x128xbf16, #tpu.memory_space<vmem>>, vector<576x128xbf16>
    %180 = vector.shape_cast %179 : vector<576x128xbf16> to vector<1x576x128xbf16>
    %181 = vector.broadcast %180 : vector<1x576x128xbf16> to vector<2x576x128xbf16>
    "tpu.trace_start"() <{level = 10 : i32, message = "nok,nkc->noc"}> : () -> ()
    %cst_103 = arith.constant dense<0.000000e+00> : vector<2x9x128xf32>
    %182 = tpu.matmul %178, %181, %cst_103 {dimension_numbers = #tpu.dot_dimension_numbers<[2], [1], [1], [2], [0, 0, 0, 1, 1, 2], [0], [0]>} : vector<2x9x576xbf16>, vector<2x576x128xbf16>, vector<2x9x128xf32> -> vector<2x9x128xf32>
    "tpu.trace_stop"() : () -> ()
    %c4_104 = arith.constant 4 : index
    %c0_105 = arith.constant 0 : index
    %183 = vector.load %arg9[%c4_104, %c0_105] : memref<8x256xf32, #tpu.memory_space<vmem>>, vector<1x128xf32>
    %c5_106 = arith.constant 5 : index
    %c0_107 = arith.constant 0 : index
    %184 = vector.load %arg9[%c5_106, %c0_107] : memref<8x256xf32, #tpu.memory_space<vmem>>, vector<1x128xf32>
    %cst_108 = arith.constant dense<0.000000e+00> : vector<2x128xf32>
    %185 = vector.multi_reduction <add>, %182, %cst_108 [1] : vector<2x9x128xf32> to vector<2x128xf32>
    %186 = vector.shape_cast %185 : vector<2x128xf32> to vector<2x1x128xf32>
    %cst_109 = arith.constant 9.000000e+00 : f32
    %187 = vector.broadcast %cst_109 : f32 to vector<2x1x128xf32>
    %188 = arith.divf %186, %187 : vector<2x1x128xf32>
    %cst_110 = arith.constant dense<0.000000e+00> : vector<1x128xf32>
    %189 = vector.multi_reduction <add>, %188, %cst_110 [0] : vector<2x1x128xf32> to vector<1x128xf32>
    %190 = vector.shape_cast %189 : vector<1x128xf32> to vector<1x1x128xf32>
    %cst_111 = arith.constant 2.000000e+00 : f32
    %191 = vector.broadcast %cst_111 : f32 to vector<1x1x128xf32>
    %192 = arith.divf %190, %191 : vector<1x1x128xf32>
    %193 = vector.broadcast %192 : vector<1x1x128xf32> to vector<2x9x128xf32>
    %194 = arith.subf %182, %193 : vector<2x9x128xf32>
    %195 = arith.mulf %194, %194 : vector<2x9x128xf32>
    %cst_112 = arith.constant dense<0.000000e+00> : vector<2x128xf32>
    %196 = vector.multi_reduction <add>, %195, %cst_112 [1] : vector<2x9x128xf32> to vector<2x128xf32>
    %197 = vector.shape_cast %196 : vector<2x128xf32> to vector<2x1x128xf32>
    %cst_113 = arith.constant 9.000000e+00 : f32
    %198 = vector.broadcast %cst_113 : f32 to vector<2x1x128xf32>
    %199 = arith.divf %197, %198 : vector<2x1x128xf32>
    %cst_114 = arith.constant dense<0.000000e+00> : vector<1x128xf32>
    %200 = vector.multi_reduction <add>, %199, %cst_114 [0] : vector<2x1x128xf32> to vector<1x128xf32>
    %201 = vector.shape_cast %200 : vector<1x128xf32> to vector<1x1x128xf32>
    %cst_115 = arith.constant 2.000000e+00 : f32
    %202 = vector.broadcast %cst_115 : f32 to vector<1x1x128xf32>
    %203 = arith.divf %201, %202 : vector<1x1x128xf32>
    %cst_116 = arith.constant 9.99999974E-6 : f32
    %204 = vector.broadcast %cst_116 : f32 to vector<1x1x128xf32>
    %205 = arith.addf %203, %204 : vector<1x1x128xf32>
    %206 = math.rsqrt %205 : vector<1x1x128xf32>
    %207 = vector.shape_cast %183 : vector<1x128xf32> to vector<1x1x128xf32>
    %208 = arith.mulf %207, %206 : vector<1x1x128xf32>
    %209 = vector.broadcast %208 : vector<1x1x128xf32> to vector<2x9x128xf32>
    %210 = arith.mulf %194, %209 : vector<2x9x128xf32>
    %211 = vector.shape_cast %184 : vector<1x128xf32> to vector<1x1x128xf32>
    %212 = vector.broadcast %211 : vector<1x1x128xf32> to vector<2x9x128xf32>
    %213 = arith.addf %210, %212 : vector<2x9x128xf32>
    %c2_117 = arith.constant 2 : index
    %214 = memref.load %arg10[%c2_117] : memref<4xf32, #tpu.memory_space<smem>>
    %cst_118 = arith.constant 0.000000e+00 : f32
    %215 = vector.broadcast %cst_118 : f32 to vector<2x9x128xf32>
    %216 = arith.cmpf ogt, %213, %215 : vector<2x9x128xf32>
    %217 = vector.broadcast %214 : f32 to vector<2x9x128xf32>
    %218 = arith.mulf %217, %213 : vector<2x9x128xf32>
    %219 = arith.select %216, %213, %218 : vector<2x9x128xi1>, vector<2x9x128xf32>
    %220 = arith.truncf %219 : vector<2x9x128xf32> to vector<2x9x128xbf16>
    %221 = vector.extract_strided_slice %220 {offsets = [0, 0, 0], sizes = [2, 1, 128], strides = [1, 1, 1]} : vector<2x9x128xbf16> to vector<2x1x128xbf16>
    %222 = vector.extract_strided_slice %220 {offsets = [0, 1, 0], sizes = [2, 1, 128], strides = [1, 1, 1]} : vector<2x9x128xbf16> to vector<2x1x128xbf16>
    %223 = vector.extract_strided_slice %220 {offsets = [0, 2, 0], sizes = [2, 1, 128], strides = [1, 1, 1]} : vector<2x9x128xbf16> to vector<2x1x128xbf16>
    %224 = vector.extract_strided_slice %220 {offsets = [0, 3, 0], sizes = [2, 1, 128], strides = [1, 1, 1]} : vector<2x9x128xbf16> to vector<2x1x128xbf16>
    %225 = vector.extract_strided_slice %220 {offsets = [0, 4, 0], sizes = [2, 1, 128], strides = [1, 1, 1]} : vector<2x9x128xbf16> to vector<2x1x128xbf16>
    %226 = vector.extract_strided_slice %220 {offsets = [0, 5, 0], sizes = [2, 1, 128], strides = [1, 1, 1]} : vector<2x9x128xbf16> to vector<2x1x128xbf16>
    %227 = vector.extract_strided_slice %220 {offsets = [0, 6, 0], sizes = [2, 1, 128], strides = [1, 1, 1]} : vector<2x9x128xbf16> to vector<2x1x128xbf16>
    %228 = vector.extract_strided_slice %220 {offsets = [0, 7, 0], sizes = [2, 1, 128], strides = [1, 1, 1]} : vector<2x9x128xbf16> to vector<2x1x128xbf16>
    %229 = vector.extract_strided_slice %220 {offsets = [0, 8, 0], sizes = [2, 1, 128], strides = [1, 1, 1]} : vector<2x9x128xbf16> to vector<2x1x128xbf16>
    %230 = tpu.concatenate %221, %222, %223, %224, %225, %226, %227, %228, %229 in 2 : vector<2x1x128xbf16>, vector<2x1x128xbf16>, vector<2x1x128xbf16>, vector<2x1x128xbf16>, vector<2x1x128xbf16>, vector<2x1x128xbf16>, vector<2x1x128xbf16>, vector<2x1x128xbf16>, vector<2x1x128xbf16> -> vector<2x1x1152xbf16>
    %c0_119 = arith.constant 0 : index
    %c0_120 = arith.constant 0 : index
    %231 = vector.load %arg6[%c0_119, %c0_120] : memref<1152x256xbf16, #tpu.memory_space<vmem>>, vector<1152x256xbf16>
    %232 = vector.shape_cast %231 : vector<1152x256xbf16> to vector<1x1152x256xbf16>
    %233 = vector.broadcast %232 : vector<1x1152x256xbf16> to vector<2x1152x256xbf16>
    "tpu.trace_start"() <{level = 10 : i32, message = "nok,nkc->noc"}> : () -> ()
    %cst_121 = arith.constant dense<0.000000e+00> : vector<2x1x256xf32>
    %234 = tpu.matmul %230, %233, %cst_121 {dimension_numbers = #tpu.dot_dimension_numbers<[2], [1], [1], [2], [0, 0, 0, 1, 1, 2], [0], [0]>} : vector<2x1x1152xbf16>, vector<2x1152x256xbf16>, vector<2x1x256xf32> -> vector<2x1x256xf32>
    "tpu.trace_stop"() : () -> ()
    %c6_122 = arith.constant 6 : index
    %c0_123 = arith.constant 0 : index
    %235 = vector.load %arg9[%c6_122, %c0_123] : memref<8x256xf32, #tpu.memory_space<vmem>>, vector<1x256xf32>
    %c7_124 = arith.constant 7 : index
    %c0_125 = arith.constant 0 : index
    %236 = vector.load %arg9[%c7_124, %c0_125] : memref<8x256xf32, #tpu.memory_space<vmem>>, vector<1x256xf32>
    %cst_126 = arith.constant dense<0.000000e+00> : vector<2x256xf32>
    %237 = vector.multi_reduction <add>, %234, %cst_126 [1] : vector<2x1x256xf32> to vector<2x256xf32>
    %238 = vector.shape_cast %237 : vector<2x256xf32> to vector<2x1x256xf32>
    %cst_127 = arith.constant 1.000000e+00 : f32
    %239 = vector.broadcast %cst_127 : f32 to vector<2x1x256xf32>
    %240 = arith.divf %238, %239 : vector<2x1x256xf32>
    %cst_128 = arith.constant dense<0.000000e+00> : vector<1x256xf32>
    %241 = vector.multi_reduction <add>, %240, %cst_128 [0] : vector<2x1x256xf32> to vector<1x256xf32>
    %242 = vector.shape_cast %241 : vector<1x256xf32> to vector<1x1x256xf32>
    %cst_129 = arith.constant 2.000000e+00 : f32
    %243 = vector.broadcast %cst_129 : f32 to vector<1x1x256xf32>
    %244 = arith.divf %242, %243 : vector<1x1x256xf32>
    %245 = vector.broadcast %244 : vector<1x1x256xf32> to vector<2x1x256xf32>
    %246 = arith.subf %234, %245 : vector<2x1x256xf32>
    %247 = arith.mulf %246, %246 : vector<2x1x256xf32>
    %cst_130 = arith.constant dense<0.000000e+00> : vector<2x256xf32>
    %248 = vector.multi_reduction <add>, %247, %cst_130 [1] : vector<2x1x256xf32> to vector<2x256xf32>
    %249 = vector.shape_cast %248 : vector<2x256xf32> to vector<2x1x256xf32>
    %cst_131 = arith.constant 1.000000e+00 : f32
    %250 = vector.broadcast %cst_131 : f32 to vector<2x1x256xf32>
    %251 = arith.divf %249, %250 : vector<2x1x256xf32>
    %cst_132 = arith.constant dense<0.000000e+00> : vector<1x256xf32>
    %252 = vector.multi_reduction <add>, %251, %cst_132 [0] : vector<2x1x256xf32> to vector<1x256xf32>
    %253 = vector.shape_cast %252 : vector<1x256xf32> to vector<1x1x256xf32>
    %cst_133 = arith.constant 2.000000e+00 : f32
    %254 = vector.broadcast %cst_133 : f32 to vector<1x1x256xf32>
    %255 = arith.divf %253, %254 : vector<1x1x256xf32>
    %cst_134 = arith.constant 9.99999974E-6 : f32
    %256 = vector.broadcast %cst_134 : f32 to vector<1x1x256xf32>
    %257 = arith.addf %255, %256 : vector<1x1x256xf32>
    %258 = math.rsqrt %257 : vector<1x1x256xf32>
    %259 = vector.shape_cast %235 : vector<1x256xf32> to vector<1x1x256xf32>
    %260 = arith.mulf %259, %258 : vector<1x1x256xf32>
    %261 = vector.broadcast %260 : vector<1x1x256xf32> to vector<2x1x256xf32>
    %262 = arith.mulf %246, %261 : vector<2x1x256xf32>
    %263 = vector.shape_cast %236 : vector<1x256xf32> to vector<1x1x256xf32>
    %264 = vector.broadcast %263 : vector<1x1x256xf32> to vector<2x1x256xf32>
    %265 = arith.addf %262, %264 : vector<2x1x256xf32>
    %c3_135 = arith.constant 3 : index
    %266 = memref.load %arg10[%c3_135] : memref<4xf32, #tpu.memory_space<smem>>
    %cst_136 = arith.constant 0.000000e+00 : f32
    %267 = vector.broadcast %cst_136 : f32 to vector<2x1x256xf32>
    %268 = arith.cmpf ogt, %265, %267 : vector<2x1x256xf32>
    %269 = vector.broadcast %266 : f32 to vector<2x1x256xf32>
    %270 = arith.mulf %269, %265 : vector<2x1x256xf32>
    %271 = arith.select %268, %265, %270 : vector<2x1x256xi1>, vector<2x1x256xf32>
    %272 = arith.truncf %271 : vector<2x1x256xf32> to vector<2x1x256xbf16>
    %c0_137 = arith.constant 0 : index
    %c0_138 = arith.constant 0 : index
    %273 = vector.load %arg7[%c0_137, %c0_138] : memref<256x128xbf16, #tpu.memory_space<vmem>>, vector<256x128xbf16>
    %274 = vector.shape_cast %273 : vector<256x128xbf16> to vector<1x256x128xbf16>
    %275 = vector.broadcast %274 : vector<1x256x128xbf16> to vector<2x256x128xbf16>
    "tpu.trace_start"() <{level = 10 : i32, message = "nok,nkc->noc"}> : () -> ()
    %cst_139 = arith.constant dense<0.000000e+00> : vector<2x1x128xf32>
    %276 = tpu.matmul %272, %275, %cst_139 {dimension_numbers = #tpu.dot_dimension_numbers<[2], [1], [1], [2], [0, 0, 0, 1, 1, 2], [0], [0]>} : vector<2x1x256xbf16>, vector<2x256x128xbf16>, vector<2x1x128xf32> -> vector<2x1x128xf32>
    "tpu.trace_stop"() : () -> ()
    %c0_140 = arith.constant 0 : index
    %c0_141 = arith.constant 0 : index
    %c0_142 = arith.constant 0 : index
    %277 = vector.load %arg8[%c0_140, %c0_141, %c0_142] : memref<1x1x128xf32, #tpu.memory_space<vmem>>, vector<1x1x128xf32>
    %278 = vector.broadcast %277 : vector<1x1x128xf32> to vector<2x1x128xf32>
    %279 = arith.addf %276, %278 : vector<2x1x128xf32>
    %c0_143 = arith.constant 0 : index
    %c0_144 = arith.constant 0 : index
    %c0_145 = arith.constant 0 : index
    %280 = vector.load %arg11[%c0_143, %c0_144, %c0_145] : memref<2x1x128xf32, #tpu.memory_space<vmem>>, vector<2x1x128xf32>
    tpu.vector_store %arg11[%c0_143, %c0_144, %c0_145], %279 {strides = array<i32>} : memref<2x1x128xf32, #tpu.memory_space<vmem>>, vector<2x1x128xf32>,
    return
  }
}

</mosaic_0001>

<bundles_post_ra>
// kernel: encoder_forward.1
= control target key start
LH: loop header
LB: loop body
LE: loop exit
PB: predicated region body
PF: predicated region fallthrough
CT: control target
= control target key end

     0   :  { %16 = vsyncpa [#allocation4], 0  ;;  %s11142_s0 = inlined_call_operand.vmem [shape: bf16[2,144,27], index: 0, kind: input, shape index: {}]   ;;  %s11143_s1 = inlined_call_operand.vmem [shape: bf16[27,32], index: 1, kind: input, shape index: {}]   ;;  %s11144_s2 = inlined_call_operand.vmem [shape: bf16[9,36,144], index: 2, kind: input, shape index: {}]   ;;  %s11145_s3 = inlined_call_operand.vmem [shape: bf16[288,64], index: 3, kind: input, shape index: {}]   ;;  %s11146_s4 = inlined_call_operand.vmem [shape: bf16[9,9,36], index: 4, kind: input, shape index: {}]   ;;  %s11147_s5 = inlined_call_operand.vmem [shape: bf16[576,128], index: 5, kind: input, shape index: {}]   ;;  %s11148_s6 = inlined_call_operand.vmem [shape: bf16[1152,256], index: 6, kind: input, shape index: {}]   ;;  %s11149_s7 = inlined_call_operand.vmem [shape: bf16[256,128], index: 7, kind: input, shape index: {}]   ;;  %s11150_s8 = inlined_call_operand.vmem [shape: f32[1,1,128], index: 8, kind: input, shape index: {}]   ;;  %s11151_s9 = inlined_call_operand.vmem [shape: f32[8,256], index: 9, kind: input, shape index: {}]   ;;  %s11152_s10 = inlined_call_operand.vmem [shape: f32[4], index: 10, kind: input, shape index: {}]   ;;  %s11153_s11 = inlined_call_operand.hbm [shape: f32[2,1,128], index: 11, kind: output, shape index: {}]  }
   0x1   :  { %17 = vsyncpa [#allocation3], 0  ;;  %s44_s19 = sshll.u32 %s11152_s10, 4  ;;  %s45_s19 = int_to_ptr.vmem [resolvable:$true] %s44_s19 }
   0x2   :  { %s8061_s20 = scalar_lea.vmem %s45_s19, 16  ;;  %p8066_p1 = scmp.lt.s32.totalorder %s45_s19, %s45_s19 }
   0x3   :  { %p8062_p0 = scmp.ne.s32.totalorder %s45_s19, %s8061_s20  ;;  %p8067_p2 = scmp.lt.s32.totalorder %s8061_s20, %s8061_s20 }
   0x5   :  { %p8068_p3 = por %p8067_p2, %p8066_p1 }
   0x7   :  { %p8069_p4 = pnand %p8068_p3, %p8062_p0 }
   0x9   :  { %8072 = shalt.err (!%p8069_p4)
}
   0xa   :  { %s8099_s21 = smov [#allocation2]  }
   0xb   :  { %47 = dma.vmem_to_smem %s45_s19, 16, %s8099_s21, [#allocation4]  }
   0xc   :  { %8095 = dma.done.wait [#allocation4], 16  }
   0xd   :  { %8096 = vsyncadd [#allocation4], 4294967280 }
   0xe   :  { %51 = sfence }
   0xf   :  { %v7664_v0 = vld [vmem:[%s11143_s1] sm:$0xff]   ;;  %v11156_v1 = vmov 0.0   ;;  %v7665_v2 = vld [vmem:[%s11143_s1 + $0x8] sm:$0x3f]   ;;  %vm177_vm0 = vcmask 1044480   ;;  %vm178_vm1 = vcmask 1045504  }
  0x10   :  { %7114 = vmatprep.subr.bf16.mxu0 %v11156_v1  ;;  %7154 = vmatprep.subr.bf16.mxu1 %v11156_v1  ;;  %v8101_v3 = vmov 65535   ;;  %vm8102_vm2 = vmmov 0   ;;  %v7666_v6 = vld [vmem:[%s11142_s0] sm:$0xff]   ;;  %v7667_v8 = vld [vmem:[%s11142_s0 + $0x48] sm:$0xff]   ;;  %vm149_vm3 = vcmask 220160   ;;  %v7669_v10 = vld [vmem:[%s11142_s0 + $0x50] sm:$0xff]  }
  0x11   :  { %7115 = vmatpush3.bf16.msra.mxu0 %v7664_v0  ;;  %7155 = vmatpush3.bf16.msra.mxu1 %v7664_v0  ;;  %v179_v4 = vsel %vm177_vm0, 4294967295, %v8101_v3  ;;  %v7668_v9 = vld [vmem:[%s11142_s0 + $0x8] sm:$0xff]   ;;  %v7670_v11 = vld [vmem:[%s11142_s0 + $0x10] sm:$0xff]   ;;  %v7671_v12 = vld [vmem:[%s11142_s0 + $0x58] sm:$0xff]   ;;  %vm468_vm4 = vcmask 261120   ;;  %vm951_vm5 = vcmask 130048  }
  0x12   :  { %7116 = vmatprep.subr.bf16.mxu0 %v11156_v1  ;;  %7156 = vmatprep.subr.bf16.mxu1 %v11156_v1  ;;  %v180_v5 = vsel %vm178_vm1, %v179_v4, 0  ;;  %v7672_v13 = vld [vmem:[%s11142_s0 + $0x18] sm:$0xff]   ;;  %v7673_v14 = vld [vmem:[%s11142_s0 + $0x60] sm:$0xff]   ;;  %v7675_v16 = vld [vmem:[%s11142_s0 + $0x68] sm:$0xff]   ;;  %s794_s23 = sld [smem:[#allocation2]]  ;;  %s8104_s13 = smov 32  }
  0x13   :  { %7118 = vmatprep.mubr.msk.bf16.mxu0 %vm8102_vm2, %v11156_v1  ;;  %7158 = vmatprep.mubr.msk.bf16.mxu1 %vm8102_vm2, %v11156_v1  ;;  %v182_v7 = vand.u32 %v7665_v2, %v180_v5  ;;  %v7674_v15 = vld [vmem:[%s11142_s0 + $0x20] sm:$0xff]   ;;  %v7676_v17 = vld [vmem:[%s11142_s0 + $0x28] sm:$0xff]   ;;  %v7677_v18 = vld [vmem:[%s11142_s0 + $0x70] sm:$0xff]   ;;  %s6636_s30 = sld [smem:[#allocation2 + $0x2]]  ;;  %s6783_s28 = sld [smem:[#allocation2 + $0x3]] }
  0x14   :  { %v7678_v19 = vld [vmem:[%s11142_s0 + $0x30] sm:$0xff]   ;;  %v7679_v20 = vld [vmem:[%s11142_s0 + $0x78] sm:$0xff]   ;;  %v7681_v22 = vld [vmem:[%s11142_s0 + $0x80] sm:$0xff]   ;;  %s8108_s14 = smov [#allocation5]  }
  0x15   :  { %7117 = vmatpush3.bf16.msra.mxu0 %v182_v7  ;;  %7157 = vmatpush3.bf16.msra.mxu1 %v182_v7  ;;  %v7680_v21 = vld [vmem:[%s11142_s0 + $0x38] sm:$0xff]   ;;  %v7682_v23 = vld [vmem:[%s11142_s0 + $0x40] sm:$0xff]   ;;  %v7683_v24 = vld [vmem:[%s11142_s0 + $0x88] sm:$0xff]   ;;  %s6332_s15 = sshll.u32 %s8108_s14, 4  ;;  %s6333_s15 = int_to_ptr.vmem [resolvable:$true] %s6332_s15 }
  0x16   :  { %p8078_p6 = scmp.lt.s32.totalorder %s6333_s15, %s6333_s15 }
  0x18   :  { %7119 = vmatmul.mubr.msk.bf16.vlgmr.msra.gmra.mrb[0].mxu0 %vm149_vm3, %v7666_v6  ;;  %7159 = vmatmul.mubr.msk.bf16.vlgmr.msra.gmra.mrb[0].mxu1 %vm149_vm3, %v7667_v8 }
  0x19   :  { %7122 = vmatprep.mubr.msk.bf16.mxu0 %vm8102_vm2, %v11156_v1  ;;  %7162 = vmatprep.mubr.msk.bf16.mxu1 %vm8102_vm2, %v11156_v1 }
  0x20   :  { %7123 = vmatmul.mubr.msk.bf16.gmra.mrb[4].mxu0 %vm149_vm3, %v7668_v9  ;;  %7163 = vmatmul.mubr.msk.bf16.gmra.mrb[4].mxu1 %vm149_vm3, %v7669_v10 }
  0x21   :  { %7126 = vmatprep.mubr.msk.bf16.mxu0 %vm8102_vm2, %v11156_v1  ;;  %7166 = vmatprep.mubr.msk.bf16.mxu1 %vm8102_vm2, %v11156_v1 }
  0x28   :  { %7127 = vmatmul.mubr.msk.bf16.gmra.mrb[8].mxu0 %vm149_vm3, %v7670_v11  ;;  %7167 = vmatmul.mubr.msk.bf16.gmra.mrb[8].mxu1 %vm149_vm3, %v7671_v12 }
  0x29   :  { %7130 = vmatprep.mubr.msk.bf16.mxu0 %vm8102_vm2, %v11156_v1  ;;  %7170 = vmatprep.mubr.msk.bf16.mxu1 %vm8102_vm2, %v11156_v1 }
  0x30   :  { %7131 = vmatmul.mubr.msk.bf16.gmra.mrb[12].mxu0 %vm149_vm3, %v7672_v13  ;;  %7171 = vmatmul.mubr.msk.bf16.gmra.mrb[12].mxu1 %vm149_vm3, %v7673_v14 }
  0x31   :  { %7134 = vmatprep.mubr.msk.bf16.mxu0 %vm8102_vm2, %v11156_v1  ;;  %7174 = vmatprep.mubr.msk.bf16.mxu1 %vm8102_vm2, %v11156_v1 }
  0x38   :  { %7135 = vmatmul.mubr.msk.bf16.gmra.mrb[16].mxu0 %vm149_vm3, %v7674_v15  ;;  %7175 = vmatmul.mubr.msk.bf16.gmra.mrb[16].mxu1 %vm149_vm3, %v7675_v16 }
  0x39   :  { %7138 = vmatprep.mubr.msk.bf16.mxu0 %vm8102_vm2, %v11156_v1  ;;  %7178 = vmatprep.mubr.msk.bf16.mxu1 %vm8102_vm2, %v11156_v1 }
  0x40   :  { %7139 = vmatmul.mubr.msk.bf16.gmra.mrb[20].mxu0 %vm149_vm3, %v7676_v17  ;;  %7179 = vmatmul.mubr.msk.bf16.gmra.mrb[20].mxu1 %vm149_vm3, %v7677_v18 }
  0x41   :  { %7142 = vmatprep.mubr.msk.bf16.mxu0 %vm8102_vm2, %v11156_v1  ;;  %7182 = vmatprep.mubr.msk.bf16.mxu1 %vm8102_vm2, %v11156_v1 }
  0x48   :  { %7143 = vmatmul.mubr.msk.bf16.gmra.mrb[24].mxu0 %vm149_vm3, %v7678_v19  ;;  %7183 = vmatmul.mubr.msk.bf16.gmra.mrb[24].mxu1 %vm149_vm3, %v7679_v20 }
  0x49   :  { %7146 = vmatprep.mubr.msk.bf16.mxu0 %vm8102_vm2, %v11156_v1  ;;  %7186 = vmatprep.mubr.msk.bf16.mxu1 %vm8102_vm2, %v11156_v1 }
  0x50   :  { %7147 = vmatmul.mubr.msk.bf16.gmra.mrb[28].mxu0 %vm149_vm3, %v7680_v21  ;;  %7187 = vmatmul.mubr.msk.bf16.gmra.mrb[28].mxu1 %vm149_vm3, %v7681_v22 }
  0x51   :  { %7150 = vmatprep.mubr.msk.bf16.mxu0 %vm8102_vm2, %v11156_v1  ;;  %7190 = vmatprep.mubr.msk.bf16.mxu1 %vm8102_vm2, %v11156_v1 }
  0x58   :  { %7151 = vmatmul.mubr.msk.bf16.gmra.mrb[32].mxu0 %vm149_vm3, %v7682_v23  ;;  %7191 = vmatmul.mubr.msk.bf16.gmra.mrb[32].mxu1 %vm149_vm3, %v7683_v24 }
  0xeb   :  { %v8292_v25 = vpop.f32.mrb[0].mxu0  ;;  %v8294_v26 = vpop.f32.mrb[0].mxu1 }
  0xec   :  { %v7120_v27 = vpop.f32.mrb[1].mxu0  ;;  %v7160_v28 = vpop.f32.mrb[1].mxu1  ;;  %v469_v31 = vsel %vm468_vm4, %v8292_v25, 0.0  ;;  %v510_v32 = vsel %vm468_vm4, %v8294_v26, 0.0 }
  0xed   :  { %v8296_v29 = vpop.f32.mrb[2].mxu0  ;;  %v8298_v30 = vpop.f32.mrb[2].mxu1 }
  0xee   :  { %v470_v33 = vsel %vm468_vm4, %v8296_v29, 0.0  ;;  %v511_v34 = vsel %vm468_vm4, %v8298_v30, 0.0  ;;  %v7121_v35 = vpop.f32.mrb[3].mxu0  ;;  %v7161_v36 = vpop.f32.mrb[3].mxu1 }
  0xef   :  { %v471_v37 = vadd.f32 %v470_v33, %v469_v31  ;;  %v512_v38 = vadd.f32 %v511_v34, %v510_v32 }
  0xf3   :  { %v8308_v39 = vpop.f32.mrb[4].mxu0  ;;  %v8310_v40 = vpop.f32.mrb[4].mxu1 }
  0xf4   :  { %v472_v41 = vsel %vm468_vm4, %v8308_v39, 0.0  ;;  %v513_v42 = vsel %vm468_vm4, %v8310_v40, 0.0  ;;  %v7124_v43 = vpop.f32.mrb[5].mxu0  ;;  %v7164_v44 = vpop.f32.mrb[5].mxu1 }
  0xf5   :  { %v473_v45 = vadd.f32 %v472_v41, %v471_v37  ;;  %v514_v46 = vadd.f32 %v513_v42, %v512_v38  ;;  %v8316_v47 = vpop.f32.mrb[6].mxu0  ;;  %v8318_v48 = vpop.f32.mrb[6].mxu1 }
  0xf6   :  { %v474_v49 = vsel %vm468_vm4, %v8316_v47, 0.0  ;;  %v515_v50 = vsel %vm468_vm4, %v8318_v48, 0.0  ;;  %v7125_v51 = vpop.f32.mrb[7].mxu0  ;;  %v7165_v52 = vpop.f32.mrb[7].mxu1 }
  0xf7   :  { %v475_v53 = vadd.f32 %v474_v49, %v473_v45  ;;  %v516_v54 = vadd.f32 %v515_v50, %v514_v46 }
  0xfb   :  { %v8324_v55 = vpop.f32.mrb[8].mxu0  ;;  %v8326_v56 = vpop.f32.mrb[8].mxu1 }
  0xfc   :  { %v476_v57 = vsel %vm468_vm4, %v8324_v55, 0.0  ;;  %v517_v58 = vsel %vm468_vm4, %v8326_v56, 0.0  ;;  %v7128_v59 = vpop.f32.mrb[9].mxu0  ;;  %v7168_v60 = vpop.f32.mrb[9].mxu1 }
  0xfd   :  { %v477_v61 = vadd.f32 %v476_v57, %v475_v53  ;;  %v518_v62 = vadd.f32 %v517_v58, %v516_v54  ;;  %v8332_v63 = vpop.f32.mrb[10].mxu0  ;;  %v8334_v0 = vpop.f32.mrb[10].mxu1 }
  0xfe   :  { %v478_v2 = vsel %vm468_vm4, %v8332_v63, 0.0  ;;  %v519_v3 = vsel %vm468_vm4, %v8334_v0, 0.0  ;;  %v7129_v4 = vpop.f32.mrb[11].mxu0  ;;  %v7169_v5 = vpop.f32.mrb[11].mxu1 }
  0xff   :  { %v479_v6 = vadd.f32 %v478_v2, %v477_v61  ;;  %v520_v7 = vadd.f32 %v519_v3, %v518_v62 }
 0x103   :  { %v8340_v8 = vpop.f32.mrb[12].mxu0  ;;  %v8342_v9 = vpop.f32.mrb[12].mxu1 }
 0x104   :  { %v480_v10 = vsel %vm468_vm4, %v8340_v8, 0.0  ;;  %v521_v11 = vsel %vm468_vm4, %v8342_v9, 0.0  ;;  %v7132_v12 = vpop.f32.mrb[13].mxu0  ;;  %v7172_v13 = vpop.f32.mrb[13].mxu1 }
 0x105   :  { %v481_v14 = vadd.f32 %v480_v10, %v479_v6  ;;  %v522_v15 = vadd.f32 %v521_v11, %v520_v7  ;;  %v8348_v16 = vpop.f32.mrb[14].mxu0  ;;  %v8350_v17 = vpop.f32.mrb[14].mxu1 }
 0x106   :  { %v482_v18 = vsel %vm468_vm4, %v8348_v16, 0.0  ;;  %v523_v19 = vsel %vm468_vm4, %v8350_v17, 0.0  ;;  %v7133_v20 = vpop.f32.mrb[15].mxu0  ;;  %v7173_v21 = vpop.f32.mrb[15].mxu1 }
 0x107   :  { %v483_v22 = vadd.f32 %v482_v18, %v481_v14  ;;  %v524_v23 = vadd.f32 %v523_v19, %v522_v15 }
 0x10b   :  { %v8356_v24 = vpop.f32.mrb[16].mxu0  ;;  %v8358_v27 = vpop.f32.mrb[16].mxu1 }
 0x10c   :  { %v484_v28 = vsel %vm468_vm4, %v8356_v24, 0.0  ;;  %v525_v31 = vsel %vm468_vm4, %v8358_v27, 0.0  ;;  %v7136_v32 = vpop.f32.mrb[17].mxu0  ;;  %v7176_v33 = vpop.f32.mrb[17].mxu1 }
 0x10d   :  { %v485_v34 = vadd.f32 %v484_v28, %v483_v22  ;;  %v526_v35 = vadd.f32 %v525_v31, %v524_v23  ;;  %v8364_v36 = vpop.f32.mrb[18].mxu0  ;;  %v8366_v37 = vpop.f32.mrb[18].mxu1 }
 0x10e   :  { %v486_v38 = vsel %vm468_vm4, %v8364_v36, 0.0  ;;  %v527_v41 = vsel %vm468_vm4, %v8366_v37, 0.0  ;;  %v7137_v42 = vpop.f32.mrb[19].mxu0  ;;  %v7177_v43 = vpop.f32.mrb[19].mxu1 }
 0x10f   :  { %v487_v44 = vadd.f32 %v486_v38, %v485_v34  ;;  %v528_v45 = vadd.f32 %v527_v41, %v526_v35 }
 0x113   :  { %v8372_v46 = vpop.f32.mrb[20].mxu0  ;;  %v8374_v49 = vpop.f32.mrb[20].mxu1 }
 0x114   :  { %v488_v50 = vsel %vm468_vm4, %v8372_v46, 0.0  ;;  %v529_v51 = vsel %vm468_vm4, %v8374_v49, 0.0  ;;  %v7140_v52 = vpop.f32.mrb[21].mxu0  ;;  %v7180_v53 = vpop.f32.mrb[21].mxu1 }
 0x115   :  { %v489_v54 = vadd.f32 %v488_v50, %v487_v44  ;;  %v530_v57 = vadd.f32 %v529_v51, %v528_v45  ;;  %v8380_v58 = vpop.f32.mrb[22].mxu0  ;;  %v8382_v59 = vpop.f32.mrb[22].mxu1 }
 0x116   :  { %v490_v60 = vsel %vm468_vm4, %v8380_v58, 0.0  ;;  %v531_v61 = vsel %vm468_vm4, %v8382_v59, 0.0  ;;  %v7141_v62 = vpop.f32.mrb[23].mxu0  ;;  %v7181_v2 = vpop.f32.mrb[23].mxu1 }
 0x117   :  { %v491_v3 = vadd.f32 %v490_v60, %v489_v54  ;;  %v532_v4 = vadd.f32 %v531_v61, %v530_v57 }
 0x11b   :  { %v8388_v5 = vpop.f32.mrb[24].mxu0  ;;  %v8390_v6 = vpop.f32.mrb[24].mxu1 }
 0x11c   :  { %v492_v7 = vsel %vm468_vm4, %v8388_v5, 0.0  ;;  %v533_v10 = vsel %vm468_vm4, %v8390_v6, 0.0  ;;  %v7144_v11 = vpop.f32.mrb[25].mxu0  ;;  %v7184_v12 = vpop.f32.mrb[25].mxu1 }
 0x11d   :  { %v493_v13 = vadd.f32 %v492_v7, %v491_v3  ;;  %v534_v14 = vadd.f32 %v533_v10, %v532_v4  ;;  %v8396_v15 = vpop.f32.mrb[26].mxu0  ;;  %v8398_v18 = vpop.f32.mrb[26].mxu1 }
 0x11e   :  { %v494_v19 = vsel %vm468_vm4, %v8396_v15, 0.0  ;;  %v535_v20 = vsel %vm468_vm4, %v8398_v18, 0.0  ;;  %v7145_v21 = vpop.f32.mrb[27].mxu0  ;;  %v7185_v22 = vpop.f32.mrb[27].mxu1 }
 0x11f   :  { %v495_v23 = vadd.f32 %v494_v19, %v493_v13  ;;  %v536_v28 = vadd.f32 %v535_v20, %v534_v14 }
 0x123   :  { %v8404_v31 = vpop.f32.mrb[28].mxu0  ;;  %v8406_v32 = vpop.f32.mrb[28].mxu1 }
 0x124   :  { %v496_v33 = vsel %vm468_vm4, %v8404_v31, 0.0  ;;  %v537_v34 = vsel %vm468_vm4, %v8406_v32, 0.0  ;;  %v7148_v35 = vpop.f32.mrb[29].mxu0  ;;  %v7188_v38 = vpop.f32.mrb[29].mxu1 }
 0x125   :  { %v497_v41 = vadd.f32 %v496_v33, %v495_v23  ;;  %v538_v42 = vadd.f32 %v537_v34, %v536_v28  ;;  %v277_v43 = vpop.f32.mrb[30].mxu0  ;;  %v8412_v44 = vpop.f32.mrb[30].mxu1 }
 0x126   :  { %v498_v45 = vsel %vm468_vm4, %v277_v43, 0.0  ;;  %v539_v50 = vsel %vm468_vm4, %v8412_v44, 0.0  ;;  %v7149_v51 = vpop.f32.mrb[31].mxu0  ;;  %v7189_v52 = vpop.f32.mrb[31].mxu1 }
 0x127   :  { %v499_v53 = vadd.f32 %v498_v45, %v497_v41  ;;  %v540_v54 = vadd.f32 %v539_v50, %v538_v42 }
 0x12b   :  { %v282_v57 = vpop.f32.mrb[32].mxu0  ;;  %v8417_v60 = vpop.f32.mrb[32].mxu1 }
 0x12c   :  { %v500_v61 = vsel %vm468_vm4, %v282_v57, 0.0  ;;  %v541_v62 = vsel %vm468_vm4, %v8417_v60, 0.0  ;;  %v7152_v2 = vpop.f32.mrb[33].mxu0  ;;  %v7192_v3 = vpop.f32.mrb[33].mxu1 }
 0x12d   :  { %v501_v4 = vadd.f32 %v500_v61, %v499_v53  ;;  %v542_v7 = vadd.f32 %v541_v62, %v540_v54  ;;  %v285_v10 = vpop.f32.mrb[34].mxu0  ;;  %v462_v11 = vpop.f32.mrb[34].mxu1 }
 0x12e   :  { %v502_v12 = vsel %vm468_vm4, %v285_v10, 0.0  ;;  %v543_v13 = vsel %vm468_vm4, %v462_v11, 0.0  ;;  %v7153_v14 = vpop.f32.mrb[35].mxu0  ;;  %v7193_v19 = vpop.f32.mrb[35].mxu1 }
 0x12f   :  { %v503_v20 = vadd.f32 %v502_v12, %v501_v4  ;;  %v544_v21 = vadd.f32 %v543_v13, %v542_v7 }
 0x131   :  { %v504_v22 = vrot.slane %v503_v20, 4  ;;  %v545_v23 = vrot.slane %v544_v21, 4 }
 0x133   :  { %v505_v28 = vadd.f32 %v504_v22, %v503_v20  ;;  %v546_v33 = vadd.f32 %v545_v23, %v544_v21 }
 0x135   :  { %v506_v34 = vrot.slane %v505_v28, 2  ;;  %v547_v35 = vrot.slane %v546_v33, 2 }
 0x137   :  { %v507_v38 = vadd.f32 %v506_v34, %v505_v28  ;;  %v548_v41 = vadd.f32 %v547_v35, %v546_v33 }
 0x139   :  { %v508_v42 = vrot.slane %v507_v38, 1  ;;  %v549_v45 = vrot.slane %v548_v41, 1 }
 0x13b   :  { %v509_v50 = vadd.f32 %v508_v42, %v507_v38  ;;  %v550_v51 = vadd.f32 %v549_v45, %v548_v41 }
 0x13d   :  { %v552_v52 = vmul.f32 0.0069444445, %v509_v50  ;;  %v553_v53 = vmul.f32 0.0069444445, %v550_v51 }
 0x13f   :  { %v554_v54 = vsel %vm468_vm4, %v552_v52, 0.0  ;;  %v555_v61 = vsel %vm468_vm4, %v553_v53, 0.0 }
 0x140   :  { %v556_v62 = vadd.f32 %v555_v61, %v554_v54 }
 0x142   :  { %v558_v2 = vmul.f32 0.5, %v556_v62 }
 0x144   :  { %v8427_v3 = vsub.f32 %v8292_v25, %v558_v2  ;;  %v8430_v4 = vsub.f32 %v8296_v29, %v558_v2  ;;  %v8433_v7 = vsub.f32 %v8308_v39, %v558_v2  ;;  %v8436_v12 = vsub.f32 %v8316_v47, %v558_v2 }
 0x145   :  { %v8439_v13 = vsub.f32 %v8324_v55, %v558_v2  ;;  %v8442_v14 = vsub.f32 %v8332_v63, %v558_v2  ;;  %v8445_v19 = vsub.f32 %v8340_v8, %v558_v2  ;;  %v8448_v25 = vsub.f32 %v8348_v16, %v558_v2 }
 0x146   :  { %v8451_v29 = vsub.f32 %v8356_v24, %v558_v2  ;;  %v8454_v39 = vsub.f32 %v8364_v36, %v558_v2  ;;  %v8457_v47 = vsub.f32 %v8372_v46, %v558_v2  ;;  %v8460_v55 = vsub.f32 %v8380_v58, %v558_v2 }
 0x147   :  { %v8463_v63 = vsub.f32 %v8388_v5, %v558_v2  ;;  %v8466_v8 = vsub.f32 %v8396_v15, %v558_v2  ;;  %v8469_v16 = vsub.f32 %v8404_v31, %v558_v2  ;;  %v8471_v24 = vsub.f32 %v277_v43, %v558_v2 }
 0x148   :  { %v8473_v20 = vsub.f32 %v282_v57, %v558_v2  ;;  %v8475_v36 = vsub.f32 %v285_v10, %v558_v2  ;;  %v8478_v46 = vsub.f32 %v8294_v26, %v558_v2  ;;  %v8481_v58 = vsub.f32 %v8298_v30, %v558_v2 }
 0x149   :  { %v8484_v5 = vsub.f32 %v8310_v40, %v558_v2  ;;  %v8487_v15 = vsub.f32 %v8318_v48, %v558_v2  ;;  %v8490_v31 = vsub.f32 %v8326_v56, %v558_v2  ;;  %v8493_v43 = vsub.f32 %v8334_v0, %v558_v2 }
 0x14a   :  { %v8496_v57 = vsub.f32 %v8342_v9, %v558_v2  ;;  %v8499_v26 = vsub.f32 %v8350_v17, %v558_v2  ;;  %v8502_v30 = vsub.f32 %v8358_v27, %v558_v2  ;;  %v8505_v40 = vsub.f32 %v8366_v37, %v558_v2 }
 0x14b   :  { %v8508_v48 = vsub.f32 %v8374_v49, %v558_v2  ;;  %v8511_v56 = vsub.f32 %v8382_v59, %v558_v2  ;;  %v8514_v0 = vsub.f32 %v8390_v6, %v558_v2  ;;  %v8517_v9 = vsub.f32 %v8398_v18, %v558_v2 }
 0x14c   :  { %v8520_v17 = vsub.f32 %v8406_v32, %v558_v2  ;;  %v8523_v27 = vsub.f32 %v8412_v44, %v558_v2  ;;  %v8526_v37 = vsub.f32 %v8417_v60, %v558_v2  ;;  %v8528_v49 = vsub.f32 %v462_v11, %v558_v2 }
 0x14d   :  { %v595_v59 = vmul.f32 %v8427_v3, %v8427_v3  ;;  %v596_v6 = vmul.f32 %v8430_v4, %v8430_v4  ;;  %v597_v18 = vmul.f32 %v8433_v7, %v8433_v7  ;;  %v598_v32 = vmul.f32 %v8436_v12, %v8436_v12 }
 0x14e   :  { %v613_v60 = vmul.f32 %v8478_v46, %v8478_v46  ;;  %v614_v11 = vmul.f32 %v8481_v58, %v8481_v58  ;;  %v599_v22 = vmul.f32 %v8439_v13, %v8439_v13  ;;  %v615_v28 = vmul.f32 %v8484_v5, %v8484_v5 }
 0x14f   :  { %v631_v44 = vsel %vm468_vm4, %v595_v59, 0.0  ;;  %v632_v10 = vsel %vm468_vm4, %v596_v6, 0.0  ;;  %v634_v23 = vsel %vm468_vm4, %v597_v18, 0.0  ;;  %v600_v34 = vmul.f32 %v8442_v14, %v8442_v14 }
 0x150   :  { %v633_v21 = vadd.f32 %v632_v10, %v631_v44  ;;  %v636_v35 = vsel %vm468_vm4, %v598_v32, 0.0  ;;  %v616_v38 = vmul.f32 %v8487_v15, %v8487_v15  ;;  %v672_v42 = vsel %vm468_vm4, %v613_v60, 0.0 }
 0x151   :  { %v673_v45 = vsel %vm468_vm4, %v614_v11, 0.0  ;;  %v601_v50 = vmul.f32 %v8445_v19, %v8445_v19  ;;  %v638_v51 = vsel %vm468_vm4, %v599_v22, 0.0  ;;  %v617_v53 = vmul.f32 %v8490_v31, %v8490_v31 }
 0x152   :  { %v635_v33 = vadd.f32 %v634_v23, %v633_v21  ;;  %v674_v52 = vadd.f32 %v673_v45, %v672_v42  ;;  %v675_v61 = vsel %vm468_vm4, %v615_v28, 0.0  ;;  %v602_v62 = vmul.f32 %v8448_v25, %v8448_v25 }
 0x153   :  { %v640_v2 = vsel %vm468_vm4, %v600_v34, 0.0  ;;  %v618_v6 = vmul.f32 %v8493_v43, %v8493_v43  ;;  %v677_v32 = vsel %vm468_vm4, %v616_v38, 0.0  ;;  %v603_v44 = vmul.f32 %v8451_v29, %v8451_v29 }
 0x154   :  { %v637_v41 = vadd.f32 %v636_v35, %v635_v33  ;;  %v676_v59 = vadd.f32 %v675_v61, %v674_v52  ;;  %v642_v10 = vsel %vm468_vm4, %v601_v50, 0.0  ;;  %v619_v11 = vmul.f32 %v8496_v57, %v8496_v57 }
 0x155   :  { %v679_v22 = vsel %vm468_vm4, %v617_v53, 0.0  ;;  %v604_v23 = vmul.f32 %v8454_v39, %v8454_v39  ;;  %v644_v28 = vsel %vm468_vm4, %v602_v62, 0.0  ;;  %v11154_v34 = vmov 0  }
 0x156   :  { %v639_v54 = vadd.f32 %v638_v51, %v637_v41  ;;  %v678_v60 = vadd.f32 %v677_v32, %v676_v59  ;;  %961 = vmatprep.subr.bf16.mxu0 %v11154_v34  ;;  %1017 = vmatprep.subr.bf16.mxu1 %v11154_v34  ;;  %v620_v35 = vmul.f32 %v8499_v26, %v8499_v26  ;;  %v681_v41 = vsel %vm468_vm4, %v618_v6, 0.0 }
 0x157   :  { %v605_v42 = vmul.f32 %v8457_v47, %v8457_v47  ;;  %v646_v45 = vsel %vm468_vm4, %v603_v44, 0.0  ;;  %v621_v51 = vmul.f32 %v8502_v30, %v8502_v30  ;;  %v683_v53 = vsel %vm468_vm4, %v619_v11, 0.0 }
 0x158   :  { %v641_v18 = vadd.f32 %v640_v2, %v639_v54  ;;  %v680_v33 = vadd.f32 %v679_v22, %v678_v60  ;;  %v606_v54 = vmul.f32 %v8460_v55, %v8460_v55  ;;  %v648_v61 = vsel %vm468_vm4, %v604_v23, 0.0 }
 0x159   :  { %v622_v2 = vmul.f32 %v8505_v40, %v8505_v40  ;;  %v685_v6 = vsel %vm468_vm4, %v620_v35, 0.0  ;;  %v650_v32 = vsel %vm468_vm4, %v605_v42, 0.0  ;;  %v687_v11 = vsel %vm468_vm4, %v621_v51, 0.0 }
 0x15a   :  { %v643_v21 = vadd.f32 %v642_v10, %v641_v18  ;;  %v682_v50 = vadd.f32 %v681_v41, %v680_v33  ;;  %v607_v18 = vmul.f32 %v8463_v63, %v8463_v63  ;;  %v623_v10 = vmul.f32 %v8508_v48, %v8508_v48 }
 0x15b   :  { %v652_v22 = vsel %vm468_vm4, %v606_v54, 0.0  ;;  %v689_v35 = vsel %vm468_vm4, %v622_v2, 0.0 }
 0x15c   :  { %v645_v38 = vadd.f32 %v644_v28, %v643_v21  ;;  %v684_v62 = vadd.f32 %v683_v53, %v682_v50  ;;  %v608_v21 = vmul.f32 %v8466_v8, %v8466_v8  ;;  %v624_v28 = vmul.f32 %v8511_v56, %v8511_v56 }
 0x15d   :  { %v654_v41 = vsel %vm468_vm4, %v607_v18, 0.0  ;;  %v691_v51 = vsel %vm468_vm4, %v623_v10, 0.0 }
 0x15e   :  { %v647_v52 = vadd.f32 %v646_v45, %v645_v38  ;;  %v686_v44 = vadd.f32 %v685_v6, %v684_v62  ;;  %v609_v38 = vmul.f32 %v8469_v16, %v8469_v16  ;;  %v625_v45 = vmul.f32 %v8514_v0, %v8514_v0 }
 0x15f   :  { %v656_v53 = vsel %vm468_vm4, %v608_v21, 0.0  ;;  %v693_v2 = vsel %vm468_vm4, %v624_v28, 0.0 }
 0x160   :  { %v649_v59 = vadd.f32 %v648_v61, %v647_v52  ;;  %v688_v23 = vadd.f32 %v687_v11, %v686_v44  ;;  %v610_v52 = vmul.f32 %v8471_v24, %v8471_v24  ;;  %v626_v61 = vmul.f32 %v8517_v9, %v8517_v9 }
 0x161   :  { %v658_v6 = vsel %vm468_vm4, %v609_v38, 0.0  ;;  %v695_v10 = vsel %vm468_vm4, %v625_v45, 0.0  ;;  %v612_v11 = vmul.f32 %v8475_v36, %v8475_v36 }
 0x162   :  { %v651_v60 = vadd.f32 %v650_v32, %v649_v59  ;;  %v690_v42 = vadd.f32 %v689_v35, %v688_v23  ;;  %v611_v59 = vmul.f32 %v8473_v20, %v8473_v20  ;;  %v627_v32 = vmul.f32 %v8520_v17, %v8520_v17 }
 0x163   :  { %v660_v21 = vsel %vm468_vm4, %v610_v52, 0.0  ;;  %v628_v23 = vmul.f32 %v8523_v27, %v8523_v27  ;;  %v630_v52 = vmul.f32 %v8528_v49, %v8528_v49 }
 0x164   :  { %v653_v33 = vadd.f32 %v652_v22, %v651_v60  ;;  %v692_v54 = vadd.f32 %v691_v51, %v690_v42  ;;  %v7686_v60 = vld [vmem:[%s11144_s2 + $0x4] ss:$8 sps:$4 sm:$0xff]   ;;  %v662_v35 = vsel %vm468_vm4, %v611_v59, 0.0  ;;  %v699_v45 = vsel %vm468_vm4, %v627_v32, 0.0 }
 0x165   :  { %6388 = vmatprep.mubr.msk.bf16.mxu0 %vm951_vm5, %v7686_v60  ;;  %6391 = vmatprep.mubr.msk.bf16.mxu1 %vm951_vm5, %v7686_v60 }
 0x166   :  { %v655_v50 = vadd.f32 %v654_v41, %v653_v33  ;;  %v694_v18 = vadd.f32 %v693_v2, %v692_v54  ;;  %v697_v33 = vsel %vm468_vm4, %v626_v61, 0.0  ;;  %v629_v41 = vmul.f32 %v8526_v37, %v8526_v37 }
 0x167   :  { %v701_v54 = vsel %vm468_vm4, %v628_v23, 0.0 }
 0x168   :  { %v657_v62 = vadd.f32 %v656_v53, %v655_v50  ;;  %v696_v22 = vadd.f32 %v695_v10, %v694_v18  ;;  %v664_v50 = vsel %vm468_vm4, %v612_v11, 0.0 }
 0x16a   :  { %v659_v44 = vadd.f32 %v658_v6, %v657_v62  ;;  %v698_v38 = vadd.f32 %v697_v33, %v696_v22  ;;  %v703_v62 = vsel %vm468_vm4, %v629_v41, 0.0  ;;  %v705_v6 = vsel %vm468_vm4, %v630_v52, 0.0 }
 0x16c   :  { %v661_v28 = vadd.f32 %v660_v21, %v659_v44  ;;  %v700_v51 = vadd.f32 %v699_v45, %v698_v38 }
 0x16e   :  { %v663_v42 = vadd.f32 %v662_v35, %v661_v28  ;;  %v702_v61 = vadd.f32 %v701_v54, %v700_v51  ;;  %v466_v54 = vld [vmem:[%s11151_s9] ss:$0 sm:$0xff] }
 0x170   :  { %v665_v53 = vadd.f32 %v664_v50, %v663_v42  ;;  %v704_v2 = vadd.f32 %v703_v62, %v702_v61 }
 0x172   :  { %v666_v59 = vrot.slane %v665_v53, 4  ;;  %v706_v18 = vadd.f32 %v705_v6, %v704_v2  ;;  %v8654_v2 = vld [vmem:[%s11151_s9 + $0x1] ss:$0 sm:$0xff] }
 0x174   :  { %v707_v44 = vrot.slane %v706_v18, 4  ;;  %v667_v10 = vadd.f32 %v666_v59, %v665_v53  ;;  %v8656_v59 = vstv %s794_s23  ;;  %s8105_s23 = smov 64  }
 0x176   :  { %v708_v32 = vadd.f32 %v707_v44, %v706_v18  ;;  %v668_v60 = vrot.slane %v667_v10, 2 }
 0x178   :  { %v709_v11 = vrot.slane %v708_v32, 2  ;;  %v669_v21 = vadd.f32 %v668_v60, %v667_v10 }
 0x17a   :  { %v710_v22 = vadd.f32 %v709_v11, %v708_v32  ;;  %v670_v28 = vrot.slane %v669_v21, 1 }
 0x17c   :  { %v711_v33 = vrot.slane %v710_v22, 1  ;;  %v671_v35 = vadd.f32 %v670_v28, %v669_v21 }
 0x17e   :  { %v712_v38 = vadd.f32 %v711_v33, %v710_v22  ;;  %v713_v23 = vmul.f32 0.0069444445, %v671_v35 }
 0x180   :  { %v714_v42 = vmul.f32 0.0069444445, %v712_v38  ;;  %v715_v41 = vsel %vm468_vm4, %v713_v23, 0.0 }
 0x182   :  { %v716_v45 = vsel %vm468_vm4, %v714_v42, 0.0 }
 0x183   :  { %v717_v50 = vadd.f32 %v716_v45, %v715_v41 }
 0x185   :  { %v718_v51 = vmul.f32 0.5, %v717_v50 }
 0x187   :  { %v719_v52 = vadd.f32 1e-05, %v718_v51 }
 0x189   :  { %8051 = vrsqrt.f32 %v719_v52 }
 0x193   :  { %v8052_v53 = vpop.eup %8051 }
 0x194   :  { %v721_v61 = vmul.f32 %v8052_v53, %v466_v54 }
 0x196   :  { %v756_v62 = vmul.f32 %v721_v61, %v8526_v37  ;;  %v8659_v6 = vmul.f32 %v721_v61, %v8528_v49  ;;  %v722_v18 = vmul.f32 %v721_v61, %v8427_v3  ;;  %v723_v44 = vmul.f32 %v721_v61, %v8430_v4 }
 0x197   :  { %v724_v10 = vmul.f32 %v721_v61, %v8433_v7  ;;  %v725_v32 = vmul.f32 %v721_v61, %v8436_v12  ;;  %v726_v60 = vmul.f32 %v721_v61, %v8439_v13  ;;  %v727_v11 = vmul.f32 %v721_v61, %v8442_v14 }
 0x198   :  { %v8666_v37 = vadd.f32 %v756_v62, %v8654_v2  ;;  %v728_v21 = vmul.f32 %v721_v61, %v8445_v19  ;;  %v729_v49 = vmul.f32 %v721_v61, %v8448_v25  ;;  %v730_v22 = vmul.f32 %v721_v61, %v8451_v29 }
 0x199   :  { %v731_v3 = vmul.f32 %v721_v61, %v8454_v39  ;;  %v732_v4 = vmul.f32 %v721_v61, %v8457_v47  ;;  %v733_v7 = vmul.f32 %v721_v61, %v8460_v55  ;;  %v734_v12 = vmul.f32 %v721_v61, %v8463_v63 }
 0x19a   :  { %v735_v28 = vmul.f32 %v721_v61, %v8466_v8  ;;  %v736_v13 = vmul.f32 %v721_v61, %v8469_v16  ;;  %v737_v14 = vmul.f32 %v721_v61, %v8471_v24  ;;  %v738_v19 = vmul.f32 %v721_v61, %v8473_v20 }
 0x19b   :  { %v8682_v25 = vmul.f32 %v721_v61, %v8475_v36  ;;  %v740_v29 = vmul.f32 %v721_v61, %v8478_v46  ;;  %v741_v39 = vmul.f32 %v721_v61, %v8481_v58  ;;  %v742_v47 = vmul.f32 %v721_v61, %v8484_v5 }
 0x19c   :  { %v743_v55 = vmul.f32 %v721_v61, %v8487_v15  ;;  %v744_v63 = vmul.f32 %v721_v61, %v8490_v31  ;;  %v745_v8 = vmul.f32 %v721_v61, %v8493_v43  ;;  %v746_v16 = vmul.f32 %v721_v61, %v8496_v57 }
 0x19d   :  { %v747_v24 = vmul.f32 %v721_v61, %v8499_v26  ;;  %v8693_v20 = vmul.f32 %v721_v61, %v8502_v30  ;;  %v8696_v36 = vmul.f32 %v721_v61, %v8505_v40  ;;  %v8699_v46 = vmul.f32 %v721_v61, %v8508_v48 }
 0x19e   :  { %v8702_v58 = vmul.f32 %v721_v61, %v8511_v56  ;;  %v8705_v5 = vmul.f32 %v721_v61, %v8514_v0  ;;  %v8708_v15 = vmul.f32 %v721_v61, %v8517_v9  ;;  %v8711_v31 = vmul.f32 %v721_v61, %v8520_v17 }
 0x19f   :  { %v758_v43 = vadd.f32 %v722_v18, %v8654_v2  ;;  %v759_v57 = vadd.f32 %v723_v44, %v8654_v2  ;;  %v8716_v26 = vmul.f32 %v721_v61, %v8523_v27  ;;  %v760_v30 = vadd.f32 %v724_v10, %v8654_v2 }
 0x1a0   :  { %v761_v40 = vadd.f32 %v725_v32, %v8654_v2  ;;  %v8721_v48 = vadd.f32 %v726_v60, %v8654_v2  ;;  %v8724_v56 = vadd.f32 %v727_v11, %v8654_v2  ;;  %v8727_v0 = vadd.f32 %v728_v21, %v8654_v2 }
 0x1a1   :  { %v776_v9 = vadd.f32 %v740_v29, %v8654_v2  ;;  %v777_v17 = vadd.f32 %v741_v39, %v8654_v2  ;;  %v8732_v27 = vadd.f32 %v729_v49, %v8654_v2  ;;  %v8735_v33 = vadd.f32 %v730_v22, %v8654_v2 }
 0x1a2   :  { %v8738_v35 = vadd.f32 %v731_v3, %v8654_v2  ;;  %v8741_v38 = vadd.f32 %v732_v4, %v8654_v2  ;;  %v8744_v23 = vadd.f32 %v733_v7, %v8654_v2  ;;  %v8747_v42 = vadd.f32 %v734_v12, %v8654_v2 }
 0x1a3   :  { %v832_v41 = vmul.f32 %v8656_v59, %v758_v43  ;;  %v833_v45 = vmul.f32 %v8656_v59, %v759_v57  ;;  %v8752_v50 = vadd.f32 %v735_v28, %v8654_v2  ;;  %v8755_v51 = vadd.f32 %v736_v13, %v8654_v2 }
 0x1a4   :  { %vm795_vm6 = vcmp.gt.f32.partialorder %v758_v43, 0.0  ;;  %vm796_vm7 = vcmp.gt.f32.partialorder %v759_v57, 0.0  ;;  %v778_v52 = vadd.f32 %v742_v47, %v8654_v2  ;;  %v779_v53 = vadd.f32 %v743_v55, %v8654_v2 }
 0x1a5   :  { %v850_v54 = vmul.f32 %v8656_v59, %v776_v9  ;;  %v851_v61 = vmul.f32 %v8656_v59, %v777_v17  ;;  %v8762_v62 = vadd.f32 %v737_v14, %v8654_v2  ;;  %v8765_v18 = vadd.f32 %v738_v19, %v8654_v2 }
 0x1a6   :  { %vm813_vm8 = vcmp.gt.f32.partialorder %v776_v9, 0.0  ;;  %vm814_vm9 = vcmp.gt.f32.partialorder %v777_v17, 0.0  ;;  %v834_v44 = vmul.f32 %v8656_v59, %v760_v30  ;;  %v835_v10 = vmul.f32 %v8656_v59, %v761_v40 }
 0x1a7   :  { %v868_v32 = vsel %vm795_vm6, %v758_v43, %v832_v41  ;;  %v869_v60 = vsel %vm796_vm7, %v759_v57, %v833_v45  ;;  %v780_v11 = vadd.f32 %v744_v63, %v8654_v2  ;;  %v781_v21 = vadd.f32 %v745_v8, %v8654_v2 }
 0x1a8   :  { %vm797_vm10 = vcmp.gt.f32.partialorder %v760_v30, 0.0  ;;  %vm798_vm11 = vcmp.gt.f32.partialorder %v761_v40, 0.0  ;;  %v852_v49 = vmul.f32 %v8656_v59, %v778_v52  ;;  %v853_v22 = vmul.f32 %v8656_v59, %v779_v53 }
 0x1a9   :  { %v886_v3 = vsel %vm813_vm8, %v776_v9, %v850_v54  ;;  %v887_v4 = vsel %vm814_vm9, %v777_v17, %v851_v61  ;;  %v782_v7 = vadd.f32 %v746_v16, %v8654_v2  ;;  %vm815_vm12 = vcmp.gt.f32.partialorder %v778_v52, 0.0 }
 0x1aa   :  { %vm816_vm13 = vcmp.gt.f32.partialorder %v779_v53, 0.0  ;;  %v8774_v12 = vpack.c.bf16 %v869_v60, %v868_v32  ;;  %v836_v28 = vmul.f32 %v8656_v59, %v8721_v48  ;;  %v837_v13 = vmul.f32 %v8656_v59, %v8724_v56 }
 0x1ab   :  { %v870_v14 = vsel %vm797_vm10, %v760_v30, %v834_v44  ;;  %v871_v19 = vsel %vm798_vm11, %v761_v40, %v835_v10  ;;  %v783_v29 = vadd.f32 %v747_v24, %v8654_v2  ;;  %vm799_vm14 = vcmp.gt.f32.partialorder %v8721_v48, 0.0 }
 0x1ac   :  { %vm800_vm15 = vcmp.gt.f32.partialorder %v8724_v56, 0.0  ;;  %v8783_v39 = vpack.c.bf16 %v887_v4, %v886_v3  ;;  %962 = vmatpush1.bf16.msra.mxu0 %v8774_v12  ;;  %v854_v47 = vmul.f32 %v8656_v59, %v780_v11  ;;  %v855_v55 = vmul.f32 %v8656_v59, %v781_v21 }
 0x1ad   :  { %v888_v63 = vsel %vm815_vm12, %v778_v52, %v852_v49  ;;  %v889_v8 = vsel %vm816_vm13, %v779_v53, %v853_v22  ;;  %963 = vmatprep.subr.bf16.mxu0 %v11154_v34  ;;  %v784_v16 = vadd.f32 %v8693_v20, %v8654_v2  ;;  %vm817_vm0 = vcmp.gt.f32.partialorder %v780_v11, 0.0 }
 0x1ae   :  { %vm818_vm1 = vcmp.gt.f32.partialorder %v781_v21, 0.0  ;;  %v8791_v24 = vpack.c.bf16 %v871_v19, %v870_v14  ;;  %1018 = vmatpush1.bf16.msra.mxu1 %v8783_v39  ;;  %v838_v43 = vmul.f32 %v8656_v59, %v8727_v0  ;;  %v839_v57 = vmul.f32 %v8656_v59, %v8732_v27 }
 0x1af   :  { %v872_v30 = vsel %vm799_vm14, %v8721_v48, %v836_v28  ;;  %v873_v20 = vsel %vm800_vm15, %v8724_v56, %v837_v13  ;;  %1019 = vmatprep.subr.bf16.mxu1 %v11154_v34  ;;  %v785_v40 = vadd.f32 %v8696_v36, %v8654_v2  ;;  %vm801_vm3 = vcmp.gt.f32.partialorder %v8727_v0, 0.0 }
 0x1b0   :  { %vm802_vm6 = vcmp.gt.f32.partialorder %v8732_v27, 0.0  ;;  %v8809_v9 = vpack.c.bf16 %v889_v8, %v888_v63  ;;  %964 = vmatpush1.bf16.msra.mxu0 %v8791_v24  ;;  %v856_v17 = vmul.f32 %v8656_v59, %v782_v7  ;;  %v857_v48 = vmul.f32 %v8656_v59, %v783_v29 }
 0x1b1   :  { %v890_v41 = vsel %vm817_vm0, %v780_v11, %v854_v47  ;;  %v891_v56 = vsel %vm818_vm1, %v781_v21, %v855_v55  ;;  %965 = vmatprep.subr.bf16.mxu0 %v11154_v34  ;;  %v786_v36 = vadd.f32 %v8699_v46, %v8654_v2  ;;  %vm819_vm7 = vcmp.gt.f32.partialorder %v782_v7, 0.0 }
 0x1b2   :  { %vm820_vm8 = vcmp.gt.f32.partialorder %v783_v29, 0.0  ;;  %v8819_v45 = vpack.c.bf16 %v873_v20, %v872_v30  ;;  %1020 = vmatpush1.bf16.msra.mxu1 %v8809_v9  ;;  %v840_v52 = vmul.f32 %v8656_v59, %v8735_v33  ;;  %v841_v53 = vmul.f32 %v8656_v59, %v8738_v35 }
 0x1b3   :  { %v874_v54 = vsel %vm801_vm3, %v8727_v0, %v838_v43  ;;  %v875_v46 = vsel %vm802_vm6, %v8732_v27, %v839_v57  ;;  %1021 = vmatprep.subr.bf16.mxu1 %v11154_v34  ;;  %v787_v61 = vadd.f32 %v8702_v58, %v8654_v2  ;;  %vm803_vm9 = vcmp.gt.f32.partialorder %v8735_v33, 0.0 }
 0x1b4   :  { %vm804_vm10 = vcmp.gt.f32.partialorder %v8738_v35, 0.0  ;;  %v8837_v44 = vpack.c.bf16 %v891_v56, %v890_v41  ;;  %966 = vmatpush1.bf16.msra.mxu0 %v8819_v45  ;;  %v858_v10 = vmul.f32 %v8656_v59, %v784_v16  ;;  %v859_v0 = vmul.f32 %v8656_v59, %v785_v40 }
 0x1b5   :  { %v892_v32 = vsel %vm819_vm7, %v782_v7, %v856_v17  ;;  %v893_v27 = vsel %vm820_vm8, %v783_v29, %v857_v48  ;;  %967 = vmatprep.subr.bf16.mxu0 %v11154_v34  ;;  %v788_v58 = vadd.f32 %v8705_v5, %v8654_v2  ;;  %vm821_vm11 = vcmp.gt.f32.partialorder %v784_v16, 0.0 }
 0x1b6   :  { %vm822_vm12 = vcmp.gt.f32.partialorder %v785_v40, 0.0  ;;  %v8847_v60 = vpack.c.bf16 %v875_v46, %v874_v54  ;;  %1022 = vmatpush1.bf16.msra.mxu1 %v8837_v44  ;;  %v842_v11 = vmul.f32 %v8656_v59, %v8741_v38  ;;  %v843_v21 = vmul.f32 %v8656_v59, %v8744_v23 }
 0x1b7   :  { %v876_v49 = vsel %vm803_vm9, %v8735_v33, %v840_v52  ;;  %v877_v5 = vsel %vm804_vm10, %v8738_v35, %v841_v53  ;;  %1023 = vmatprep.subr.bf16.mxu1 %v11154_v34  ;;  %v789_v22 = vadd.f32 %v8708_v15, %v8654_v2  ;;  %vm805_vm13 = vcmp.gt.f32.partialorder %v8741_v38, 0.0 }
 0x1b8   :  { %vm806_vm14 = vcmp.gt.f32.partialorder %v8744_v23, 0.0  ;;  %v8865_v3 = vpack.c.bf16 %v893_v27, %v892_v32  ;;  %968 = vmatpush1.bf16.msra.mxu0 %v8847_v60  ;;  %v860_v4 = vmul.f32 %v8656_v59, %v786_v36  ;;  %v861_v33 = vmul.f32 %v8656_v59, %v787_v61 }
 0x1b9   :  { %v894_v7 = vsel %vm821_vm11, %v784_v16, %v858_v10  ;;  %v895_v35 = vsel %vm822_vm12, %v785_v40, %v859_v0  ;;  %969 = vmatprep.subr.bf16.mxu0 %v11154_v34  ;;  %v790_v15 = vadd.f32 %v8711_v31, %v8654_v2  ;;  %vm823_vm15 = vcmp.gt.f32.partialorder %v786_v36, 0.0 }
 0x1ba   :  { %vm824_vm0 = vcmp.gt.f32.partialorder %v787_v61, 0.0  ;;  %v8875_v28 = vpack.c.bf16 %v877_v5, %v876_v49  ;;  %1024 = vmatpush1.bf16.msra.mxu1 %v8865_v3  ;;  %v844_v13 = vmul.f32 %v8656_v59, %v8747_v42  ;;  %v845_v14 = vmul.f32 %v8656_v59, %v8752_v50  ;;  %v7694_v5 = vld [vmem:[%s11144_s2 + $0x2c] ss:$8 sps:$4 sm:$0xff]  }
 0x1bb   :  { %v878_v19 = vsel %vm805_vm13, %v8741_v38, %v842_v11  ;;  %v879_v31 = vsel %vm806_vm14, %v8744_v23, %v843_v21  ;;  %1025 = vmatprep.subr.bf16.mxu1 %v11154_v34  ;;  %v791_v29 = vadd.f32 %v8716_v26, %v8654_v2  ;;  %vm807_vm1 = vcmp.gt.f32.partialorder %v8747_v42, 0.0  ;;  %v7689_v11 = vld [vmem:[%s11144_s2 + $0x10] ss:$8 sps:$4 sm:$0xff]  }
 0x1bc   :  { %vm808_vm3 = vcmp.gt.f32.partialorder %v8752_v50, 0.0  ;;  %v8893_v47 = vpack.c.bf16 %v895_v35, %v894_v7  ;;  %970 = vmatpush1.bf16.msra.mxu0 %v8875_v28  ;;  %v862_v55 = vmul.f32 %v8656_v59, %v788_v58  ;;  %v863_v38 = vmul.f32 %v8656_v59, %v789_v22  ;;  %v7697_v7 = vld [vmem:[%s11144_s2 + $0x38] ss:$8 sps:$4 sm:$0xff]  }
 0x1bd   :  { %v896_v63 = vsel %vm823_vm15, %v786_v36, %v860_v4  ;;  %v897_v23 = vsel %vm824_vm0, %v787_v61, %v861_v33  ;;  %971 = vmatprep.subr.bf16.mxu0 %v11154_v34  ;;  %v775_v26 = vadd.f32 %v8682_v25, %v8654_v2  ;;  %vm825_vm6 = vcmp.gt.f32.partialorder %v788_v58, 0.0  ;;  %v7695_v4 = vld [vmem:[%s11144_s2 + $0x3c] ss:$8 sps:$4 sm:$0xff]   ;;  %v6398_v33 = vld [vmem:[%s11144_s2 + $0x48] sm:$0x33] }
 0x1be   :  { %vm826_vm7 = vcmp.gt.f32.partialorder %v789_v22, 0.0  ;;  %v8903_v8 = vpack.c.bf16 %v879_v31, %v878_v19  ;;  %1026 = vmatpush1.bf16.msra.mxu1 %v8893_v47  ;;  %v846_v16 = vmul.f32 %v8656_v59, %v8755_v51  ;;  %v847_v43 = vmul.f32 %v8656_v59, %v8762_v62  ;;  %v7703_v19 = vld [vmem:[%s11144_s2 + $0x64] ss:$8 sps:$4 sm:$0xff]   ;;  %v6415_v31 = vld [vmem:[%s11144_s2 + $0x70] sm:$0x33] }
 0x1bf   :  { %v880_v57 = vsel %vm807_vm1, %v8747_v42, %v844_v13  ;;  %v881_v25 = vsel %vm808_vm3, %v8752_v50, %v845_v14  ;;  %1027 = vmatprep.subr.bf16.mxu1 %v11154_v34  ;;  %v793_v30 = vadd.f32 %v8659_v6, %v8654_v2  ;;  %vm809_vm8 = vcmp.gt.f32.partialorder %v8755_v51, 0.0  ;;  %v7702_v13 = vld [vmem:[%s11144_s2 + $0x54] ss:$8 sps:$4 sm:$0xff]   ;;  %v7700_v14 = vld [vmem:[%s11144_s2 + $0x50] ss:$8 sps:$4 sm:$0xff]  }
 0x1c0   :  { %vm810_vm9 = vcmp.gt.f32.partialorder %v8762_v62, 0.0  ;;  %v8921_v20 = vpack.c.bf16 %v897_v23, %v896_v63  ;;  %972 = vmatpush1.bf16.msra.mxu0 %v8903_v8  ;;  %v864_v40 = vmul.f32 %v8656_v59, %v790_v15  ;;  %v865_v42 = vmul.f32 %v8656_v59, %v791_v29  ;;  %v7710_v63 = vld [vmem:[%s11144_s2 + $0x7c] ss:$8 sps:$4 sm:$0xff]   ;;  %v7708_v23 = vld [vmem:[%s11144_s2 + $0x78] ss:$8 sps:$4 sm:$0xff]  }
 0x1c1   :  { %v898_v17 = vsel %vm825_vm6, %v788_v58, %v862_v55  ;;  %v899_v50 = vsel %vm826_vm7, %v789_v22, %v863_v38  ;;  %973 = vmatprep.subr.bf16.mxu0 %v11154_v34  ;;  %vm827_vm10 = vcmp.gt.f32.partialorder %v790_v15, 0.0  ;;  %vm828_vm11 = vcmp.gt.f32.partialorder %v791_v29, 0.0  ;;  %v926_v58 = vld [vmem:[%s11144_s2 + $0x20] sm:$0x33]  ;;  %v7692_v22 = vld [vmem:[%s11144_s2 + $0x28] ss:$8 sps:$4 sm:$0xff]  }
 0x1c2   :  { %v8929_v2 = vpack.c.bf16 %v881_v25, %v880_v57  ;;  %1028 = vmatpush1.bf16.msra.mxu1 %v8921_v20  ;;  %v848_v6 = vmul.f32 %v8656_v59, %v8765_v18  ;;  %v849_v48 = vmul.f32 %v8656_v59, %v775_v26  ;;  %v882_v41 = vsel %vm809_vm8, %v8755_v51, %v846_v16  ;;  %v6432_v16 = vld [vmem:[%s11144_s2 + $0x98] sm:$0x33] }
 0x1c3   :  { %v883_v56 = vsel %vm810_vm9, %v8762_v62, %v847_v43  ;;  %1029 = vmatprep.subr.bf16.mxu1 %v11154_v34  ;;  %vm811_vm12 = vcmp.gt.f32.partialorder %v8765_v18, 0.0  ;;  %vm812_vm13 = vcmp.gt.f32.partialorder %v775_v26, 0.0  ;;  %v8939_v36 = vpack.c.bf16 %v899_v50, %v898_v17  ;;  %v7713_v43 = vld [vmem:[%s11144_s2 + $0x88] ss:$8 sps:$4 sm:$0xff]   ;;  %v6449_v17 = vld [vmem:[%s11144_s2 + $0xc0] sm:$0x33] }
 0x1c4   :  { %974 = vmatpush1.bf16.msra.mxu0 %v8929_v2  ;;  %v866_v52 = vmul.f32 %v8656_v59, %v8666_v37  ;;  %v867_v53 = vmul.f32 %v8656_v59, %v793_v30  ;;  %v900_v54 = vsel %vm827_vm10, %v790_v15, %v864_v40  ;;  %v901_v46 = vsel %vm828_vm11, %v791_v29, %v865_v42  ;;  %v7705_v29 = vld [vmem:[%s11144_s2 + $0x60] ss:$8 sps:$4 sm:$0xff]   ;;  %v7719_v42 = vld [vmem:[%s11144_s2 + $0xb4] ss:$8 sps:$4 sm:$0xff]   ;;  %v7721_v50 = vld [vmem:[%s11144_s2 + $0xb0] ss:$8 sps:$4 sm:$0xff]  }
 0x1c5   :  { %975 = vmatprep.subr.bf16.mxu0 %v11154_v34  ;;  %vm829_vm14 = vcmp.gt.f32.partialorder %v8666_v37, 0.0  ;;  %vm830_vm15 = vcmp.gt.f32.partialorder %v793_v30, 0.0  ;;  %v8947_v51 = vpack.c.bf16 %v883_v56, %v882_v41  ;;  %v884_v62 = vsel %vm811_vm12, %v8765_v18, %v848_v6  ;;  %v7684_v18 = vld [vmem:[%s11144_s2] ss:$8 sps:$4 sm:$0xff]   ;;  %v7726_v41 = vld [vmem:[%s11144_s2 + $0xcc] ss:$8 sps:$4 sm:$0xff]  }
 0x1c6   :  { %1030 = vmatpush1.bf16.msra.mxu1 %v8939_v36  ;;  %v885_v61 = vsel %vm812_vm13, %v775_v26, %v849_v48  ;;  %v8952_v10 = vpack.c.bf16 %v901_v46, %v900_v54  ;;  %v902_v59 = vsel %vm829_vm14, %v8666_v37, %v866_v52  ;;  %v903_v0 = vsel %vm830_vm15, %v793_v30, %v867_v53  ;;  %v7687_v37 = vld [vmem:[%s11144_s2 + $0x14] ss:$8 sps:$4 sm:$0xff]   ;;  %v7718_v30 = vld [vmem:[%s11144_s2 + $0xa4] ss:$8 sps:$4 sm:$0xff]   ;;  %v7716_v40 = vld [vmem:[%s11144_s2 + $0xa0] ss:$8 sps:$4 sm:$0xff]  }
 0x1c7   :  { %1031 = vmatprep.subr.bf16.mxu1 %v11154_v34  ;;  %v8957_v32 = vpack.c.bf16 %v885_v61, %v884_v62  ;;  %v8964_v27 = vpack.c.bf16 %v903_v0, %v902_v59  ;;  %v6387_v21 = vcombine.high %v926_v58, %v926_v58  ;;  %v6386_v49 = vcombine.low %v926_v58, %v926_v58  ;;  %v7711_v26 = vld [vmem:[%s11144_s2 + $0x8c] ss:$8 sps:$4 sm:$0xff]   ;;  %v7724_v56 = vld [vmem:[%s11144_s2 + $0xc8] ss:$8 sps:$4 sm:$0xff]   ;;  %v7727_v52 = vld [vmem:[%s11144_s2 + $0xdc] ss:$8 sps:$4 sm:$0xff]  }
 0x1c8   :  { %976 = vmatpush1.bf16.msra.mxu0 %v8947_v51  ;;  %v6404_v35 = vcombine.high %v6398_v33, %v6398_v33  ;;  %v6403_v15 = vcombine.low %v6398_v33, %v6398_v33  ;;  %v6421_v55 = vcombine.high %v6415_v31, %v6415_v31  ;;  %v6420_v38 = vcombine.low %v6415_v31, %v6415_v31  ;;  %v6466_v53 = vld [vmem:[%s11144_s2 + $0xe8] sm:$0x33]  ;;  %v7729_v54 = vld [vmem:[%s11144_s2 + $0xd8] ss:$8 sps:$4 sm:$0xff]   ;;  %v7734_v61 = vld [vmem:[%s11144_s2 + $0xf4] ss:$8 sps:$4 sm:$0xff]  }
 0x1c9   :  { %977 = vmatprep.subr.bf16.mxu0 %v11154_v34  ;;  %v6438_v57 = vcombine.high %v6432_v16, %v6432_v16  ;;  %v6437_v25 = vcombine.low %v6432_v16, %v6432_v16  ;;  %v6455_v6 = vcombine.high %v6449_v17, %v6449_v17  ;;  %v6454_v48 = vcombine.low %v6449_v17, %v6449_v17  ;;  %v7732_v0 = vld [vmem:[%s11144_s2 + $0xf0] ss:$8 sps:$4 sm:$0xff]   ;;  %v7742_v16 = vld [vmem:[%s11144_s2 + $0x11c] ss:$8 sps:$4 sm:$0xff]  }
 0x1ca   :  { %1032 = vmatpush1.bf16.msra.mxu1 %v8952_v10  ;;  %v6472_v46 = vcombine.high %v6466_v53, %v6466_v53  ;;  %v6471_v62 = vcombine.low %v6466_v53, %v6466_v53  ;;  %v7743_v53 = vld [vmem:[%s11144_s2 + $0x12c] ss:$8 sps:$4 sm:$0xff]   ;;  %vm2542_vm0 = vcmask 785408   ;;  %vm3155_vm14 = vcmask 1041408  }
 0x1cb   :  { %1033 = vmatprep.subr.bf16.mxu1 %v11154_v34  ;;  %vm3151_vm15 = vcmask 293888  }
 0x1cc   :  { %978 = vmatpush1.bf16.msra.mxu0 %v8957_v32 }
 0x1cd   :  { %1112 = vmatprep.subr.bf16.mxu0 %v11154_v34 }
 0x1ce   :  { %1034 = vmatpush1.bf16.msra.mxu1 %v8964_v27 }
 0x1cf   :  { %1168 = vmatprep.subr.bf16.mxu1 %v11154_v34  ;;  %994 = vmatmul.mubr.bf16.vlgmr.msra.gmra.mrb[36].mxu0 %v7684_v18 }
 0x1d0   :  { %1113 = vmatpush1.bf16.msra.mxu0 %v8774_v12  ;;  %6389 = vmatprep.mubr.msk.bf16.mxu0 %vm951_vm5, %v7687_v37 }
 0x1d1   :  { %1050 = vmatmul.mubr.bf16.vlgmr.msra.gmra.mrb[36].mxu1 %v7684_v18  ;;  %1114 = vmatprep.subr.bf16.mxu0 %v11154_v34 }
 0x1d2   :  { %1169 = vmatpush1.bf16.msra.mxu1 %v8783_v39  ;;  %6392 = vmatprep.mubr.msk.bf16.mxu1 %vm951_vm5, %v7687_v37  ;;  %v7735_v37 = vld [vmem:[%s11144_s2 + $0x104] ss:$8 sps:$4 sm:$0xff]  }
 0x1d3   :  { %1170 = vmatprep.subr.bf16.mxu1 %v11154_v34 }
 0x1d4   :  { %1115 = vmatpush1.bf16.msra.mxu0 %v8791_v24 }
 0x1d5   :  { %1116 = vmatprep.subr.bf16.mxu0 %v11154_v34 }
 0x1d6   :  { %1171 = vmatpush1.bf16.msra.mxu1 %v8809_v9 }
 0x1d7   :  { %1172 = vmatprep.subr.bf16.mxu1 %v11154_v34  ;;  %1002 = vmatmul.mubr.bf16.gmra.mrb[40].mxu0 %v7689_v11 }
 0x1d8   :  { %1117 = vmatpush1.bf16.msra.mxu0 %v8819_v45  ;;  %6390 = vmatprep.mubr.msk.bf16.mxu0 %vm951_vm5, %v6387_v21 }
 0x1d9   :  { %1118 = vmatprep.subr.bf16.mxu0 %v11154_v34  ;;  %1058 = vmatmul.mubr.bf16.gmra.mrb[40].mxu1 %v7689_v11 }
 0x1da   :  { %1173 = vmatpush1.bf16.msra.mxu1 %v8837_v44  ;;  %6393 = vmatprep.mubr.msk.bf16.mxu1 %vm951_vm5, %v6387_v21 }
 0x1db   :  { %1174 = vmatprep.subr.bf16.mxu1 %v11154_v34 }
 0x1dc   :  { %1119 = vmatpush1.bf16.msra.mxu0 %v8847_v60 }
 0x1dd   :  { %1120 = vmatprep.subr.bf16.mxu0 %v11154_v34 }
 0x1de   :  { %1175 = vmatpush1.bf16.msra.mxu1 %v8865_v3 }
 0x1df   :  { %1176 = vmatprep.subr.bf16.mxu1 %v11154_v34  ;;  %1010 = vmatmul.mubr.bf16.gmra.mrb[44].mxu0 %v6386_v49 }
 0x1e0   :  { %1121 = vmatpush1.bf16.msra.mxu0 %v8875_v28  ;;  %6405 = vmatprep.mubr.msk.bf16.mxu0 %vm951_vm5, %v7694_v5 }
 0x1e1   :  { %1122 = vmatprep.subr.bf16.mxu0 %v11154_v34  ;;  %1066 = vmatmul.mubr.bf16.gmra.mrb[44].mxu1 %v6386_v49 }
 0x1e2   :  { %1177 = vmatpush1.bf16.msra.mxu1 %v8893_v47  ;;  %6408 = vmatprep.mubr.msk.bf16.mxu1 %vm951_vm5, %v7694_v5 }
 0x1e3   :  { %1178 = vmatprep.subr.bf16.mxu1 %v11154_v34 }
 0x1e4   :  { %1123 = vmatpush1.bf16.msra.mxu0 %v8903_v8 }
 0x1e5   :  { %1124 = vmatprep.subr.bf16.mxu0 %v11154_v34 }
 0x1e6   :  { %1179 = vmatpush1.bf16.msra.mxu1 %v8921_v20 }
 0x1e7   :  { %1180 = vmatprep.subr.bf16.mxu1 %v11154_v34 }
 0x1e8   :  { %1125 = vmatpush1.bf16.msra.mxu0 %v8929_v2 }
 0x1e9   :  { %1126 = vmatprep.subr.bf16.mxu0 %v11154_v34 }
 0x1ea   :  { %1181 = vmatpush1.bf16.msra.mxu1 %v8939_v36 }
 0x1eb   :  { %1182 = vmatprep.subr.bf16.mxu1 %v11154_v34 }
 0x1ec   :  { %1127 = vmatpush1.bf16.msra.mxu0 %v8947_v51 }
 0x1ed   :  { %1128 = vmatprep.subr.bf16.mxu0 %v11154_v34 }
 0x1ee   :  { %1183 = vmatpush1.bf16.msra.mxu1 %v8952_v10 }
 0x1ef   :  { %1184 = vmatprep.subr.bf16.mxu1 %v11154_v34 }
 0x1f0   :  { %1129 = vmatpush1.bf16.msra.mxu0 %v8957_v32 }
 0x1f1   :  { %1263 = vmatprep.subr.bf16.mxu0 %v11154_v34 }
 0x1f2   :  { %1185 = vmatpush1.bf16.msra.mxu1 %v8964_v27 }
 0x1f3   :  { %1145 = vmatmul.mubr.bf16.vlgmr.msra.gmra.mrb[48].mxu0 %v7692_v22  ;;  %1319 = vmatprep.subr.bf16.mxu1 %v11154_v34 }
 0x1f4   :  { %1264 = vmatpush1.bf16.msra.mxu0 %v8774_v12  ;;  %6406 = vmatprep.mubr.msk.bf16.mxu0 %vm951_vm5, %v7695_v4 }
 0x1f5   :  { %1201 = vmatmul.mubr.bf16.vlgmr.msra.gmra.mrb[48].mxu1 %v7692_v22  ;;  %1265 = vmatprep.subr.bf16.mxu0 %v11154_v34 }
 0x1f6   :  { %1320 = vmatpush1.bf16.msra.mxu1 %v8783_v39  ;;  %6409 = vmatprep.mubr.msk.bf16.mxu1 %vm951_vm5, %v7695_v4  ;;  %v6483_v4 = vld [vmem:[%s11144_s2 + $0x110] sm:$0x33] }
 0x1f7   :  { %1321 = vmatprep.subr.bf16.mxu1 %v11154_v34 }
 0x1f8   :  { %1266 = vmatpush1.bf16.msra.mxu0 %v8791_v24 }
 0x1f9   :  { %1267 = vmatprep.subr.bf16.mxu0 %v11154_v34 }
 0x1fa   :  { %1322 = vmatpush1.bf16.msra.mxu1 %v8809_v9 }
 0x1fb   :  { %1153 = vmatmul.mubr.bf16.gmra.mrb[52].mxu0 %v7697_v7  ;;  %1323 = vmatprep.subr.bf16.mxu1 %v11154_v34 }
 0x1fc   :  { %1268 = vmatpush1.bf16.msra.mxu0 %v8819_v45  ;;  %6407 = vmatprep.mubr.msk.bf16.mxu0 %vm951_vm5, %v6404_v35 }
 0x1fd   :  { %1269 = vmatprep.subr.bf16.mxu0 %v11154_v34  ;;  %1209 = vmatmul.mubr.bf16.gmra.mrb[52].mxu1 %v7697_v7  ;;  %v7737_v7 = vld [vmem:[%s11144_s2 + $0x100] ss:$8 sps:$4 sm:$0xff]  }
 0x1fe   :  { %1324 = vmatpush1.bf16.msra.mxu1 %v8837_v44  ;;  %6410 = vmatprep.mubr.msk.bf16.mxu1 %vm951_vm5, %v6404_v35 }
 0x1ff   :  { %1325 = vmatprep.subr.bf16.mxu1 %v11154_v34 }
 0x200   :  { %1270 = vmatpush1.bf16.msra.mxu0 %v8847_v60 }
 0x201   :  { %1271 = vmatprep.subr.bf16.mxu0 %v11154_v34 }
 0x202   :  { %1326 = vmatpush1.bf16.msra.mxu1 %v8865_v3 }
 0x203   :  { %1327 = vmatprep.subr.bf16.mxu1 %v11154_v34  ;;  %1161 = vmatmul.mubr.bf16.gmra.mrb[56].mxu0 %v6403_v15 }
 0x204   :  { %1272 = vmatpush1.bf16.msra.mxu0 %v8875_v28  ;;  %6422 = vmatprep.mubr.msk.bf16.mxu0 %vm951_vm5, %v7702_v13 }
 0x205   :  { %1273 = vmatprep.subr.bf16.mxu0 %v11154_v34  ;;  %1217 = vmatmul.mubr.bf16.gmra.mrb[56].mxu1 %v6403_v15  ;;  %v6489_v15 = vcombine.high %v6483_v4, %v6483_v4 }
 0x206   :  { %1328 = vmatpush1.bf16.msra.mxu1 %v8893_v47  ;;  %6425 = vmatprep.mubr.msk.bf16.mxu1 %vm951_vm5, %v7702_v13 }
 0x207   :  { %1329 = vmatprep.subr.bf16.mxu1 %v11154_v34 }
 0x208   :  { %1274 = vmatpush1.bf16.msra.mxu0 %v8903_v8 }
 0x209   :  { %1275 = vmatprep.subr.bf16.mxu0 %v11154_v34 }
 0x20a   :  { %1330 = vmatpush1.bf16.msra.mxu1 %v8921_v20 }
 0x20b   :  { %1331 = vmatprep.subr.bf16.mxu1 %v11154_v34 }
 0x20c   :  { %1276 = vmatpush1.bf16.msra.mxu0 %v8929_v2 }
 0x20d   :  { %1277 = vmatprep.subr.bf16.mxu0 %v11154_v34 }
 0x20e   :  { %1332 = vmatpush1.bf16.msra.mxu1 %v8939_v36 }
 0x20f   :  { %1333 = vmatprep.subr.bf16.mxu1 %v11154_v34 }
 0x210   :  { %1278 = vmatpush1.bf16.msra.mxu0 %v8947_v51 }
 0x211   :  { %1279 = vmatprep.subr.bf16.mxu0 %v11154_v34 }
 0x212   :  { %1334 = vmatpush1.bf16.msra.mxu1 %v8952_v10 }
 0x213   :  { %1335 = vmatprep.subr.bf16.mxu1 %v11154_v34 }
 0x214   :  { %1280 = vmatpush1.bf16.msra.mxu0 %v8957_v32 }
 0x215   :  { %1414 = vmatprep.subr.bf16.mxu0 %v11154_v34 }
 0x216   :  { %1336 = vmatpush1.bf16.msra.mxu1 %v8964_v27 }
 0x217   :  { %1296 = vmatmul.mubr.bf16.vlgmr.msra.gmra.mrb[60].mxu0 %v7700_v14  ;;  %1470 = vmatprep.subr.bf16.mxu1 %v11154_v34 }
 0x218   :  { %1415 = vmatpush1.bf16.msra.mxu0 %v8774_v12  ;;  %6423 = vmatprep.mubr.msk.bf16.mxu0 %vm951_vm5, %v7703_v19 }
 0x219   :  { %1352 = vmatmul.mubr.bf16.vlgmr.msra.gmra.mrb[60].mxu1 %v7700_v14  ;;  %1416 = vmatprep.subr.bf16.mxu0 %v11154_v34 }
 0x21a   :  { %1471 = vmatpush1.bf16.msra.mxu1 %v8783_v39  ;;  %6426 = vmatprep.mubr.msk.bf16.mxu1 %vm951_vm5, %v7703_v19 }
 0x21b   :  { %1472 = vmatprep.subr.bf16.mxu1 %v11154_v34 }
 0x21c   :  { %1417 = vmatpush1.bf16.msra.mxu0 %v8791_v24 }
 0x21d   :  { %1418 = vmatprep.subr.bf16.mxu0 %v11154_v34 }
 0x21e   :  { %1473 = vmatpush1.bf16.msra.mxu1 %v8809_v9 }
 0x21f   :  { %1304 = vmatmul.mubr.bf16.gmra.mrb[64].mxu0 %v7705_v29  ;;  %1474 = vmatprep.subr.bf16.mxu1 %v11154_v34 }
 0x220   :  { %1419 = vmatpush1.bf16.msra.mxu0 %v8819_v45  ;;  %6424 = vmatprep.mubr.msk.bf16.mxu0 %vm951_vm5, %v6421_v55 }
 0x221   :  { %1420 = vmatprep.subr.bf16.mxu0 %v11154_v34  ;;  %1360 = vmatmul.mubr.bf16.gmra.mrb[64].mxu1 %v7705_v29 }
 0x222   :  { %1475 = vmatpush1.bf16.msra.mxu1 %v8837_v44  ;;  %6427 = vmatprep.mubr.msk.bf16.mxu1 %vm951_vm5, %v6421_v55 }
 0x223   :  { %1476 = vmatprep.subr.bf16.mxu1 %v11154_v34 }
 0x224   :  { %1421 = vmatpush1.bf16.msra.mxu0 %v8847_v60 }
 0x225   :  { %1422 = vmatprep.subr.bf16.mxu0 %v11154_v34 }
 0x226   :  { %1477 = vmatpush1.bf16.msra.mxu1 %v8865_v3 }
 0x227   :  { %1478 = vmatprep.subr.bf16.mxu1 %v11154_v34  ;;  %1312 = vmatmul.mubr.bf16.gmra.mrb[68].mxu0 %v6420_v38 }
 0x228   :  { %1423 = vmatpush1.bf16.msra.mxu0 %v8875_v28  ;;  %6439 = vmatprep.mubr.msk.bf16.mxu0 %vm951_vm5, %v7710_v63 }
 0x229   :  { %1424 = vmatprep.subr.bf16.mxu0 %v11154_v34  ;;  %1368 = vmatmul.mubr.bf16.gmra.mrb[68].mxu1 %v6420_v38 }
 0x22a   :  { %1479 = vmatpush1.bf16.msra.mxu1 %v8893_v47  ;;  %6442 = vmatprep.mubr.msk.bf16.mxu1 %vm951_vm5, %v7710_v63  ;;  %v6488_v63 = vcombine.low %v6483_v4, %v6483_v4 }
 0x22b   :  { %1480 = vmatprep.subr.bf16.mxu1 %v11154_v34 }
 0x22c   :  { %1425 = vmatpush1.bf16.msra.mxu0 %v8903_v8 }
 0x22d   :  { %1426 = vmatprep.subr.bf16.mxu0 %v11154_v34 }
 0x22e   :  { %1481 = vmatpush1.bf16.msra.mxu1 %v8921_v20 }
 0x22f   :  { %1482 = vmatprep.subr.bf16.mxu1 %v11154_v34 }
 0x230   :  { %1427 = vmatpush1.bf16.msra.mxu0 %v8929_v2 }
 0x231   :  { %1428 = vmatprep.subr.bf16.mxu0 %v11154_v34 }
 0x232   :  { %1483 = vmatpush1.bf16.msra.mxu1 %v8939_v36 }
 0x233   :  { %1484 = vmatprep.subr.bf16.mxu1 %v11154_v34 }
 0x234   :  { %1429 = vmatpush1.bf16.msra.mxu0 %v8947_v51 }
 0x235   :  { %1430 = vmatprep.subr.bf16.mxu0 %v11154_v34 }
 0x236   :  { %1485 = vmatpush1.bf16.msra.mxu1 %v8952_v10 }
 0x237   :  { %1486 = vmatprep.subr.bf16.mxu1 %v11154_v34 }
 0x238   :  { %1431 = vmatpush1.bf16.msra.mxu0 %v8957_v32 }
 0x239   :  { %1565 = vmatprep.subr.bf16.mxu0 %v11154_v34 }
 0x23a   :  { %1487 = vmatpush1.bf16.msra.mxu1 %v8964_v27 }
 0x23b   :  { %1447 = vmatmul.mubr.bf16.vlgmr.msra.gmra.mrb[72].mxu0 %v7708_v23  ;;  %1621 = vmatprep.subr.bf16.mxu1 %v11154_v34 }
 0x23c   :  { %1566 = vmatpush1.bf16.msra.mxu0 %v8774_v12  ;;  %6440 = vmatprep.mubr.msk.bf16.mxu0 %vm951_vm5, %v7711_v26 }
 0x23d   :  { %1503 = vmatmul.mubr.bf16.vlgmr.msra.gmra.mrb[72].mxu1 %v7708_v23  ;;  %1567 = vmatprep.subr.bf16.mxu0 %v11154_v34 }
 0x23e   :  { %1622 = vmatpush1.bf16.msra.mxu1 %v8783_v39  ;;  %6443 = vmatprep.mubr.msk.bf16.mxu1 %vm951_vm5, %v7711_v26 }
 0x23f   :  { %1623 = vmatprep.subr.bf16.mxu1 %v11154_v34 }
 0x240   :  { %1568 = vmatpush1.bf16.msra.mxu0 %v8791_v24 }
 0x241   :  { %1569 = vmatprep.subr.bf16.mxu0 %v11154_v34 }
 0x242   :  { %1624 = vmatpush1.bf16.msra.mxu1 %v8809_v9 }
 0x243   :  { %1625 = vmatprep.subr.bf16.mxu1 %v11154_v34  ;;  %1455 = vmatmul.mubr.bf16.gmra.mrb[76].mxu0 %v7713_v43 }
 0x244   :  { %1570 = vmatpush1.bf16.msra.mxu0 %v8819_v45  ;;  %6441 = vmatprep.mubr.msk.bf16.mxu0 %vm951_vm5, %v6438_v57 }
 0x245   :  { %1571 = vmatprep.subr.bf16.mxu0 %v11154_v34  ;;  %1511 = vmatmul.mubr.bf16.gmra.mrb[76].mxu1 %v7713_v43 }
 0x246   :  { %1626 = vmatpush1.bf16.msra.mxu1 %v8837_v44  ;;  %6444 = vmatprep.mubr.msk.bf16.mxu1 %vm951_vm5, %v6438_v57 }
 0x247   :  { %1627 = vmatprep.subr.bf16.mxu1 %v11154_v34 }
 0x248   :  { %1572 = vmatpush1.bf16.msra.mxu0 %v8847_v60 }
 0x249   :  { %1573 = vmatprep.subr.bf16.mxu0 %v11154_v34 }
 0x24a   :  { %1628 = vmatpush1.bf16.msra.mxu1 %v8865_v3 }
 0x24b   :  { %1629 = vmatprep.subr.bf16.mxu1 %v11154_v34  ;;  %1463 = vmatmul.mubr.bf16.gmra.mrb[80].mxu0 %v6437_v25 }
 0x24c   :  { %1574 = vmatpush1.bf16.msra.mxu0 %v8875_v28  ;;  %6456 = vmatprep.mubr.msk.bf16.mxu0 %vm951_vm5, %v7718_v30 }
 0x24d   :  { %1575 = vmatprep.subr.bf16.mxu0 %v11154_v34  ;;  %1519 = vmatmul.mubr.bf16.gmra.mrb[80].mxu1 %v6437_v25 }
 0x24e   :  { %1630 = vmatpush1.bf16.msra.mxu1 %v8893_v47  ;;  %6459 = vmatprep.mubr.msk.bf16.mxu1 %vm951_vm5, %v7718_v30 }
 0x24f   :  { %1631 = vmatprep.subr.bf16.mxu1 %v11154_v34 }
 0x250   :  { %1576 = vmatpush1.bf16.msra.mxu0 %v8903_v8 }
 0x251   :  { %1577 = vmatprep.subr.bf16.mxu0 %v11154_v34 }
 0x252   :  { %1632 = vmatpush1.bf16.msra.mxu1 %v8921_v20 }
 0x253   :  { %1633 = vmatprep.subr.bf16.mxu1 %v11154_v34 }
 0x254   :  { %1578 = vmatpush1.bf16.msra.mxu0 %v8929_v2 }
 0x255   :  { %1579 = vmatprep.subr.bf16.mxu0 %v11154_v34 }
 0x256   :  { %1634 = vmatpush1.bf16.msra.mxu1 %v8939_v36 }
 0x257   :  { %1635 = vmatprep.subr.bf16.mxu1 %v11154_v34 }
 0x258   :  { %1580 = vmatpush1.bf16.msra.mxu0 %v8947_v51 }
 0x259   :  { %1581 = vmatprep.subr.bf16.mxu0 %v11154_v34 }
 0x25a   :  { %1636 = vmatpush1.bf16.msra.mxu1 %v8952_v10 }
 0x25b   :  { %1637 = vmatprep.subr.bf16.mxu1 %v11154_v34 }
 0x25c   :  { %1582 = vmatpush1.bf16.msra.mxu0 %v8957_v32 }
 0x25d   :  { %1716 = vmatprep.subr.bf16.mxu0 %v11154_v34 }
 0x25e   :  { %1638 = vmatpush1.bf16.msra.mxu1 %v8964_v27 }
 0x25f   :  { %1772 = vmatprep.subr.bf16.mxu1 %v11154_v34  ;;  %1598 = vmatmul.mubr.bf16.vlgmr.msra.gmra.mrb[84].mxu0 %v7716_v40 }
 0x260   :  { %1717 = vmatpush1.bf16.msra.mxu0 %v8774_v12  ;;  %6457 = vmatprep.mubr.msk.bf16.mxu0 %vm951_vm5, %v7719_v42 }
 0x261   :  { %1654 = vmatmul.mubr.bf16.vlgmr.msra.gmra.mrb[84].mxu1 %v7716_v40  ;;  %1718 = vmatprep.subr.bf16.mxu0 %v11154_v34 }
 0x262   :  { %1773 = vmatpush1.bf16.msra.mxu1 %v8783_v39  ;;  %6460 = vmatprep.mubr.msk.bf16.mxu1 %vm951_vm5, %v7719_v42 }
 0x263   :  { %1774 = vmatprep.subr.bf16.mxu1 %v11154_v34 }
 0x264   :  { %1719 = vmatpush1.bf16.msra.mxu0 %v8791_v24 }
 0x265   :  { %1720 = vmatprep.subr.bf16.mxu0 %v11154_v34 }
 0x266   :  { %1775 = vmatpush1.bf16.msra.mxu1 %v8809_v9 }
 0x267   :  { %1776 = vmatprep.subr.bf16.mxu1 %v11154_v34  ;;  %1606 = vmatmul.mubr.bf16.gmra.mrb[88].mxu0 %v7721_v50 }
 0x268   :  { %1721 = vmatpush1.bf16.msra.mxu0 %v8819_v45  ;;  %6458 = vmatprep.mubr.msk.bf16.mxu0 %vm951_vm5, %v6455_v6 }
 0x269   :  { %1722 = vmatprep.subr.bf16.mxu0 %v11154_v34  ;;  %1662 = vmatmul.mubr.bf16.gmra.mrb[88].mxu1 %v7721_v50  ;;  %v7740_v50 = vld [vmem:[%s11144_s2 + $0x118] ss:$8 sps:$4 sm:$0xff]  }
 0x26a   :  { %1777 = vmatpush1.bf16.msra.mxu1 %v8837_v44  ;;  %6461 = vmatprep.mubr.msk.bf16.mxu1 %vm951_vm5, %v6455_v6 }
 0x26b   :  { %1778 = vmatprep.subr.bf16.mxu1 %v11154_v34 }
 0x26c   :  { %1723 = vmatpush1.bf16.msra.mxu0 %v8847_v60 }
 0x26d   :  { %1724 = vmatprep.subr.bf16.mxu0 %v11154_v34 }
 0x26e   :  { %1779 = vmatpush1.bf16.msra.mxu1 %v8865_v3 }
 0x26f   :  { %1780 = vmatprep.subr.bf16.mxu1 %v11154_v34  ;;  %1614 = vmatmul.mubr.bf16.gmra.mrb[92].mxu0 %v6454_v48 }
 0x270   :  { %1725 = vmatpush1.bf16.msra.mxu0 %v8875_v28  ;;  %6473 = vmatprep.mubr.msk.bf16.mxu0 %vm951_vm5, %v7726_v41 }
 0x271   :  { %1726 = vmatprep.subr.bf16.mxu0 %v11154_v34  ;;  %1670 = vmatmul.mubr.bf16.gmra.mrb[92].mxu1 %v6454_v48 }
 0x272   :  { %1781 = vmatpush1.bf16.msra.mxu1 %v8893_v47  ;;  %6476 = vmatprep.mubr.msk.bf16.mxu1 %vm951_vm5, %v7726_v41 }
 0x273   :  { %1782 = vmatprep.subr.bf16.mxu1 %v11154_v34 }
 0x274   :  { %1727 = vmatpush1.bf16.msra.mxu0 %v8903_v8 }
 0x275   :  { %1728 = vmatprep.subr.bf16.mxu0 %v11154_v34 }
 0x276   :  { %1783 = vmatpush1.bf16.msra.mxu1 %v8921_v20 }
 0x277   :  { %1784 = vmatprep.subr.bf16.mxu1 %v11154_v34 }
 0x278   :  { %1729 = vmatpush1.bf16.msra.mxu0 %v8929_v2 }
 0x279   :  { %1730 = vmatprep.subr.bf16.mxu0 %v11154_v34 }
 0x27a   :  { %1785 = vmatpush1.bf16.msra.mxu1 %v8939_v36 }
 0x27b   :  { %1786 = vmatprep.subr.bf16.mxu1 %v11154_v34 }
 0x27c   :  { %1731 = vmatpush1.bf16.msra.mxu0 %v8947_v51 }
 0x27d   :  { %1732 = vmatprep.subr.bf16.mxu0 %v11154_v34 }
 0x27e   :  { %1787 = vmatpush1.bf16.msra.mxu1 %v8952_v10 }
 0x27f   :  { %1788 = vmatprep.subr.bf16.mxu1 %v11154_v34 }
 0x280   :  { %1733 = vmatpush1.bf16.msra.mxu0 %v8957_v32 }
 0x281   :  { %1867 = vmatprep.subr.bf16.mxu0 %v11154_v34 }
 0x282   :  { %1789 = vmatpush1.bf16.msra.mxu1 %v8964_v27 }
 0x283   :  { %1749 = vmatmul.mubr.bf16.vlgmr.msra.gmra.mrb[96].mxu0 %v7724_v56  ;;  %1923 = vmatprep.subr.bf16.mxu1 %v11154_v34 }
 0x284   :  { %1868 = vmatpush1.bf16.msra.mxu0 %v8774_v12  ;;  %6474 = vmatprep.mubr.msk.bf16.mxu0 %vm951_vm5, %v7727_v52 }
 0x285   :  { %1805 = vmatmul.mubr.bf16.vlgmr.msra.gmra.mrb[96].mxu1 %v7724_v56  ;;  %1869 = vmatprep.subr.bf16.mxu0 %v11154_v34 }
 0x286   :  { %1924 = vmatpush1.bf16.msra.mxu1 %v8783_v39  ;;  %6477 = vmatprep.mubr.msk.bf16.mxu1 %vm951_vm5, %v7727_v52 }
 0x287   :  { %1925 = vmatprep.subr.bf16.mxu1 %v11154_v34 }
 0x288   :  { %1870 = vmatpush1.bf16.msra.mxu0 %v8791_v24 }
 0x289   :  { %1871 = vmatprep.subr.bf16.mxu0 %v11154_v34 }
 0x28a   :  { %1926 = vmatpush1.bf16.msra.mxu1 %v8809_v9 }
 0x28b   :  { %1757 = vmatmul.mubr.bf16.gmra.mrb[100].mxu0 %v7729_v54  ;;  %1927 = vmatprep.subr.bf16.mxu1 %v11154_v34 }
 0x28c   :  { %1872 = vmatpush1.bf16.msra.mxu0 %v8819_v45  ;;  %6475 = vmatprep.mubr.msk.bf16.mxu0 %vm951_vm5, %v6472_v46 }
 0x28d   :  { %1813 = vmatmul.mubr.bf16.gmra.mrb[100].mxu1 %v7729_v54  ;;  %1873 = vmatprep.subr.bf16.mxu0 %v11154_v34 }
 0x28e   :  { %1928 = vmatpush1.bf16.msra.mxu1 %v8837_v44  ;;  %6478 = vmatprep.mubr.msk.bf16.mxu1 %vm951_vm5, %v6472_v46 }
 0x28f   :  { %1929 = vmatprep.subr.bf16.mxu1 %v11154_v34 }
 0x290   :  { %1874 = vmatpush1.bf16.msra.mxu0 %v8847_v60 }
 0x291   :  { %1875 = vmatprep.subr.bf16.mxu0 %v11154_v34 }
 0x292   :  { %1930 = vmatpush1.bf16.msra.mxu1 %v8865_v3 }
 0x293   :  { %1765 = vmatmul.mubr.bf16.gmra.mrb[104].mxu0 %v6471_v62  ;;  %1931 = vmatprep.subr.bf16.mxu1 %v11154_v34 }
 0x294   :  { %1876 = vmatpush1.bf16.msra.mxu0 %v8875_v28  ;;  %6490 = vmatprep.mubr.msk.bf16.mxu0 %vm951_vm5, %v7734_v61 }
 0x295   :  { %1821 = vmatmul.mubr.bf16.gmra.mrb[104].mxu1 %v6471_v62  ;;  %1877 = vmatprep.subr.bf16.mxu0 %v11154_v34 }
 0x296   :  { %1932 = vmatpush1.bf16.msra.mxu1 %v8893_v47  ;;  %6493 = vmatprep.mubr.msk.bf16.mxu1 %vm951_vm5, %v7734_v61 }
 0x297   :  { %1933 = vmatprep.subr.bf16.mxu1 %v11154_v34 }
 0x298   :  { %1878 = vmatpush1.bf16.msra.mxu0 %v8903_v8 }
 0x299   :  { %1879 = vmatprep.subr.bf16.mxu0 %v11154_v34 }
 0x29a   :  { %1934 = vmatpush1.bf16.msra.mxu1 %v8921_v20 }
 0x29b   :  { %1935 = vmatprep.subr.bf16.mxu1 %v11154_v34 }
 0x29c   :  { %1880 = vmatpush1.bf16.msra.mxu0 %v8929_v2 }
 0x29d   :  { %1881 = vmatprep.subr.bf16.mxu0 %v11154_v34 }
 0x29e   :  { %1936 = vmatpush1.bf16.msra.mxu1 %v8939_v36 }
 0x29f   :  { %1937 = vmatprep.subr.bf16.mxu1 %v11154_v34 }
 0x2a0   :  { %1882 = vmatpush1.bf16.msra.mxu0 %v8947_v51 }
 0x2a1   :  { %1883 = vmatprep.subr.bf16.mxu0 %v11154_v34 }
 0x2a2   :  { %1938 = vmatpush1.bf16.msra.mxu1 %v8952_v10  ;;  %v9304_v59 = vpop.f32.mrb[36].mxu0 }
 0x2a3   :  { %1939 = vmatprep.subr.bf16.mxu1 %v11154_v34  ;;  %v997_v18 = vpop.f32.mrb[37].mxu0 }
 0x2a4   :  { %1884 = vmatpush1.bf16.msra.mxu0 %v8957_v32  ;;  %v9314_v58 = vpop.f32.mrb[38].mxu0  ;;  %v9316_v11 = vpop.f32.mrb[36].mxu1  ;;  %v7745_v18 = vld [vmem:[%s11144_s2 + $0x128] ss:$8 sps:$4 sm:$0xff]  }
 0x2a5   :  { %11159 = vst [vmem:[#allocation8_spill] sm:$0xff] %v9316_v11  ;;  %2018 = vmatprep.subr.bf16.mxu0 %v11154_v34  ;;  %v1000_v21 = vpop.f32.mrb[39].mxu0  ;;  %v1053_v49 = vpop.f32.mrb[37].mxu1 }
 0x2a6   :  { %1940 = vmatpush1.bf16.msra.mxu1 %v8964_v27  ;;  %v9320_v5 = vpop.f32.mrb[38].mxu1 }
 0x2a7   :  { %11160 = vst [vmem:[#allocation9_spill] sm:$0xff] %v9320_v5  ;;  %1900 = vmatmul.mubr.bf16.vlgmr.msra.gmra.mrb[108].mxu0 %v7732_v0  ;;  %2074 = vmatprep.subr.bf16.mxu1 %v11154_v34  ;;  %v1056_v22 = vpop.f32.mrb[39].mxu1 }
 0x2a8   :  { %2019 = vmatpush1.bf16.msra.mxu0 %v8774_v12  ;;  %6491 = vmatprep.mubr.msk.bf16.mxu0 %vm951_vm5, %v7735_v37 }
 0x2a9   :  { %1956 = vmatmul.mubr.bf16.vlgmr.msra.gmra.mrb[108].mxu1 %v7732_v0  ;;  %2020 = vmatprep.subr.bf16.mxu0 %v11154_v34 }
 0x2aa   :  { %2075 = vmatpush1.bf16.msra.mxu1 %v8783_v39  ;;  %6494 = vmatprep.mubr.msk.bf16.mxu1 %vm951_vm5, %v7735_v37  ;;  %v9331_v33 = vpop.f32.mrb[40].mxu0 }
 0x2ab   :  { %2076 = vmatprep.subr.bf16.mxu1 %v11154_v34  ;;  %v1005_v35 = vpop.f32.mrb[41].mxu0 }
 0x2ac   :  { %2021 = vmatpush1.bf16.msra.mxu0 %v8791_v24  ;;  %v9338_v13 = vpop.f32.mrb[42].mxu0  ;;  %v9340_v14 = vpop.f32.mrb[40].mxu1 }
 0x2ad   :  { %11161 = vst [vmem:[#allocation10_spill] sm:$0xff] %v9340_v14  ;;  %2022 = vmatprep.subr.bf16.mxu0 %v11154_v34  ;;  %v1008_v19 = vpop.f32.mrb[43].mxu0  ;;  %v1061_v31 = vpop.f32.mrb[41].mxu1 }
 0x2ae   :  { %2077 = vmatpush1.bf16.msra.mxu1 %v8809_v9  ;;  %v9344_v29 = vpop.f32.mrb[42].mxu1 }
 0x2af   :  { %11162 = vst [vmem:[#allocation11_spill] sm:$0xff] %v9344_v29  ;;  %1908 = vmatmul.mubr.bf16.gmra.mrb[112].mxu0 %v7737_v7  ;;  %2078 = vmatprep.subr.bf16.mxu1 %v11154_v34  ;;  %v1064_v55 = vpop.f32.mrb[43].mxu1 }
 0x2b0   :  { %2023 = vmatpush1.bf16.msra.mxu0 %v8819_v45  ;;  %6492 = vmatprep.mubr.msk.bf16.mxu0 %vm951_vm5, %v6489_v15 }
 0x2b1   :  { %1964 = vmatmul.mubr.bf16.gmra.mrb[112].mxu1 %v7737_v7  ;;  %2024 = vmatprep.subr.bf16.mxu0 %v11154_v34 }
 0x2b2   :  { %2079 = vmatpush1.bf16.msra.mxu1 %v8837_v44  ;;  %6495 = vmatprep.mubr.msk.bf16.mxu1 %vm951_vm5, %v6489_v15  ;;  %v9352_v38 = vpop.f32.mrb[44].mxu0 }
 0x2b3   :  { %11163 = vst [vmem:[#allocation12_spill] sm:$0xff] %v9352_v38  ;;  %2080 = vmatprep.subr.bf16.mxu1 %v11154_v34  ;;  %v1013_v23 = vpop.f32.mrb[45].mxu0 }
 0x2b4   :  { %2025 = vmatpush1.bf16.msra.mxu0 %v8847_v60  ;;  %v1014_v26 = vpop.f32.mrb[46].mxu0  ;;  %v9359_v43 = vpop.f32.mrb[44].mxu1 }
 0x2b5   :  { %11164 = vst [vmem:[#allocation13_spill] sm:$0xff] %v9359_v43  ;;  %2026 = vmatprep.subr.bf16.mxu0 %v11154_v34  ;;  %v1015_v57 = vpop.f32.mrb[47].mxu0  ;;  %v1069_v25 = vpop.f32.mrb[45].mxu1 }
 0x2b6   :  { %2081 = vmatpush1.bf16.msra.mxu1 %v8865_v3  ;;  %v1070_v30 = vpop.f32.mrb[46].mxu1  ;;  %v6517_v57 = vld [vmem:[%s11144_s2 + $0x160] sm:$0x33] }
 0x2b7   :  { %1916 = vmatmul.mubr.bf16.gmra.mrb[116].mxu0 %v6488_v63  ;;  %2082 = vmatprep.subr.bf16.mxu1 %v11154_v34  ;;  %v1071_v40 = vpop.f32.mrb[47].mxu1  ;;  %v7753_v30 = vld [vmem:[%s11144_s2 + $0x150] ss:$8 sps:$4 sm:$0xff]  }
 0x2b8   :  { %2027 = vmatpush1.bf16.msra.mxu0 %v8875_v28  ;;  %6507 = vmatprep.mubr.msk.bf16.mxu0 %vm951_vm5, %v7742_v16 }
 0x2b9   :  { %1972 = vmatmul.mubr.bf16.gmra.mrb[116].mxu1 %v6488_v63  ;;  %2028 = vmatprep.subr.bf16.mxu0 %v11154_v34 }
 0x2ba   :  { %2083 = vmatpush1.bf16.msra.mxu1 %v8893_v47  ;;  %6510 = vmatprep.mubr.msk.bf16.mxu1 %vm951_vm5, %v7742_v16 }
 0x2bb   :  { %2084 = vmatprep.subr.bf16.mxu1 %v11154_v34 }
 0x2bc   :  { %2029 = vmatpush1.bf16.msra.mxu0 %v8903_v8 }
 0x2bd   :  { %2030 = vmatprep.subr.bf16.mxu0 %v11154_v34 }
 0x2be   :  { %2085 = vmatpush1.bf16.msra.mxu1 %v8921_v20 }
 0x2bf   :  { %2086 = vmatprep.subr.bf16.mxu1 %v11154_v34 }
 0x2c0   :  { %2031 = vmatpush1.bf16.msra.mxu0 %v8929_v2 }
 0x2c1   :  { %2032 = vmatprep.subr.bf16.mxu0 %v11154_v34 }
 0x2c2   :  { %2087 = vmatpush1.bf16.msra.mxu1 %v8939_v36 }
 0x2c3   :  { %2088 = vmatprep.subr.bf16.mxu1 %v11154_v34 }
 0x2c4   :  { %2033 = vmatpush1.bf16.msra.mxu0 %v8947_v51 }
 0x2c5   :  { %2034 = vmatprep.subr.bf16.mxu0 %v11154_v34 }
 0x2c6   :  { %2089 = vmatpush1.bf16.msra.mxu1 %v8952_v10  ;;  %v1146_v42 = vpop.f32.mrb[48].mxu0 }
 0x2c7   :  { %v1148_v17 = vpop.f32.mrb[49].mxu0  ;;  %2090 = vmatprep.subr.bf16.mxu1 %v11154_v34 }
 0x2c8   :  { %v1149_v6 = vpop.f32.mrb[50].mxu0  ;;  %2035 = vmatpush1.bf16.msra.mxu0 %v8957_v32  ;;  %v9386_v48 = vpop.f32.mrb[48].mxu1  ;;  %v6523_v17 = vcombine.high %v6517_v57, %v6517_v57 }
 0x2c9   :  { %v7474_v41 = vpack.i.bf16 %v1149_v6, %v1146_v42  ;;  %2169 = vmatprep.subr.bf16.mxu0 %v11154_v34  ;;  %v1151_v56 = vpop.f32.mrb[51].mxu0  ;;  %v1204_v52 = vpop.f32.mrb[49].mxu1 }
 0x2ca   :  { %2091 = vmatpush1.bf16.msra.mxu1 %v8964_v27  ;;  %v9393_v54 = vpop.f32.mrb[50].mxu1 }
 0x2cb   :  { %2051 = vmatmul.mubr.bf16.vlgmr.msra.gmra.mrb[120].mxu0 %v7740_v50  ;;  %2225 = vmatprep.subr.bf16.mxu1 %v11154_v34  ;;  %v1207_v62 = vpop.f32.mrb[51].mxu1  ;;  %v11174_v38 = vpack.i.bf16 %v9393_v54, %v9386_v48 }
 0x2cc   :  { %7475 = vrot.lane.b32.xlu0 %v7474_v41, %s8104_s13  ;;  %2170 = vmatpush1.bf16.msra.mxu0 %v8774_v12  ;;  %v6500_v12 = vld [vmem:[%s11144_s2 + $0x138] sm:$0x33] }
 0x2cd   :  { %2107 = vmatmul.mubr.bf16.vlgmr.msra.gmra.mrb[120].mxu1 %v7740_v50  ;;  %2171 = vmatprep.subr.bf16.mxu0 %v11154_v34  ;;  %v6506_v4 = vcombine.high %v6500_v12, %v6500_v12 }
 0x2ce   :  { %2226 = vmatpush1.bf16.msra.mxu1 %v8783_v39  ;;  %v1154_v61 = vpop.f32.mrb[52].mxu0  ;;  %6508 = vmatprep.mubr.msk.bf16.mxu0 %vm951_vm5, %v7743_v53 }
 0x2cf   :  { %v1156_v0 = vpop.f32.mrb[53].mxu0  ;;  %2227 = vmatprep.subr.bf16.mxu1 %v11154_v34  ;;  %6511 = vmatprep.mubr.msk.bf16.mxu1 %vm951_vm5, %v7743_v53 }
 0x2d0   :  { %v1157_v37 = vpop.f32.mrb[54].mxu0  ;;  %2172 = vmatpush1.bf16.msra.mxu0 %v8791_v24  ;;  %v9412_v39 = vpop.f32.mrb[52].mxu1  ;;  %v6522_v0 = vcombine.low %v6517_v57, %v6517_v57 }
 0x2d1   :  { %v7479_v21 = vpack.i.bf16 %v1157_v37, %v1154_v61  ;;  %2173 = vmatprep.subr.bf16.mxu0 %v11154_v34  ;;  %v1159_v49 = vpop.f32.mrb[55].mxu0  ;;  %v1212_v22 = vpop.f32.mrb[53].mxu1 }
 0x2d2   :  { %2228 = vmatpush1.bf16.msra.mxu1 %v8809_v9  ;;  %v9416_v7 = vpop.f32.mrb[54].mxu1  ;;  %v6505_v9 = vcombine.low %v6500_v12, %v6500_v12 }
 0x2d3   :  { %2059 = vmatmul.mubr.bf16.gmra.mrb[124].mxu0 %v7745_v18  ;;  %2229 = vmatprep.subr.bf16.mxu1 %v11154_v34  ;;  %v1215_v15 = vpop.f32.mrb[55].mxu1 }
 0x2d4   :  { %7480 = vrot.lane.b32.xlu1 %v7479_v21, %s8104_s13  ;;  %2174 = vmatpush1.bf16.msra.mxu0 %v8819_v45  ;;  %v7750_v45 = vld [vmem:[%s11144_s2 + $0x144] ss:$8 sps:$4 sm:$0xff]  }
 0x2d5   :  { %2115 = vmatmul.mubr.bf16.gmra.mrb[124].mxu1 %v7745_v18  ;;  %2175 = vmatprep.subr.bf16.mxu0 %v11154_v34 }
 0x2d6   :  { %2230 = vmatpush1.bf16.msra.mxu1 %v8837_v44  ;;  %6509 = vmatprep.mubr.msk.bf16.mxu0 %vm951_vm5, %v6506_v4  ;;  %v9426_v24 = vpop.f32.mrb[56].mxu0 }
 0x2d7   :  { %2231 = vmatprep.subr.bf16.mxu1 %v11154_v34  ;;  %6512 = vmatprep.mubr.msk.bf16.mxu1 %vm951_vm5, %v6506_v4  ;;  %v1164_v19 = vpop.f32.mrb[57].mxu0 }
 0x2d8   :  { %2176 = vmatpush1.bf16.msra.mxu0 %v8847_v60  ;;  %v1165_v31 = vpop.f32.mrb[58].mxu0  ;;  %v9431_v55 = vpop.f32.mrb[56].mxu1 }
 0x2d9   :  { %2177 = vmatprep.subr.bf16.mxu0 %v11154_v34  ;;  %v1166_v44 = vpop.f32.mrb[59].mxu0  ;;  %v1220_v63 = vpop.f32.mrb[57].mxu1 }
 0x2da   :  { %2232 = vmatpush1.bf16.msra.mxu1 %v8865_v3  ;;  %v1221_v23 = vpop.f32.mrb[58].mxu1 }
 0x2db   :  { %2067 = vmatmul.mubr.bf16.gmra.mrb[128].mxu0 %v6505_v9  ;;  %2233 = vmatprep.subr.bf16.mxu1 %v11154_v34  ;;  %v1222_v26 = vpop.f32.mrb[59].mxu1 }
 0x2dc   :  { %2178 = vmatpush1.bf16.msra.mxu0 %v8875_v28  ;;  %6524 = vmatprep.mubr.msk.bf16.mxu0 %vm951_vm5, %v7750_v45  ;;  %v7748_v28 = vld [vmem:[%s11144_s2 + $0x140] ss:$8 sps:$4 sm:$0xff]  }
 0x2dd   :  { %2123 = vmatmul.mubr.bf16.gmra.mrb[128].mxu1 %v6505_v9  ;;  %2179 = vmatprep.subr.bf16.mxu0 %v11154_v34 }
 0x2de   :  { %2234 = vmatpush1.bf16.msra.mxu1 %v8893_v47  ;;  %6527 = vmatprep.mubr.msk.bf16.mxu1 %vm951_vm5, %v7750_v45 }
 0x2df   :  { %2235 = vmatprep.subr.bf16.mxu1 %v11154_v34 }
 0x2e0   :  { %2180 = vmatpush1.bf16.msra.mxu0 %v8903_v8 }
 0x2e1   :  { %2181 = vmatprep.subr.bf16.mxu0 %v11154_v34 }
 0x2e2   :  { %2236 = vmatpush1.bf16.msra.mxu1 %v8921_v20  ;;  %v7751_v20 = vld [vmem:[%s11144_s2 + $0x154] ss:$8 sps:$4 sm:$0xff]   ;;  %s8106_s2 = smov 96  }
 0x2e3   :  { %2237 = vmatprep.subr.bf16.mxu1 %v11154_v34 }
 0x2e4   :  { %2182 = vmatpush1.bf16.msra.mxu0 %v8929_v2 }
 0x2e5   :  { %2183 = vmatprep.subr.bf16.mxu0 %v11154_v34 }
 0x2e6   :  { %2238 = vmatpush1.bf16.msra.mxu1 %v8939_v36 }
 0x2e7   :  { %2239 = vmatprep.subr.bf16.mxu1 %v11154_v34 }
 0x2e8   :  { %2184 = vmatpush1.bf16.msra.mxu0 %v8947_v51 }
 0x2e9   :  { %2185 = vmatprep.subr.bf16.mxu0 %v11154_v34 }
 0x2ea   :  { %2240 = vmatpush1.bf16.msra.mxu1 %v8952_v10  ;;  %v1297_v60 = vpop.f32.mrb[60].mxu0 }
 0x2eb   :  { %v1299_v3 = vpop.f32.mrb[61].mxu0  ;;  %2241 = vmatprep.subr.bf16.mxu1 %v11154_v34 }
 0x2ec   :  { %v1300_v47 = vpop.f32.mrb[62].mxu0  ;;  %2186 = vmatpush1.bf16.msra.mxu0 %v8957_v32  ;;  %v9461_v8 = vpop.f32.mrb[60].mxu1 }
 0x2ed   :  { %v7484_v2 = vpack.i.bf16 %v1300_v47, %v1297_v60  ;;  %v1302_v36 = vpop.f32.mrb[63].mxu0  ;;  %v1355_v51 = vpop.f32.mrb[61].mxu1 }
 0x2ee   :  { %2242 = vmatpush1.bf16.msra.mxu1 %v8964_v27  ;;  %v9467_v10 = vpop.f32.mrb[62].mxu1 }
 0x2ef   :  { %7485 = vrot.lane.b32.xlu1 %v7484_v2, %s8105_s23  ;;  %v1358_v32 = vpop.f32.mrb[63].mxu1  ;;  %2202 = vmatmul.mubr.bf16.vlgmr.msra.gmra.mrb[132].mxu0 %v7748_v28 }
 0x2f0   :  { %6525 = vmatprep.mubr.msk.bf16.mxu0 %vm951_vm5, %v7751_v20  ;;  %7194 = vmatprep.subr.bf16.mxu1 %v11156_v1 }
 0x2f1   :  { %2258 = vmatmul.mubr.bf16.vlgmr.msra.gmra.mrb[132].mxu1 %v7748_v28 }
 0x2f2   :  { %v1305_v27 = vpop.f32.mrb[64].mxu0  ;;  %6528 = vmatprep.mubr.msk.bf16.mxu1 %vm951_vm5, %v7751_v20 }
 0x2f3   :  { %v1307_v25 = vpop.f32.mrb[65].mxu0 }
 0x2f4   :  { %v1308_v40 = vpop.f32.mrb[66].mxu0  ;;  %v9481_v42 = vpop.f32.mrb[64].mxu1 }
 0x2f5   :  { %v7489_v50 = vpack.i.bf16 %v1308_v40, %v1305_v27  ;;  %v1310_v6 = vpop.f32.mrb[67].mxu0  ;;  %v1363_v41 = vpop.f32.mrb[65].mxu1 }
 0x2f6   :  { %v9483_v56 = vpop.f32.mrb[66].mxu1 }
 0x2f7   :  { %7490 = vrot.lane.b32.xlu1 %v7489_v50, %s8105_s23  ;;  %v1366_v53 = vpop.f32.mrb[67].mxu1  ;;  %2210 = vmatmul.mubr.bf16.gmra.mrb[136].mxu0 %v7753_v30 }
 0x2f8   :  { %6526 = vmatprep.mubr.msk.bf16.mxu0 %vm951_vm5, %v6523_v17 }
 0x2f9   :  { %2266 = vmatmul.mubr.bf16.gmra.mrb[136].mxu1 %v7753_v30 }
 0x2fa   :  { %v9489_v62 = vpop.f32.mrb[68].mxu0  ;;  %6529 = vmatprep.mubr.msk.bf16.mxu1 %vm951_vm5, %v6523_v17  ;;  %vm2531_vm5 = vcmask 523264  }
 0x2fb   :  { %v1315_v61 = vpop.f32.mrb[69].mxu0 }
 0x2fc   :  { %v1316_v18 = vpop.f32.mrb[70].mxu0  ;;  %v9492_v12 = vpop.f32.mrb[68].mxu1 }
 0x2fd   :  { %v1317_v37 = vpop.f32.mrb[71].mxu0  ;;  %v1371_v21 = vpop.f32.mrb[69].mxu1 }
 0x2fe   :  { %v1372_v49 = vpop.f32.mrb[70].mxu1 }
 0x2ff   :  { %v1373_v22 = vpop.f32.mrb[71].mxu1  ;;  %2218 = vmatmul.mubr.bf16.gmra.mrb[140].mxu0 %v6522_v0 }
 0x301   :  { %2274 = vmatmul.mubr.bf16.gmra.mrb[140].mxu1 %v6522_v0 }
 0x302   :  { %7198 = vmatprep.mubr.msk.bf16.mxu1 %vm8102_vm2, %v11156_v1 }
 0x30e   :  { %v1448_v4 = vpop.f32.mrb[72].mxu0 }
 0x30f   :  { %v1450_v15 = vpop.f32.mrb[73].mxu0 }
 0x310   :  { %v1451_v9 = vpop.f32.mrb[74].mxu0  ;;  %v9496_v19 = vpop.f32.mrb[72].mxu1 }
 0x311   :  { %v7494_v31 = vpack.i.bf16 %v1451_v9, %v1448_v4  ;;  %v1453_v45 = vpop.f32.mrb[75].mxu0  ;;  %v1506_v44 = vpop.f32.mrb[73].mxu1 }
 0x312   :  { %v9498_v63 = vpop.f32.mrb[74].mxu1 }
 0x313   :  { %7495 = vrot.lane.b32.xlu1 %v7494_v31, %s8106_s2  ;;  %v1509_v26 = vpop.f32.mrb[75].mxu1 }
 0x316   :  { %v9503_v60 = vpop.f32.mrb[76].mxu0 }
 0x317   :  { %v1458_v3 = vpop.f32.mrb[77].mxu0 }
 0x318   :  { %v9505_v28 = vpop.f32.mrb[78].mxu0  ;;  %v9507_v47 = vpop.f32.mrb[76].mxu1 }
 0x319   :  { %v7514_v20 = vpack.i.bf16 %v9505_v28, %v9503_v60  ;;  %v1461_v2 = vpop.f32.mrb[79].mxu0  ;;  %v1514_v36 = vpop.f32.mrb[77].mxu1 }
 0x31a   :  { %v9511_v51 = vpop.f32.mrb[78].mxu1 }
 0x31b   :  { %v1517_v57 = vpop.f32.mrb[79].mxu1 }
 0x31e   :  { %v9515_v27 = vpop.f32.mrb[80].mxu0 }
 0x31f   :  { %v1466_v25 = vpop.f32.mrb[81].mxu0 }
 0x320   :  { %v1467_v30 = vpop.f32.mrb[82].mxu0  ;;  %v9517_v40 = vpop.f32.mrb[80].mxu1 }
 0x321   :  { %v1468_v17 = vpop.f32.mrb[83].mxu0  ;;  %v1522_v50 = vpop.f32.mrb[81].mxu1 }
 0x322   :  { %v1523_v6 = vpop.f32.mrb[82].mxu1 }
 0x323   :  { %v1524_v41 = vpop.f32.mrb[83].mxu1 }
 0x332   :  { %v9519_v53 = vpop.f32.mrb[84].mxu0 }
 0x333   :  { %v1601_v61 = vpop.f32.mrb[85].mxu0 }
 0x334   :  { %v9521_v0 = vpop.f32.mrb[86].mxu0  ;;  %v9523_v18 = vpop.f32.mrb[84].mxu1 }
 0x335   :  { %v1604_v37 = vpop.f32.mrb[87].mxu0  ;;  %v1657_v21 = vpop.f32.mrb[85].mxu1 }
 0x336   :  { %v9525_v49 = vpop.f32.mrb[86].mxu1 }
 0x337   :  { %v1660_v22 = vpop.f32.mrb[87].mxu1 }
 0x33a   :  { %v9527_v4 = vpop.f32.mrb[88].mxu0 }
 0x33b   :  { %11165 = vst [vmem:[#allocation14_spill] sm:$0xff] %v9527_v4  ;;  %v1609_v15 = vpop.f32.mrb[89].mxu0 }
 0x33c   :  { %v9529_v9 = vpop.f32.mrb[90].mxu0  ;;  %v9531_v31 = vpop.f32.mrb[88].mxu1 }
 0x33d   :  { %11166 = vst [vmem:[#allocation15_spill] sm:$0xff] %v9531_v31  ;;  %v1612_v45 = vpop.f32.mrb[91].mxu0  ;;  %v1665_v44 = vpop.f32.mrb[89].mxu1 }
 0x33e   :  { %v9533_v26 = vpop.f32.mrb[90].mxu1 }
 0x33f   :  { %11167 = vst [vmem:[#allocation16_spill] sm:$0xff] %v9533_v26  ;;  %v1668_v3 = vpop.f32.mrb[91].mxu1 }
 0x342   :  { %v9535_v2 = vpop.f32.mrb[92].mxu0 }
 0x343   :  { %11168 = vst [vmem:[#allocation17_spill] sm:$0xff] %v9535_v2  ;;  %v1617_v36 = vpop.f32.mrb[93].mxu0 }
 0x344   :  { %v1618_v57 = vpop.f32.mrb[94].mxu0  ;;  %v9537_v25 = vpop.f32.mrb[92].mxu1 }
 0x345   :  { %11169 = vst [vmem:[#allocation18_spill] sm:$0xff] %v9537_v25  ;;  %v1619_v30 = vpop.f32.mrb[95].mxu0  ;;  %v1673_v17 = vpop.f32.mrb[93].mxu1 }
 0x346   :  { %v1674_v50 = vpop.f32.mrb[94].mxu1  ;;  %v9559_v52 = vpop.permute.xlu1 %7480 }
 0x347   :  { %v1675_v6 = vpop.f32.mrb[95].mxu1 }
 0x356   :  { %v1750_v41 = vpop.f32.mrb[96].mxu0 }
 0x357   :  { %v1752_v61 = vpop.f32.mrb[97].mxu0 }
 0x358   :  { %v1753_v37 = vpop.f32.mrb[98].mxu0  ;;  %v9539_v21 = vpop.f32.mrb[96].mxu1 }
 0x359   :  { %v7499_v22 = vpack.i.bf16 %v1753_v37, %v1750_v41  ;;  %v1755_v15 = vpop.f32.mrb[99].mxu0  ;;  %v1808_v45 = vpop.f32.mrb[97].mxu1 }
 0x35a   :  { %v9541_v44 = vpop.f32.mrb[98].mxu1 }
 0x35b   :  { %7500 = vrot.lane.b32.xlu0 %v7499_v22, %s8104_s13  ;;  %v1811_v36 = vpop.f32.mrb[99].mxu1 }
 0x35e   :  { %v1758_v57 = vpop.f32.mrb[100].mxu0 }
 0x35f   :  { %v1760_v30 = vpop.f32.mrb[101].mxu0 }
 0x360   :  { %v1761_v17 = vpop.f32.mrb[102].mxu0  ;;  %v9546_v50 = vpop.f32.mrb[100].mxu1 }
 0x361   :  { %v7504_v6 = vpack.i.bf16 %v1761_v17, %v1758_v57  ;;  %v1816_v61 = vpop.f32.mrb[101].mxu1  ;;  %v1763_v41 = vpop.f32.mrb[103].mxu0 }
 0x362   :  { %v9548_v34 = vpop.f32.mrb[102].mxu1 }
 0x363   :  { %7505 = vrot.lane.b32.xlu0 %v7504_v6, %s8104_s13  ;;  %v1819_v22 = vpop.f32.mrb[103].mxu1 }
 0x364   :  { %v7486_v22 = vpop.permute.xlu1 %7485 }
 0x366   :  { %v1766_v15 = vpop.f32.mrb[104].mxu0 }
 0x367   :  { %v7519_v45 = vpack.i.bf16 %v9426_v24, %v1766_v15  ;;  %v1768_v36 = vpop.f32.mrb[105].mxu0  ;;  %v7756_v15 = vld [vmem:[%s11145_s3 + $0x40] sm:$0xff]  }
 0x368   :  { %v9554_v32 = vpop.f32.mrb[104].mxu1  ;;  %v1769_v30 = vpop.f32.mrb[106].mxu0  ;;  %6822 = vmatprep.subr.bf16.mxu0 %v7756_v15 }
 0x369   :  { %7520 = vrot.lane.b32.xlu0 %v7519_v45, %s8104_s13  ;;  %v1770_v17 = vpop.f32.mrb[107].mxu0  ;;  %v1824_v61 = vpop.f32.mrb[105].mxu1  ;;  %v9569_v45 = vld [vmem:[%s11145_s3] sm:$0xff]  }
 0x36a   :  { %v1825_v41 = vpop.f32.mrb[106].mxu1  ;;  %6823 = vmatpush3.bf16.msra.mxu0 %v9569_v45  ;;  %v9577_v57 = vpop.permute.xlu1 %7490 }
 0x36b   :  { %v1826_v6 = vpop.f32.mrb[107].mxu1  ;;  %v7476_v41 = vpop.permute.xlu0 %7475 }
 0x36c   :  { %v7478_v37 = vunpack.i.h.bf16 %v7476_v41  ;;  %v7477_v46 = vunpack.i.l.bf16 %v7476_v41 }
 0x36e   :  { %v2522_v60 = vsel %vm468_vm4, %v9314_v58, %v7478_v37  ;;  %v2521_v28 = vsel %vm468_vm4, %v9304_v59, %v7477_v46  ;;  %v9623_v58 = vld [vmem:[%s11145_s3 + $0x88] sm:$0xff]  }
 0x36f   :  { %11171 = vst [vmem:[#allocation19_spill] sm:$0xff] %v9623_v58 }
 0x37a   :  { %v1901_v35 = vpop.f32.mrb[108].mxu0 }
 0x37b   :  { %v1903_v23 = vpop.f32.mrb[109].mxu0 }
 0x37c   :  { %v1904_v16 = vpop.f32.mrb[110].mxu0  ;;  %v9561_v24 = vpop.f32.mrb[108].mxu1 }
 0x37d   :  { %v7509_v36 = vpack.i.bf16 %v1904_v16, %v1901_v35  ;;  %v1906_v30 = vpop.f32.mrb[111].mxu0  ;;  %v1959_v17 = vpop.f32.mrb[109].mxu1  ;;  %v9582_v35 = vld [vmem:[%s11145_s3 + $0x48] sm:$0xff]  }
 0x37e   :  { %v9571_v61 = vpop.f32.mrb[110].mxu1  ;;  %v9587_v16 = vld [vmem:[%s11145_s3 + $0x8] sm:$0xff]   ;;  %v7488_v30 = vunpack.i.h.bf16 %v7486_v22  ;;  %v7487_v17 = vunpack.i.l.bf16 %v7486_v22  ;;  %6824 = vmatprep.subr.bf16.mxu0 %v9582_v35  ;;  %v11170_v22 = vmov 0.0  }
 0x37f   :  { %7510 = vrot.lane.b32.xlu1 %v7509_v36, %s8105_s23  ;;  %v1962_v6 = vpop.f32.mrb[111].mxu1  ;;  %v9592_v36 = vld [vmem:[%s11145_s3 + $0x80] sm:$0xff]   ;;  %6825 = vmatpush3.bf16.msra.mxu0 %v9587_v16 }
 0x380   :  { %7195 = vmatpush3.bf16.msra.mxu1 %v9592_v36  ;;  %v2533_v59 = vsel %vm2531_vm5, %v2522_v60, %v7488_v30  ;;  %v2532_v46 = vsel %vm2531_vm5, %v2521_v28, %v7487_v17  ;;  %v9659_v60 = vld [vmem:[%s11145_s3 + $0x60] sm:$0xff]  }
 0x381   :  { %7196 = vmatprep.subr.bf16.mxu1 %v11170_v22 }
 0x382   :  { %v1909_v3 = vpop.f32.mrb[112].mxu0 }
 0x383   :  { %7515 = vrot.lane.b32.xlu1 %v7514_v20, %s8106_s2  ;;  %v1911_v41 = vpop.f32.mrb[113].mxu0 }
 0x384   :  { %v1912_v6 = vpop.f32.mrb[114].mxu0  ;;  %v9598_v23 = vpop.f32.mrb[112].mxu1  ;;  %7197 = vmatpush3.bf16.msra.mxu1 %v9623_v58 }
 0x385   :  { %v7529_v1 = vpack.i.bf16 %v1912_v6, %v1909_v3  ;;  %v7496_v25 = vpop.permute.xlu1 %7495  ;;  %v1967_v43 = vpop.f32.mrb[113].mxu1  ;;  %v9613_v3 = vld [vmem:[%s11145_s3 + $0x50] sm:$0xff]   ;;  %v9637_v6 = vld [vmem:[%s11145_s3 + $0x58] sm:$0xff]   ;;  %6861 = vmatprep.subr.bf16.mxu1 %v7756_v15 }
 0x386   :  { %v7498_v20 = vunpack.i.h.bf16 %v7496_v25  ;;  %v7497_v41 = vunpack.i.l.bf16 %v7496_v25  ;;  %v9608_v14 = vpop.f32.mrb[114].mxu1  ;;  %v1914_v29 = vpop.f32.mrb[115].mxu0  ;;  %v9618_v43 = vld [vmem:[%s11145_s3 + $0x10] sm:$0xff]   ;;  %6826 = vmatprep.subr.bf16.mxu0 %v9613_v3 }
 0x387   :  { %v11172_v29 = vpack.i.bf16 %v9541_v44, %v9539_v21  ;;  %7530 = vrot.lane.b32.xlu0 %v7529_v1, %s8105_s23  ;;  %v1970_v37 = vpop.f32.mrb[115].mxu1  ;;  %6827 = vmatpush3.bf16.msra.mxu0 %v9618_v43  ;;  %v9653_v21 = vld [vmem:[%s11145_s3 + $0x18] sm:$0xff]  }
 0x388   :  { %v9640_v30 = vsel %vm2542_vm0, %v2533_v59, %v7498_v20  ;;  %v9643_v17 = vsel %vm2542_vm0, %v2532_v46, %v7497_v41  ;;  %6828 = vmatprep.subr.bf16.mxu0 %v9637_v6  ;;  %v9671_v37 = vld [vmem:[%s11145_s3 + $0x20] sm:$0xff]  }
 0x389   :  { %7525 = vrot.lane.b32.xlu1 %v11172_v29, %s8104_s13 }
 0x38a   :  { %v1917_v44 = vpop.f32.mrb[116].mxu0 }
 0x38b   :  { %v7534_v28 = vpack.i.bf16 %v9489_v62, %v1917_v44  ;;  %v1919_v20 = vpop.f32.mrb[117].mxu0  ;;  %6829 = vmatpush3.bf16.msra.mxu0 %v9653_v21  ;;  %v9677_v62 = vld [vmem:[%s11145_s3 + $0x68] sm:$0xff]  }
 0x38c   :  { %v9662_v41 = vpop.f32.mrb[116].mxu1  ;;  %v1920_v59 = vpop.f32.mrb[118].mxu0  ;;  %6830 = vmatprep.subr.bf16.mxu0 %v9659_v60  ;;  %v9687_v20 = vld [vmem:[%s11145_s3 + $0x28] sm:$0xff]  }
 0x38d   :  { %7535 = vrot.lane.b32.xlu1 %v7534_v28, %s8105_s23  ;;  %v1975_v15 = vpop.f32.mrb[117].mxu1  ;;  %v1921_v29 = vpop.f32.mrb[119].mxu0  ;;  %v11173_v28 = vpack.i.bf16 %v9571_v61, %v9561_v24  ;;  %v9699_v24 = vld [vmem:[%s11145_s3 + $0x30] sm:$0xff]   ;;  %v9705_v61 = vld [vmem:[%s11145_s3 + $0x78] sm:$0xff]  }
 0x38e   :  { %v1976_v1 = vpop.f32.mrb[118].mxu1  ;;  %v9711_v59 = vld [vmem:[%s11145_s3 + $0x38] sm:$0xff]  }
 0x38f   :  { %v1977_v44 = vpop.f32.mrb[119].mxu1  ;;  %6831 = vmatpush3.bf16.msra.mxu0 %v9671_v37  ;;  %v9693_v1 = vld [vmem:[%s11145_s3 + $0x70] sm:$0xff]  }
 0x390   :  { %6832 = vmatprep.subr.bf16.mxu0 %v9677_v62 }
 0x391   :  { %7550 = vrot.lane.b32.xlu1 %v11173_v28, %s8105_s23 }
 0x393   :  { %6833 = vmatpush3.bf16.msra.mxu0 %v9687_v20 }
 0x394   :  { %6834 = vmatprep.subr.bf16.mxu0 %v9693_v1 }
 0x397   :  { %6835 = vmatpush3.bf16.msra.mxu0 %v9699_v24 }
 0x398   :  { %6836 = vmatprep.subr.bf16.mxu0 %v9705_v61 }
 0x39b   :  { %6837 = vmatpush3.bf16.msra.mxu0 %v9711_v59 }
 0x39c   :  { %7210 = vmatprep.subr.bf16.mxu0 %v11170_v22 }
 0x39e   :  { %v2052_v15 = vpop.f32.mrb[120].mxu0 }
 0x39f   :  { %v2054_v29 = vpop.f32.mrb[121].mxu0 }
 0x3a0   :  { %v2108_v44 = vpop.f32.mrb[120].mxu1  ;;  %v2055_v28 = vpop.f32.mrb[122].mxu0 }
 0x3a1   :  { %v2110_v46 = vpop.f32.mrb[121].mxu1  ;;  %v7539_v25 = vpack.i.bf16 %v2055_v28, %v2052_v15  ;;  %v2057_v11 = vpop.f32.mrb[123].mxu0 }
 0x3a2   :  { %v2111_v5 = vpop.f32.mrb[122].mxu1  ;;  %v11175_v11 = vpack.i.bf16 %v9548_v34, %v9546_v50  ;;  %v11177_v34 = vpack.i.bf16 %v9467_v10, %v9461_v8  ;;  %v11179_v8 = vpack.i.bf16 %v9498_v63, %v9496_v19  ;;  %v11180_v10 = vpack.i.bf16 %v9416_v7, %v9412_v39 }
 0x3a3   :  { %v7564_v31 = vpack.i.bf16 %v2111_v5, %v2108_v44  ;;  %7540 = vrot.lane.b32.xlu0 %v7539_v25, %s8106_s2  ;;  %v2113_v26 = vpop.f32.mrb[123].mxu1  ;;  %v11183_v7 = vpack.i.bf16 %v9492_v12, %v9662_v41 }
 0x3a5   :  { %7565 = vrot.lane.b32.xlu1 %v7564_v31, %s8106_s2 }
 0x3a6   :  { %v2060_v2 = vpop.f32.mrb[124].mxu0 }
 0x3a7   :  { %7545 = vrot.lane.b32.xlu0 %v11174_v38, %s8104_s13  ;;  %v2062_v58 = vpop.f32.mrb[125].mxu0  ;;  %v11176_v38 = vpack.i.bf16 %v9608_v14, %v9598_v23 }
 0x3a8   :  { %v2063_v29 = vpop.f32.mrb[126].mxu0  ;;  %v2116_v4 = vpop.f32.mrb[124].mxu1 }
 0x3a9   :  { %7580 = vrot.lane.b32.xlu1 %v11175_v11, %s8104_s13  ;;  %v7554_v5 = vpack.i.bf16 %v2063_v29, %v2060_v2  ;;  %v2118_v46 = vpop.f32.mrb[125].mxu1  ;;  %v2065_v25 = vpop.f32.mrb[127].mxu0 }
 0x3aa   :  { %v2119_v26 = vpop.f32.mrb[126].mxu1 }
 0x3ab   :  { %7555 = vrot.lane.b32.xlu0 %v7554_v5, %s8106_s2  ;;  %v7599_v31 = vpack.i.bf16 %v2119_v26, %v2116_v4  ;;  %v2121_v15 = vpop.f32.mrb[127].mxu1 }
 0x3ad   :  { %7590 = vrot.lane.b32.xlu1 %v11176_v38, %s8105_s23 }
 0x3ae   :  { %v2068_v48 = vpop.f32.mrb[128].mxu0 }
 0x3af   :  { %v7569_v54 = vpack.i.bf16 %v9515_v27, %v2068_v48  ;;  %7560 = vrot.lane.b32.xlu0 %v11177_v34, %s8105_s23  ;;  %v2070_v2 = vpop.f32.mrb[129].mxu0  ;;  %v11178_v27 = vpack.i.bf16 %v9431_v55, %v9554_v32  ;;  %v11182_v55 = vpack.i.bf16 %v9511_v51, %v9507_v47 }
 0x3b0   :  { %v2124_v50 = vpop.f32.mrb[128].mxu1  ;;  %v2071_v58 = vpop.f32.mrb[130].mxu0 }
 0x3b1   :  { %v7619_v44 = vpack.i.bf16 %v9517_v40, %v2124_v50  ;;  %7600 = vrot.lane.b32.xlu1 %v7599_v31, %s8106_s2  ;;  %v2072_v4 = vpop.f32.mrb[131].mxu0  ;;  %v2126_v28 = vpop.f32.mrb[129].mxu1  ;;  %v11181_v40 = vpack.i.bf16 %v9483_v56, %v9481_v42 }
 0x3b2   :  { %v2127_v29 = vpop.f32.mrb[130].mxu1 }
 0x3b3   :  { %7570 = vrot.lane.b32.xlu0 %v7569_v54, %s8106_s2  ;;  %v2128_v14 = vpop.f32.mrb[131].mxu1 }
 0x3b5   :  { %7610 = vrot.lane.b32.xlu1 %v11178_v27, %s8104_s13 }
 0x3b7   :  { %7575 = vrot.lane.b32.xlu0 %v11179_v8, %s8106_s2 }
 0x3b9   :  { %7620 = vrot.lane.b32.xlu1 %v7619_v44, %s8106_s2 }
 0x3bb   :  { %7585 = vrot.lane.b32.xlu0 %v11180_v10, %s8104_s13 }
 0x3bf   :  { %7595 = vrot.lane.b32.xlu0 %v11181_v40, %s8105_s23 }
 0x3c2   :  { %v2203_v23 = vpop.f32.mrb[132].mxu0 }
 0x3c3   :  { %7605 = vrot.lane.b32.xlu0 %v11182_v55, %s8106_s2  ;;  %v2205_v19 = vpop.f32.mrb[133].mxu0  ;;  %s6554_s2 = sld [smem:[#allocation2 + $0x1]] }
 0x3c4   :  { %v2206_v63 = vpop.f32.mrb[134].mxu0  ;;  %v9760_v32 = vpop.f32.mrb[132].mxu1 }
 0x3c5   :  { %v2585_v11 = vpack.c.bf16 %v2206_v63, %v2203_v23  ;;  %v2208_v5 = vpop.f32.mrb[135].mxu0  ;;  %v2261_v46 = vpop.f32.mrb[133].mxu1 }
 0x3c6   :  { %v9762_v39 = vpop.f32.mrb[134].mxu1 }
 0x3c7   :  { %7615 = vrot.lane.b32.xlu0 %v11183_v7, %s8105_s23  ;;  %7199 = vmatmul.mubr.msk.bf16.vlgmr.msra.gmra.mrb[144].mxu1 %vm468_vm4, %v2585_v11  ;;  %v2594_v42 = vpack.c.bf16 %v9762_v39, %v9760_v32  ;;  %v2264_v56 = vpop.f32.mrb[135].mxu1 }
 0x3c8   :  { %6862 = vmatpush3.bf16.msra.mxu1 %v9569_v45  ;;  %7202 = vmatprep.mubr.msk.bf16.mxu1 %vm8102_vm2, %v11170_v22 }
 0x3c9   :  { %6863 = vmatprep.subr.bf16.mxu1 %v9582_v35 }
 0x3ca   :  { %v2211_v47 = vpop.f32.mrb[136].mxu0 }
 0x3cb   :  { %v2213_v51 = vpop.f32.mrb[137].mxu0 }
 0x3cc   :  { %v2214_v25 = vpop.f32.mrb[138].mxu0  ;;  %6864 = vmatpush3.bf16.msra.mxu1 %v9587_v16  ;;  %v9776_v12 = vpop.f32.mrb[136].mxu1 }
 0x3cd   :  { %v2588_v41 = vpack.c.bf16 %v2214_v25, %v2211_v47  ;;  %v2216_v26 = vpop.f32.mrb[139].mxu0  ;;  %6865 = vmatprep.subr.bf16.mxu1 %v9613_v3  ;;  %v2269_v31 = vpop.f32.mrb[137].mxu1 }
 0x3ce   :  { %v9780_v45 = vpop.f32.mrb[138].mxu1  ;;  %v7501_v28 = vpop.permute.xlu0 %7500 }
 0x3cf   :  { %7203 = vmatmul.mubr.msk.bf16.gmra.mrb[148].mxu1 %vm468_vm4, %v2588_v41  ;;  %v2597_v35 = vpack.c.bf16 %v9780_v45, %v9776_v12  ;;  %v2272_v16 = vpop.f32.mrb[139].mxu1  ;;  %v7503_v8 = vunpack.i.h.bf16 %v7501_v28  ;;  %v7502_v10 = vunpack.i.l.bf16 %v7501_v28 }
 0x3d0   :  { %6866 = vmatpush3.bf16.msra.mxu1 %v9618_v43  ;;  %7206 = vmatprep.mubr.msk.bf16.mxu1 %vm8102_vm2, %v11170_v22 }
 0x3d1   :  { %6867 = vmatprep.subr.bf16.mxu1 %v9637_v6  ;;  %v2554_v7 = vsel %vm468_vm4, %v9521_v0, %v7503_v8  ;;  %v2553_v56 = vsel %vm468_vm4, %v9519_v53, %v7502_v10 }
 0x3d2   :  { %v2219_v15 = vpop.f32.mrb[140].mxu0 }
 0x3d3   :  { %v2591_v38 = vpack.c.bf16 %v2219_v15, %v2219_v15  ;;  %v2221_v48 = vpop.f32.mrb[141].mxu0 }
 0x3d4   :  { %6868 = vmatpush3.bf16.msra.mxu1 %v9653_v21  ;;  %v2222_v3 = vpop.f32.mrb[142].mxu0  ;;  %v9789_v54 = vpop.f32.mrb[140].mxu1  ;;  %v7483_v21 = vunpack.i.h.bf16 %v9559_v52 }
 0x3d5   :  { %6869 = vmatprep.subr.bf16.mxu1 %v9659_v60  ;;  %v2223_v43 = vpop.f32.mrb[143].mxu0  ;;  %v2277_v34 = vpop.f32.mrb[141].mxu1  ;;  %v7482_v60 = vunpack.i.l.bf16 %v9559_v52 }
 0x3d6   :  { %v2278_v2 = vpop.f32.mrb[142].mxu1  ;;  %v7506_v29 = vpop.permute.xlu0 %7505 }
 0x3d7   :  { %7207 = vmatmul.mubr.msk.bf16.gmra.mrb[152].mxu1 %vm468_vm4, %v2591_v38  ;;  %v2279_v50 = vpop.f32.mrb[143].mxu1  ;;  %v7508_v53 = vunpack.i.h.bf16 %v7506_v29 }
 0x3d8   :  { %6870 = vmatpush3.bf16.msra.mxu1 %v9671_v37  ;;  %v7493_v37 = vunpack.i.h.bf16 %v9577_v57  ;;  %v7507_v50 = vunpack.i.l.bf16 %v7506_v29 }
 0x3d9   :  { %6871 = vmatprep.subr.bf16.mxu1 %v9677_v62  ;;  %v7492_v62 = vunpack.i.l.bf16 %v9577_v57 }
 0x3dc   :  { %6872 = vmatpush3.bf16.msra.mxu1 %v9687_v20 }
 0x3dd   :  { %6873 = vmatprep.subr.bf16.mxu1 %v9693_v1  ;;  %v2524_v1 = vsel %vm468_vm4, %v9338_v13, %v7483_v21 }
 0x3de   :  { %v2535_v58 = vsel %vm2531_vm5, %v2524_v1, %v7493_v37 }
 0x3e0   :  { %6874 = vmatpush3.bf16.msra.mxu1 %v9699_v24  ;;  %v2523_v24 = vsel %vm468_vm4, %v9331_v33, %v7482_v60  ;;  %v9821_v33 = vpop.permute.xlu0 %7520 }
 0x3e1   :  { %6875 = vmatprep.subr.bf16.mxu1 %v9705_v61  ;;  %v2534_v44 = vsel %vm2531_vm5, %v2523_v24, %v7492_v62  ;;  %v11184_v62 = vpack.c.bf16 %v9640_v30, %v9643_v17  ;;  %v11185_v24 = vld [vmem:[#allocation14_spill] sm:$0xff]  ;;  %v7522_v28 = vunpack.i.l.bf16 %v9821_v33 }
 0x3e4   :  { %6876 = vmatpush3.bf16.msra.mxu1 %v9711_v59 }
 0x3e5   :  { %7236 = vmatprep.subr.bf16.mxu1 %v11170_v22 }
 0x3f1   :  { %v7511_v6 = vpop.permute.xlu1 %7510 }
 0x3f2   :  { %v7513_v23 = vunpack.i.h.bf16 %v7511_v6  ;;  %v7512_v55 = vunpack.i.l.bf16 %v7511_v6 }
 0x3f4   :  { %v2564_v25 = vsel %vm2531_vm5, %v2554_v7, %v7513_v23  ;;  %v2563_v41 = vsel %vm2531_vm5, %v2553_v56, %v7512_v55 }
 0x3f5   :  { %v7516_v20 = vpop.permute.xlu1 %7515 }
 0x3f6   :  { %v7518_v61 = vunpack.i.h.bf16 %v7516_v20  ;;  %v7517_v59 = vunpack.i.l.bf16 %v7516_v20  ;;  %v2556_v20 = vsel %vm468_vm4, %v9529_v9, %v7508_v53 }
 0x3f8   :  { %v9812_v4 = vsel %vm2542_vm0, %v2534_v44, %v7517_v59  ;;  %v9815_v52 = vsel %vm2542_vm0, %v2535_v58, %v7518_v61  ;;  %v2555_v61 = vsel %vm468_vm4, %v11185_v24, %v7507_v50  ;;  %v7523_v59 = vunpack.i.h.bf16 %v9821_v33  ;;  %v11187_v33 = vld [vmem:[#allocation12_spill] sm:$0xff] }
 0x3f9   :  { %v2586_v57 = vpack.c.bf16 %v9815_v52, %v9812_v4  ;;  %v7531_v27 = vpop.permute.xlu0 %7530 }
 0x3fa   :  { %v7533_v6 = vunpack.i.h.bf16 %v7531_v27  ;;  %v7532_v21 = vunpack.i.l.bf16 %v7531_v27 }
 0x3fb   :  { %v7526_v13 = vpop.permute.xlu1 %7525 }
 0x3fc   :  { %v7528_v19 = vunpack.i.h.bf16 %v7526_v13  ;;  %v7527_v63 = vunpack.i.l.bf16 %v7526_v13  ;;  %v2566_v30 = vsel %vm2531_vm5, %v2556_v20, %v7533_v6  ;;  %v2565_v17 = vsel %vm2531_vm5, %v2555_v61, %v7532_v21  ;;  %v11191_v21 = vld [vmem:[#allocation9_spill] sm:$0xff] }
 0x3fe   :  { %v2559_v26 = vsel %vm468_vm4, %v9525_v49, %v7528_v19  ;;  %v2558_v31 = vsel %vm468_vm4, %v9523_v18, %v7527_v63  ;;  %v11186_v19 = vld [vmem:[#allocation19_spill] sm:$0xff]  ;;  %v2525_v63 = vsel %vm468_vm4, %v11187_v33, %v7523_v59 }
 0x3ff   :  { %v9819_v14 = vpop.permute.xlu1 %7535 }
 0x400   :  { %v7538_v9 = vunpack.i.h.bf16 %v9819_v14  ;;  %v7537_v7 = vunpack.i.l.bf16 %v9819_v14 }
 0x403   :  { %v7551_v40 = vpop.permute.xlu1 %7550 }
 0x404   :  { %v7553_v11 = vunpack.i.h.bf16 %v7551_v40  ;;  %v7552_v5 = vunpack.i.l.bf16 %v7551_v40 }
 0x406   :  { %v2569_v3 = vsel %vm2531_vm5, %v2559_v26, %v7553_v11  ;;  %v2568_v43 = vsel %vm2531_vm5, %v2558_v31, %v7552_v5  ;;  %v11188_v11 = vld [vmem:[#allocation17_spill] sm:$0xff] }
 0x407   :  { %v2557_v5 = vsel %vm468_vm4, %v11188_v11, %v7522_v28 }
 0x415   :  { %v7541_v46 = vpop.permute.xlu0 %7540 }
 0x416   :  { %v7543_v47 = vunpack.i.h.bf16 %v7541_v46  ;;  %v7542_v51 = vunpack.i.l.bf16 %v7541_v46  ;;  %v2536_v46 = vsel %vm2531_vm5, %v2525_v63, %v7538_v9 }
 0x417   :  { %v7566_v16 = vpop.permute.xlu1 %7565 }
 0x418   :  { %v7568_v15 = vunpack.i.h.bf16 %v7566_v16  ;;  %v7567_v38 = vunpack.i.l.bf16 %v7566_v16  ;;  %v2573_v0 = vsel %vm2542_vm0, %v2563_v41, %v7542_v51  ;;  %v2574_v48 = vsel %vm2542_vm0, %v2564_v25, %v7543_v47  ;;  %v11189_v47 = vld [vmem:[#allocation16_spill] sm:$0xff]  ;;  %v11190_v25 = vld [vmem:[#allocation15_spill] sm:$0xff] }
 0x419   :  { %v9837_v34 = vpop.permute.xlu0 %7545  ;;  %v2584_v2 = vpack.c.bf16 %v2574_v48, %v2573_v0 }
 0x41a   :  { %v2578_v49 = vsel %vm2542_vm0, %v2568_v43, %v7567_v38  ;;  %v2579_v18 = vsel %vm2542_vm0, %v2569_v3, %v7568_v15  ;;  %v7548_v16 = vunpack.i.h.bf16 %v9837_v34  ;;  %v7547_v15 = vunpack.i.l.bf16 %v9837_v34 }
 0x41b   :  { %v7581_v60 = vpop.permute.xlu1 %7580  ;;  %2786 = vmatprep.mubr.bf16.mxu0 %v2584_v2  ;;  %v2593_v37 = vpack.c.bf16 %v2579_v18, %v2578_v49  ;;  %v2567_v2 = vsel %vm2531_vm5, %v2557_v5, %v7537_v7 }
 0x41c   :  { %2787 = vmatmul.mubr.bf16.vlgmr.msra.gmra.mrb[144].mxu0 %v11184_v62  ;;  %v7583_v29 = vunpack.i.h.bf16 %v7581_v60 }
 0x41d   :  { %2907 = vmatprep.mubr.bf16.mxu1 %v2593_v37  ;;  %v7556_v1 = vpop.permute.xlu0 %7555  ;;  %7211 = vmatpush3.bf16.msra.mxu0 %v9592_v36  ;;  %v7582_v36 = vunpack.i.l.bf16 %v7581_v60  ;;  %v2527_v60 = vsel %vm468_vm4, %v11191_v21, %v7548_v16  ;;  %v11192_v37 = vld [vmem:[#allocation8_spill] sm:$0xff] }
 0x41e   :  { %v7558_v58 = vunpack.i.h.bf16 %v7556_v1  ;;  %v7557_v44 = vunpack.i.l.bf16 %v7556_v1  ;;  %7212 = vmatprep.subr.bf16.mxu0 %v11170_v22  ;;  %v2561_v51 = vsel %vm468_vm4, %v11189_v47, %v7583_v29  ;;  %v2526_v62 = vsel %vm468_vm4, %v11192_v37, %v7547_v15 }
 0x41f   :  { %v7591_v13 = vpop.permute.xlu1 %7590  ;;  %v2560_v41 = vsel %vm468_vm4, %v11190_v25, %v7582_v36 }
 0x420   :  { %v2575_v27 = vsel %vm2542_vm0, %v2565_v17, %v7557_v44  ;;  %v2576_v8 = vsel %vm2542_vm0, %v2566_v30, %v7558_v58  ;;  %v7593_v10 = vunpack.i.h.bf16 %v7591_v13  ;;  %v7592_v40 = vunpack.i.l.bf16 %v7591_v13 }
 0x421   :  { %v7561_v23 = vpop.permute.xlu0 %7560  ;;  %v2587_v55 = vpack.c.bf16 %v2576_v8, %v2575_v27  ;;  %7213 = vmatpush3.bf16.msra.mxu0 %v11186_v19  ;;  %v11193_v8 = vld [vmem:[#allocation11_spill] sm:$0xff] }
 0x422   :  { %7226 = vmatprep.subr.bf16.mxu0 %v11170_v22  ;;  %v2570_v14 = vsel %vm2531_vm5, %v2560_v41, %v7592_v40  ;;  %v2571_v38 = vsel %vm2531_vm5, %v2561_v51, %v7593_v10  ;;  %v7563_v50 = vunpack.i.h.bf16 %v7561_v23  ;;  %v7562_v4 = vunpack.i.l.bf16 %v7561_v23  ;;  %v11194_v40 = vld [vmem:[#allocation10_spill] sm:$0xff]  ;;  %v11195_v51 = vld [vmem:[#allocation13_spill] sm:$0xff] }
 0x423   :  { %v7601_v56 = vpop.permute.xlu1 %7600  ;;  %2794 = vmatprep.mubr.bf16.mxu0 %v2587_v55  ;;  %v11196_v41 = vld [vmem:[#allocation18_spill] sm:$0xff] }
 0x424   :  { %v7603_v26 = vunpack.i.h.bf16 %v7601_v56  ;;  %v7602_v31 = vunpack.i.l.bf16 %v7601_v56  ;;  %2795 = vmatmul.mubr.bf16.gmra.mrb[148].mxu0 %v2586_v57  ;;  %v2538_v24 = vsel %vm2531_vm5, %v2527_v60, %v7563_v50  ;;  %v2537_v61 = vsel %vm2531_vm5, %v2526_v62, %v7562_v4 }
 0x425   :  { %v7571_v0 = vpop.permute.xlu0 %7570 }
 0x426   :  { %v7573_v48 = vunpack.i.h.bf16 %v7571_v0  ;;  %v7572_v53 = vunpack.i.l.bf16 %v7571_v0  ;;  %v2580_v3 = vsel %vm2542_vm0, %v2570_v14, %v7602_v31  ;;  %v2581_v43 = vsel %vm2542_vm0, %v2571_v38, %v7603_v26 }
 0x427   :  { %v2596_v52 = vpack.c.bf16 %v2581_v43, %v2580_v3  ;;  %v7611_v17 = vpop.permute.xlu1 %7610 }
 0x428   :  { %v2577_v57 = vsel %vm2542_vm0, %v2567_v2, %v7572_v53  ;;  %v2547_v34 = vsel %vm2542_vm0, %v2536_v46, %v7573_v48  ;;  %v7613_v33 = vunpack.i.h.bf16 %v7611_v17  ;;  %v7612_v63 = vunpack.i.l.bf16 %v7611_v17 }
 0x429   :  { %v7576_v49 = vpop.permute.xlu0 %7575  ;;  %v2590_v18 = vpack.c.bf16 %v2577_v57, %v2577_v57  ;;  %v2589_v6 = vpack.c.bf16 %v2547_v34, %v2547_v34  ;;  %v2600_v53 = vpack.c.bf16 %v9789_v54, %v9789_v54 }
 0x42a   :  { %v7578_v20 = vunpack.i.h.bf16 %v7576_v49  ;;  %v7577_v1 = vunpack.i.l.bf16 %v7576_v49  ;;  %v2530_v25 = vsel %vm468_vm4, %v11195_v51, %v7613_v33  ;;  %v2562_v26 = vsel %vm468_vm4, %v11196_v41, %v7612_v63 }
 0x42b   :  { %2802 = vmatprep.mubr.bf16.mxu0 %v2590_v18  ;;  %v7621_v39 = vpop.permute.xlu1 %7620 }
 0x42c   :  { %v2549_v59 = vsel %vm2542_vm0, %v2538_v24, %v7578_v20  ;;  %v2548_v58 = vsel %vm2542_vm0, %v2537_v61, %v7577_v1  ;;  %2803 = vmatmul.mubr.bf16.gmra.mrb[152].mxu0 %v2589_v6  ;;  %v7622_v31 = vunpack.i.l.bf16 %v7621_v39  ;;  %v7623_v16 = vunpack.i.h.bf16 %v7621_v39 }
 0x42d   :  { %v2592_v44 = vpack.c.bf16 %v2549_v59, %v2548_v58  ;;  %v7586_v28 = vpop.permute.xlu0 %7585  ;;  %7214 = vmatprep.mubr.msk.bf16.mxu0 %vm8102_vm2, %v11170_v22 }
 0x42e   :  { %v7588_v9 = vunpack.i.h.bf16 %v7586_v28  ;;  %v7587_v13 = vunpack.i.l.bf16 %v7586_v28 }
 0x42f   :  { %2908 = vmatmul.mubr.bf16.vlgmr.msra.gmra.mrb[156].mxu1 %v2592_v44 }
 0x430   :  { %2915 = vmatprep.mubr.bf16.mxu1 %v2596_v52  ;;  %v2529_v10 = vsel %vm468_vm4, %v11193_v8, %v7588_v9  ;;  %v2528_v23 = vsel %vm468_vm4, %v11194_v40, %v7587_v13 }
 0x431   :  { %v7596_v30 = vpop.permute.xlu0 %7595 }
 0x432   :  { %v7598_v29 = vunpack.i.h.bf16 %v7596_v30  ;;  %v7597_v36 = vunpack.i.l.bf16 %v7596_v30 }
 0x434   :  { %7215 = vmatmul.mubr.msk.bf16.vlgmr.msra.gmra.mrb[156].mxu0 %vm468_vm4, %v2594_v42  ;;  %v2539_v11 = vsel %vm2531_vm5, %v2528_v23, %v7597_v36  ;;  %v2540_v32 = vsel %vm2531_vm5, %v2529_v10, %v7598_v29 }
 0x435   :  { %v7606_v27 = vpop.permute.xlu0 %7605  ;;  %7218 = vmatprep.mubr.msk.bf16.mxu0 %vm8102_vm2, %v11170_v22 }
 0x436   :  { %v7608_v55 = vunpack.i.h.bf16 %v7606_v27  ;;  %v7607_v19 = vunpack.i.l.bf16 %v7606_v27 }
 0x438   :  { %v2550_v42 = vsel %vm2542_vm0, %v2539_v11, %v7607_v19  ;;  %v2551_v5 = vsel %vm2542_vm0, %v2540_v32, %v7608_v55 }
 0x439   :  { %v7616_v46 = vpop.permute.xlu0 %7615  ;;  %v2595_v7 = vpack.c.bf16 %v2551_v5, %v2550_v42 }
 0x43a   :  { %v7618_v56 = vunpack.i.h.bf16 %v7616_v46  ;;  %v7617_v47 = vunpack.i.l.bf16 %v7616_v46 }
 0x43b   :  { %2916 = vmatmul.mubr.bf16.gmra.mrb[160].mxu1 %v2595_v7 }
 0x43c   :  { %v2541_v15 = vsel %vm2531_vm5, %v2530_v25, %v7618_v56  ;;  %v2572_v14 = vsel %vm2531_vm5, %v2562_v26, %v7617_v47  ;;  %7219 = vmatmul.mubr.msk.bf16.gmra.mrb[160].mxu0 %vm468_vm4, %v2597_v35 }
 0x43d   :  { %v2582_v38 = vsel %vm2542_vm0, %v2572_v14, %v7622_v31  ;;  %7222 = vmatprep.mubr.msk.bf16.mxu0 %vm8102_vm2, %v11170_v22  ;;  %v2552_v48 = vsel %vm2542_vm0, %v2541_v15, %v7623_v16 }
 0x43e   :  { %v2599_v0 = vpack.c.bf16 %v2582_v38, %v2582_v38  ;;  %v2598_v3 = vpack.c.bf16 %v2552_v48, %v2552_v48 }
 0x440   :  { %2923 = vmatprep.mubr.bf16.mxu1 %v2599_v0 }
 0x443   :  { %2924 = vmatmul.mubr.bf16.gmra.mrb[164].mxu1 %v2598_v3 }
 0x444   :  { %7223 = vmatmul.mubr.msk.bf16.gmra.mrb[164].mxu0 %vm468_vm4, %v2600_v53  ;;  %7242 = vmatprep.mubr.msk.bf16.mxu1 %vm8102_vm2, %v11170_v22  ;;  %vm2996_vm4 = vcmask 519168  }
 0x445   :  { %7232 = vmatprep.mubr.msk.bf16.mxu0 %vm8102_vm2, %v11170_v22 }
 0x49a   :  { %v2844_v12 = vpop.f32.mrb[144].mxu1 }
 0x49b   :  { %v7200_v45 = vpop.f32.mrb[145].mxu1 }
 0x49c   :  { %v2847_v35 = vpop.f32.mrb[146].mxu1 }
 0x49d   :  { %v7201_v43 = vpop.f32.mrb[147].mxu1 }
 0x4a2   :  { %v2852_v2 = vpop.f32.mrb[148].mxu1 }
 0x4a3   :  { %v7204_v50 = vpop.f32.mrb[149].mxu1 }
 0x4a4   :  { %v2855_v4 = vpop.f32.mrb[150].mxu1 }
 0x4a5   :  { %v7205_v52 = vpop.f32.mrb[151].mxu1 }
 0x4aa   :  { %v2860_v57 = vpop.f32.mrb[152].mxu1 }
 0x4ab   :  { %v7208_v54 = vpop.f32.mrb[153].mxu1 }
 0x4ac   :  { %v2863_v34 = vpop.f32.mrb[154].mxu1 }
 0x4ad   :  { %v7209_v49 = vpop.f32.mrb[155].mxu1 }
 0x4ef   :  { %v6838_v18 = vpop.f32.mrb[144].mxu0 }
 0x4f0   :  { %v6839_v6 = vpop.f32.mrb[145].mxu0 }
 0x4f1   :  { %v6840_v21 = vadd.f32 %v6839_v6, %v6838_v18  ;;  %v6841_v60 = vpop.f32.mrb[146].mxu0 }
 0x4f2   :  { %v6842_v37 = vpop.f32.mrb[147].mxu0 }
 0x4f3   :  { %v6843_v62 = vadd.f32 %v6842_v37, %v6841_v60  ;;  %v9926_v20 = vadd.f32 %v6840_v21, %v2844_v12 }
 0x4f5   :  { %v9928_v1 = vadd.f32 %v6843_v62, %v2847_v35  ;;  %v2989_v24 = vsel %vm2531_vm5, %v9926_v20, 0.0 }
 0x4f7   :  { %v2990_v61 = vsel %vm2531_vm5, %v9928_v1, 0.0  ;;  %v6844_v59 = vpop.f32.mrb[148].mxu0 }
 0x4f8   :  { %v2991_v58 = vadd.f32 %v2990_v61, %v2989_v24  ;;  %v6845_v44 = vpop.f32.mrb[149].mxu0 }
 0x4f9   :  { %v6846_v28 = vadd.f32 %v6845_v44, %v6844_v59  ;;  %v6847_v30 = vpop.f32.mrb[150].mxu0 }
 0x4fa   :  { %v6848_v17 = vpop.f32.mrb[151].mxu0 }
 0x4fb   :  { %v6849_v9 = vadd.f32 %v6848_v17, %v6847_v30  ;;  %v9934_v13 = vadd.f32 %v6846_v28, %v2852_v2 }
 0x4fd   :  { %v2992_v29 = vsel %vm2531_vm5, %v9934_v13, 0.0  ;;  %v9938_v36 = vadd.f32 %v6849_v9, %v2855_v4 }
 0x4fe   :  { %v2993_v27 = vadd.f32 %v2992_v29, %v2991_v58 }
 0x4ff   :  { %v2994_v8 = vsel %vm2531_vm5, %v9938_v36, 0.0  ;;  %v6850_v10 = vpop.f32.mrb[152].mxu0 }
 0x500   :  { %v2995_v40 = vadd.f32 %v2994_v8, %v2993_v27  ;;  %v6851_v23 = vpop.f32.mrb[153].mxu0 }
 0x501   :  { %v6852_v55 = vadd.f32 %v6851_v23, %v6850_v10  ;;  %v6853_v19 = vpop.f32.mrb[154].mxu0 }
 0x502   :  { %v6854_v33 = vpop.f32.mrb[155].mxu0  ;;  %v6877_v63 = vpop.f32.mrb[156].mxu1 }
 0x503   :  { %v9942_v11 = vadd.f32 %v6852_v55, %v2860_v57  ;;  %v6878_v32 = vpop.f32.mrb[157].mxu1 }
 0x504   :  { %v6879_v39 = vadd.f32 %v6878_v32, %v6877_v63  ;;  %v6880_v42 = vpop.f32.mrb[158].mxu1 }
 0x505   :  { %v2997_v5 = vsel %vm2996_vm4, %v9942_v11, 0.0  ;;  %v6881_v46 = vpop.f32.mrb[159].mxu1 }
 0x506   :  { %v2998_v7 = vadd.f32 %v2997_v5, %v2995_v40  ;;  %v6882_v56 = vadd.f32 %v6881_v46, %v6880_v42 }
 0x507   :  { %v2965_v47 = vpop.f32.mrb[156].mxu0 }
 0x508   :  { %v2966_v51 = vadd.f32 %v6879_v39, %v2965_v47  ;;  %v7216_v25 = vpop.f32.mrb[157].mxu0  ;;  %v2999_v45 = vrot.slane %v2998_v7, 4 }
 0x509   :  { %v2968_v41 = vpop.f32.mrb[158].mxu0 }
 0x50a   :  { %v2969_v26 = vadd.f32 %v6882_v56, %v2968_v41  ;;  %v7217_v31 = vpop.f32.mrb[159].mxu0  ;;  %v3005_v16 = vsel %vm2531_vm5, %v2966_v51, 0.0  ;;  %v3000_v54 = vadd.f32 %v2999_v45, %v2998_v7 }
 0x50c   :  { %v3006_v15 = vsel %vm2531_vm5, %v2969_v26, 0.0  ;;  %v3001_v61 = vrot.slane %v3000_v54, 2 }
 0x50d   :  { %v3007_v14 = vadd.f32 %v3006_v15, %v3005_v16 }
 0x50e   :  { %v6883_v38 = vpop.f32.mrb[160].mxu1  ;;  %v3002_v17 = vadd.f32 %v3001_v61, %v3000_v54 }
 0x50f   :  { %v6884_v0 = vpop.f32.mrb[161].mxu1  ;;  %v2973_v48 = vpop.f32.mrb[160].mxu0 }
 0x510   :  { %v6885_v53 = vadd.f32 %v6884_v0, %v6883_v38  ;;  %v6886_v3 = vpop.f32.mrb[162].mxu1  ;;  %v7220_v12 = vpop.f32.mrb[161].mxu0  ;;  %v3003_v27 = vrot.slane %v3002_v17, 1 }
 0x511   :  { %v6887_v35 = vpop.f32.mrb[163].mxu1  ;;  %v2976_v43 = vpop.f32.mrb[162].mxu0 }
 0x512   :  { %v6888_v2 = vadd.f32 %v6887_v35, %v6886_v3  ;;  %v2974_v50 = vadd.f32 %v6885_v53, %v2973_v48  ;;  %v7221_v4 = vpop.f32.mrb[163].mxu0  ;;  %v3004_v40 = vadd.f32 %v3003_v27, %v3002_v17 }
 0x514   :  { %v3008_v52 = vsel %vm2531_vm5, %v2974_v50, 0.0  ;;  %v2977_v57 = vadd.f32 %v6888_v2, %v2976_v43  ;;  %v3021_v19 = vmul.f32 0.027777778, %v3004_v40 }
 0x515   :  { %v3009_v34 = vadd.f32 %v3008_v52, %v3007_v14 }
 0x516   :  { %v3010_v49 = vsel %vm2531_vm5, %v2977_v57, 0.0  ;;  %v6889_v18 = vpop.f32.mrb[164].mxu1  ;;  %v3023_v32 = vsel %vm2531_vm5, %v3021_v19, 0.0 }
 0x517   :  { %v3011_v6 = vadd.f32 %v3010_v49, %v3009_v34  ;;  %v6890_v21 = vpop.f32.mrb[165].mxu1  ;;  %v2981_v60 = vpop.f32.mrb[164].mxu0 }
 0x518   :  { %v6891_v37 = vadd.f32 %v6890_v21, %v6889_v18  ;;  %v6892_v62 = vpop.f32.mrb[166].mxu1  ;;  %v7224_v24 = vpop.f32.mrb[165].mxu0 }
 0x519   :  { %v6893_v59 = vpop.f32.mrb[167].mxu1  ;;  %v2984_v58 = vpop.f32.mrb[166].mxu0 }
 0x51a   :  { %v2982_v44 = vadd.f32 %v6891_v37, %v2981_v60  ;;  %v7225_v28 = vpop.f32.mrb[167].mxu0 }
 0x51c   :  { %v3012_v30 = vsel %vm2996_vm4, %v2982_v44, 0.0 }
 0x51d   :  { %v3013_v9 = vadd.f32 %v3012_v30, %v3011_v6 }
 0x51f   :  { %v3014_v29 = vrot.slane %v3013_v9, 4 }
 0x521   :  { %v3015_v8 = vadd.f32 %v3014_v29, %v3013_v9 }
 0x523   :  { %v3016_v10 = vrot.slane %v3015_v8, 2 }
 0x525   :  { %v3017_v23 = vadd.f32 %v3016_v10, %v3015_v8 }
 0x527   :  { %v3018_v55 = vrot.slane %v3017_v23, 1 }
 0x529   :  { %v3019_v33 = vadd.f32 %v3018_v55, %v3017_v23 }
 0x52b   :  { %v3022_v63 = vmul.f32 0.027777778, %v3019_v33  ;;  %v2987_v33 = vld [vmem:[%s11151_s9 + $0x2] ss:$0 sm:$0xff] }
 0x52d   :  { %v3024_v39 = vsel %vm2531_vm5, %v3022_v63, 0.0 }
 0x52e   :  { %v3025_v42 = vadd.f32 %v3024_v39, %v3023_v32  ;;  %v2988_v39 = vld [vmem:[%s11151_s9 + $0x3] ss:$0 sm:$0xff] }
 0x530   :  { %v3026_v5 = vmul.f32 0.5, %v3025_v42 }
 0x532   :  { %v9954_v46 = vsub.f32 %v9926_v20, %v3026_v5  ;;  %v9957_v7 = vsub.f32 %v9928_v1, %v3026_v5  ;;  %v9960_v56 = vsub.f32 %v9934_v13, %v3026_v5  ;;  %v9963_v47 = vsub.f32 %v9938_v36, %v3026_v5 }
 0x533   :  { %v9966_v25 = vsub.f32 %v9942_v11, %v3026_v5  ;;  %v9968_v41 = vsub.f32 %v2966_v51, %v3026_v5  ;;  %v9970_v31 = vsub.f32 %v2969_v26, %v3026_v5  ;;  %v9972_v16 = vsub.f32 %v2974_v50, %v3026_v5 }
 0x534   :  { %v9974_v20 = vsub.f32 %v2977_v57, %v3026_v5  ;;  %v9976_v15 = vsub.f32 %v2982_v44, %v3026_v5  ;;  %v3037_v1 = vmul.f32 %v9954_v46, %v9954_v46  ;;  %v3038_v13 = vmul.f32 %v9957_v7, %v9957_v7 }
 0x535   :  { %v3039_v36 = vmul.f32 %v9960_v56, %v9960_v56  ;;  %v3042_v11 = vmul.f32 %v9968_v41, %v9968_v41  ;;  %v3043_v51 = vmul.f32 %v9970_v31, %v9970_v31  ;;  %v3044_v26 = vmul.f32 %v9972_v16, %v9972_v16 }
 0x536   :  { %v3040_v14 = vmul.f32 %v9963_v47, %v9963_v47  ;;  %v3047_v38 = vsel %vm2531_vm5, %v3037_v1, 0.0  ;;  %v3048_v0 = vsel %vm2531_vm5, %v3038_v13, 0.0  ;;  %v3045_v48 = vmul.f32 %v9974_v20, %v9974_v20 }
 0x537   :  { %v3049_v53 = vadd.f32 %v3048_v0, %v3047_v38  ;;  %v3062_v3 = vsel %vm2531_vm5, %v3042_v11, 0.0  ;;  %v3063_v12 = vsel %vm2531_vm5, %v3043_v51, 0.0  ;;  %v3041_v45 = vmul.f32 %v9966_v25, %v9966_v25 }
 0x538   :  { %v3050_v35 = vsel %vm2531_vm5, %v3039_v36, 0.0  ;;  %v3064_v43 = vadd.f32 %v3063_v12, %v3062_v3  ;;  %v3046_v2 = vmul.f32 %v9976_v15, %v9976_v15  ;;  %v3065_v4 = vsel %vm2531_vm5, %v3044_v26, 0.0 }
 0x539   :  { %v3051_v50 = vadd.f32 %v3050_v35, %v3049_v53  ;;  %v3052_v52 = vsel %vm2531_vm5, %v3040_v14, 0.0  ;;  %v3067_v34 = vsel %vm2531_vm5, %v3045_v48, 0.0  ;;  %v3054_v49 = vsel %vm2996_vm4, %v3041_v45, 0.0 }
 0x53a   :  { %v3066_v57 = vadd.f32 %v3065_v4, %v3064_v43  ;;  %v3069_v21 = vsel %vm2996_vm4, %v3046_v2, 0.0 }
 0x53b   :  { %v3053_v54 = vadd.f32 %v3052_v52, %v3051_v50 }
 0x53c   :  { %v3068_v18 = vadd.f32 %v3067_v34, %v3066_v57 }
 0x53d   :  { %v3055_v6 = vadd.f32 %v3054_v49, %v3053_v54 }
 0x53e   :  { %v3070_v60 = vadd.f32 %v3069_v21, %v3068_v18 }
 0x53f   :  { %v3056_v37 = vrot.slane %v3055_v6, 4 }
 0x540   :  { %v3071_v62 = vrot.slane %v3070_v60, 4 }
 0x541   :  { %v3057_v24 = vadd.f32 %v3056_v37, %v3055_v6 }
 0x542   :  { %v3072_v61 = vadd.f32 %v3071_v62, %v3070_v60 }
 0x543   :  { %v3058_v59 = vrot.slane %v3057_v24, 2 }
 0x544   :  { %v3073_v58 = vrot.slane %v3072_v61, 2 }
 0x545   :  { %v3059_v44 = vadd.f32 %v3058_v59, %v3057_v24 }
 0x546   :  { %v3074_v28 = vadd.f32 %v3073_v58, %v3072_v61 }
 0x547   :  { %v3060_v30 = vrot.slane %v3059_v44, 1 }
 0x548   :  { %v3075_v17 = vrot.slane %v3074_v28, 1 }
 0x549   :  { %v3061_v9 = vadd.f32 %v3060_v30, %v3059_v44  ;;  %v7774_v30 = vld [vmem:[%s11146_s4] sm:$0x1f]  }
 0x54a   :  { %v3076_v29 = vadd.f32 %v3075_v17, %v3074_v28 }
 0x54b   :  { %v3077_v27 = vmul.f32 0.027777778, %v3061_v9  ;;  %v7775_v9 = vld [vmem:[%s11146_s4 + $0x8] sm:$0x1f]  }
 0x54c   :  { %v3078_v8 = vmul.f32 0.027777778, %v3076_v29  ;;  %v7776_v29 = vld [vmem:[%s11146_s4 + $0x10] sm:$0x1f]  }
 0x54d   :  { %v3079_v10 = vsel %vm2531_vm5, %v3077_v27, 0.0  ;;  %v7777_v27 = vld [vmem:[%s11146_s4 + $0x18] sm:$0x1f]  }
 0x54e   :  { %v3080_v40 = vsel %vm2531_vm5, %v3078_v8, 0.0  ;;  %v7778_v8 = vld [vmem:[%s11146_s4 + $0x20] sm:$0x1f]  }
 0x54f   :  { %v3081_v23 = vadd.f32 %v3080_v40, %v3079_v10  ;;  %v7779_v10 = vld [vmem:[%s11146_s4 + $0x28] sm:$0x1f]   ;;  %v7780_v40 = vld [vmem:[%s11146_s4 + $0x30] sm:$0x1f]  }
 0x551   :  { %v3082_v55 = vmul.f32 0.5, %v3081_v23  ;;  %v7781_v23 = vld [vmem:[%s11146_s4 + $0x38] sm:$0x1f]  }
 0x553   :  { %v3083_v19 = vadd.f32 1e-05, %v3082_v55  ;;  %v7782_v55 = vld [vmem:[%s11146_s4 + $0x40] sm:$0x1f]  }
 0x555   :  { %8053 = vrsqrt.f32 %v3083_v19  ;;  %v10225_v19 = vld [vmem:[%s11147_s5 + $0x40] sm:$0xff]  }
 0x55f   :  { %v8054_v63 = vpop.eup %8053 }
 0x560   :  { %v3085_v32 = vmul.f32 %v8054_v63, %v2987_v33  ;;  %v10230_v33 = vld [vmem:[%s11147_s5] sm:$0xff]  }
 0x562   :  { %v3086_v42 = vmul.f32 %v3085_v32, %v9954_v46  ;;  %v3087_v5 = vmul.f32 %v3085_v32, %v9957_v7  ;;  %v3088_v1 = vmul.f32 %v3085_v32, %v9960_v56  ;;  %v3089_v13 = vmul.f32 %v3085_v32, %v9963_v47 }
 0x563   :  { %v3090_v36 = vmul.f32 %v3085_v32, %v9966_v25  ;;  %v3091_v11 = vmul.f32 %v3085_v32, %v9968_v41  ;;  %v3092_v51 = vmul.f32 %v3085_v32, %v9970_v31  ;;  %v3093_v26 = vmul.f32 %v3085_v32, %v9972_v16 }
 0x564   :  { %v3094_v14 = vmul.f32 %v3085_v32, %v9974_v20  ;;  %v3095_v38 = vmul.f32 %v3085_v32, %v9976_v15  ;;  %v3117_v46 = vstv %s6554_s2  ;;  %v3099_v48 = vadd.f32 %v3089_v13, %v2988_v39 }
 0x565   :  { %v3101_v0 = vadd.f32 %v3091_v11, %v2988_v39  ;;  %v3102_v7 = vadd.f32 %v3092_v51, %v2988_v39  ;;  %v3103_v53 = vadd.f32 %v3093_v26, %v2988_v39  ;;  %v3096_v3 = vadd.f32 %v3086_v42, %v2988_v39  ;;  %v10245_v11 = vld [vmem:[%s11147_s5 + $0x48] sm:$0xff]   ;;  %v10257_v26 = vld [vmem:[%s11147_s5 + $0x50] sm:$0xff]  }
 0x566   :  { %v3104_v56 = vadd.f32 %v3094_v14, %v2988_v39  ;;  %v3098_v47 = vadd.f32 %v3088_v1, %v2988_v39  ;;  %v3105_v12 = vadd.f32 %v3095_v38, %v2988_v39  ;;  %v3097_v25 = vadd.f32 %v3087_v5, %v2988_v39  ;;  %v10250_v51 = vld [vmem:[%s11147_s5 + $0x8] sm:$0xff]   ;;  %v10262_v14 = vld [vmem:[%s11147_s5 + $0x10] sm:$0xff]  }
 0x567   :  { %v3100_v45 = vadd.f32 %v3090_v36, %v2988_v39  ;;  %vm3112_vm1 = vcmp.gt.f32.partialorder %v3101_v0, 0.0  ;;  %vm3113_vm3 = vcmp.gt.f32.partialorder %v3102_v7, 0.0  ;;  %vm3114_vm6 = vcmp.gt.f32.partialorder %v3103_v53, 0.0 }
 0x568   :  { %vm3115_vm7 = vcmp.gt.f32.partialorder %v3104_v56, 0.0  ;;  %v3123_v41 = vmul.f32 %v3117_v46, %v3101_v0  ;;  %v3124_v31 = vmul.f32 %v3117_v46, %v3102_v7  ;;  %vm3110_vm8 = vcmp.gt.f32.partialorder %v3099_v48, 0.0 }
 0x569   :  { %v3121_v16 = vmul.f32 %v3117_v46, %v3099_v48  ;;  %v3125_v20 = vmul.f32 %v3117_v46, %v3103_v53  ;;  %v3126_v15 = vmul.f32 %v3117_v46, %v3104_v56  ;;  %v3120_v35 = vmul.f32 %v3117_v46, %v3098_v47 }
 0x56a   :  { %v3127_v43 = vmul.f32 %v3117_v46, %v3105_v12  ;;  %v3133_v2 = vsel %vm3112_vm1, %v3101_v0, %v3123_v41  ;;  %v3134_v50 = vsel %vm3113_vm3, %v3102_v7, %v3124_v31  ;;  %vm3116_vm9 = vcmp.gt.f32.partialorder %v3105_v12, 0.0  ;;  %v10269_v0 = vld [vmem:[%s11147_s5 + $0x58] sm:$0xff]   ;;  %v10292_v31 = vld [vmem:[%s11147_s5 + $0x20] sm:$0xff]  }
 0x56b   :  { %v3135_v4 = vsel %vm3114_vm6, %v3103_v53, %v3125_v20  ;;  %v3136_v52 = vsel %vm3115_vm7, %v3104_v56, %v3126_v15  ;;  %vm3107_vm10 = vcmp.gt.f32.partialorder %v3096_v3, 0.0  ;;  %v10026_v57 = vpack.c.bf16 %v3134_v50, %v3133_v2  ;;  %v10280_v56 = vld [vmem:[%s11147_s5 + $0x18] sm:$0xff]   ;;  %v10305_v20 = vld [vmem:[%s11147_s5 + $0x28] sm:$0xff]  }
 0x56c   :  { %v10028_v54 = vpack.c.bf16 %v3136_v52, %v3135_v4  ;;  %vm3108_vm11 = vcmp.gt.f32.partialorder %v3097_v25, 0.0  ;;  %v3118_v34 = vmul.f32 %v3117_v46, %v3096_v3  ;;  %v3119_v49 = vmul.f32 %v3117_v46, %v3097_v25  ;;  %v10321_v4 = vld [vmem:[%s11147_s5 + $0x30] sm:$0xff]  }
 0x56d   :  { %vm3109_vm12 = vcmp.gt.f32.partialorder %v3098_v47, 0.0  ;;  %v3131_v18 = vsel %vm3110_vm8, %v3099_v48, %v3121_v16  ;;  %v3122_v6 = vmul.f32 %v3117_v46, %v3100_v45  ;;  %v3137_v21 = vsel %vm3116_vm9, %v3105_v12, %v3127_v43  ;;  %7237 = vmatpush3.bf16.msra.mxu1 %v10026_v57  ;;  %v10298_v16 = vld [vmem:[%s11147_s5 + $0x68] sm:$0xff]  }
 0x56e   :  { %v3128_v60 = vsel %vm3107_vm10, %v3096_v3, %v3118_v34  ;;  %v3130_v37 = vsel %vm3109_vm12, %v3098_v47, %v3120_v35  ;;  %vm3111_vm13 = vcmp.gt.f32.partialorder %v3100_v45, 0.0  ;;  %v3129_v62 = vsel %vm3108_vm11, %v3097_v25, %v3119_v49  ;;  %7238 = vmatprep.subr.bf16.mxu1 %v11170_v22  ;;  %v10286_v47 = vld [vmem:[%s11147_s5 + $0x60] sm:$0xff]   ;;  %v10313_v35 = vld [vmem:[%s11147_s5 + $0x70] sm:$0xff]   ;;  %v10332_v49 = vld [vmem:[%s11147_s5 + $0x78] sm:$0xff]  }
 0x56f   :  { %v10033_v24 = vpack.c.bf16 %v3131_v18, %v3130_v37  ;;  %v10035_v61 = vpack.c.bf16 %v3129_v62, %v3128_v60  ;;  %v3143_v59 = vpack.c.bf16 %v3137_v21, %v3137_v21  ;;  %v3132_v58 = vsel %vm3111_vm13, %v3100_v45, %v3122_v6  ;;  %v10337_v18 = vld [vmem:[%s11147_s5 + $0x38] sm:$0xff]  }
 0x570   :  { %v3140_v44 = vpack.c.bf16 %v3132_v58, %v3132_v58 }
 0x571   :  { %7227 = vmatpush3.bf16.msra.mxu0 %v10035_v61  ;;  %7239 = vmatpush3.bf16.msra.mxu1 %v10028_v54  ;;  %v10041_v28 = vsel %vm3155_vm14, %v3143_v59, 0 }
 0x572   :  { %7228 = vmatprep.subr.bf16.mxu0 %v11170_v22  ;;  %7240 = vmatprep.subr.bf16.mxu1 %v11170_v22  ;;  %v10050_v17 = vsel %vm3155_vm14, %v3140_v44, 0 }
 0x575   :  { %7229 = vmatpush3.bf16.msra.mxu0 %v10033_v24  ;;  %7241 = vmatpush3.bf16.msra.mxu1 %v10041_v28 }
 0x576   :  { %7230 = vmatprep.subr.bf16.mxu0 %v11170_v22  ;;  %7256 = vmatprep.subr.bf16.mxu1 %v11170_v22 }
 0x578   :  { %7243 = vmatmul.mubr.msk.bf16.vlgmr.msra.gmra.mrb[168].mxu1 %vm3151_vm15, %v7774_v30 }
 0x579   :  { %7231 = vmatpush3.bf16.msra.mxu0 %v10050_v17  ;;  %7257 = vmatpush3.bf16.msra.mxu1 %v10026_v57 }
 0x57a   :  { %7246 = vmatprep.subr.bf16.mxu0 %v11170_v22  ;;  %7258 = vmatprep.subr.bf16.mxu1 %v11170_v22 }
 0x57b   :  { %7262 = vmatprep.mubr.msk.bf16.mxu1 %vm8102_vm2, %v11170_v22 }
 0x57c   :  { %7233 = vmatmul.mubr.msk.bf16.vlgmr.msra.gmra.mrb[168].mxu0 %vm3151_vm15, %v7774_v30  ;;  %v10356_v30 = vld [vmem:[%s11147_s5 + $0x80] sm:$0xff]  }
 0x57d   :  { %7247 = vmatpush3.bf16.msra.mxu0 %v10035_v61  ;;  %7259 = vmatpush3.bf16.msra.mxu1 %v10028_v54 }
 0x57e   :  { %7248 = vmatprep.subr.bf16.mxu0 %v11170_v22  ;;  %7260 = vmatprep.subr.bf16.mxu1 %v11170_v22 }
 0x57f   :  { %7252 = vmatprep.mubr.msk.bf16.mxu0 %vm8102_vm2, %v11170_v22 }
 0x581   :  { %7249 = vmatpush3.bf16.msra.mxu0 %v10033_v24  ;;  %7261 = vmatpush3.bf16.msra.mxu1 %v10041_v28 }
 0x582   :  { %7250 = vmatprep.subr.bf16.mxu0 %v11170_v22  ;;  %7276 = vmatprep.subr.bf16.mxu1 %v11170_v22 }
 0x584   :  { %7263 = vmatmul.mubr.msk.bf16.vlgmr.msra.gmra.mrb[172].mxu1 %vm3151_vm15, %v7775_v9 }
 0x585   :  { %7251 = vmatpush3.bf16.msra.mxu0 %v10050_v17  ;;  %7277 = vmatpush3.bf16.msra.mxu1 %v10026_v57 }
 0x586   :  { %7266 = vmatprep.subr.bf16.mxu0 %v11170_v22  ;;  %7278 = vmatprep.subr.bf16.mxu1 %v11170_v22 }
 0x587   :  { %7282 = vmatprep.mubr.msk.bf16.mxu1 %vm8102_vm2, %v11170_v22 }
 0x588   :  { %7253 = vmatmul.mubr.msk.bf16.vlgmr.msra.gmra.mrb[172].mxu0 %vm3151_vm15, %v7775_v9 }
 0x589   :  { %7267 = vmatpush3.bf16.msra.mxu0 %v10035_v61  ;;  %7279 = vmatpush3.bf16.msra.mxu1 %v10028_v54 }
 0x58a   :  { %7268 = vmatprep.subr.bf16.mxu0 %v11170_v22  ;;  %7280 = vmatprep.subr.bf16.mxu1 %v11170_v22 }
 0x58b   :  { %7272 = vmatprep.mubr.msk.bf16.mxu0 %vm8102_vm2, %v11170_v22 }
 0x58d   :  { %7269 = vmatpush3.bf16.msra.mxu0 %v10033_v24  ;;  %7281 = vmatpush3.bf16.msra.mxu1 %v10041_v28 }
 0x58e   :  { %7270 = vmatprep.subr.bf16.mxu0 %v11170_v22  ;;  %7296 = vmatprep.subr.bf16.mxu1 %v11170_v22 }
 0x590   :  { %7283 = vmatmul.mubr.msk.bf16.vlgmr.msra.gmra.mrb[176].mxu1 %vm3151_vm15, %v7776_v29 }
 0x591   :  { %7271 = vmatpush3.bf16.msra.mxu0 %v10050_v17  ;;  %7297 = vmatpush3.bf16.msra.mxu1 %v10026_v57 }
 0x592   :  { %7286 = vmatprep.subr.bf16.mxu0 %v11170_v22  ;;  %7298 = vmatprep.subr.bf16.mxu1 %v11170_v22 }
 0x593   :  { %7302 = vmatprep.mubr.msk.bf16.mxu1 %vm8102_vm2, %v11170_v22 }
 0x594   :  { %7273 = vmatmul.mubr.msk.bf16.vlgmr.msra.gmra.mrb[176].mxu0 %vm3151_vm15, %v7776_v29 }
 0x595   :  { %7287 = vmatpush3.bf16.msra.mxu0 %v10035_v61  ;;  %7299 = vmatpush3.bf16.msra.mxu1 %v10028_v54 }
 0x596   :  { %7288 = vmatprep.subr.bf16.mxu0 %v11170_v22  ;;  %7300 = vmatprep.subr.bf16.mxu1 %v11170_v22 }
 0x597   :  { %7292 = vmatprep.mubr.msk.bf16.mxu0 %vm8102_vm2, %v11170_v22 }
 0x599   :  { %7289 = vmatpush3.bf16.msra.mxu0 %v10033_v24  ;;  %7301 = vmatpush3.bf16.msra.mxu1 %v10041_v28 }
 0x59a   :  { %7290 = vmatprep.subr.bf16.mxu0 %v11170_v22  ;;  %7316 = vmatprep.subr.bf16.mxu1 %v11170_v22 }
 0x59c   :  { %7303 = vmatmul.mubr.msk.bf16.vlgmr.msra.gmra.mrb[180].mxu1 %vm3151_vm15, %v7777_v27 }
 0x59d   :  { %7291 = vmatpush3.bf16.msra.mxu0 %v10050_v17  ;;  %7317 = vmatpush3.bf16.msra.mxu1 %v10026_v57 }
 0x59e   :  { %7306 = vmatprep.subr.bf16.mxu0 %v11170_v22  ;;  %7318 = vmatprep.subr.bf16.mxu1 %v11170_v22 }
 0x59f   :  { %7322 = vmatprep.mubr.msk.bf16.mxu1 %vm8102_vm2, %v11170_v22 }
 0x5a0   :  { %7293 = vmatmul.mubr.msk.bf16.vlgmr.msra.gmra.mrb[180].mxu0 %vm3151_vm15, %v7777_v27 }
 0x5a1   :  { %7307 = vmatpush3.bf16.msra.mxu0 %v10035_v61  ;;  %7319 = vmatpush3.bf16.msra.mxu1 %v10028_v54 }
 0x5a2   :  { %7308 = vmatprep.subr.bf16.mxu0 %v11170_v22  ;;  %7320 = vmatprep.subr.bf16.mxu1 %v11170_v22 }
 0x5a3   :  { %7312 = vmatprep.mubr.msk.bf16.mxu0 %vm8102_vm2, %v11170_v22 }
 0x5a5   :  { %7309 = vmatpush3.bf16.msra.mxu0 %v10033_v24  ;;  %7321 = vmatpush3.bf16.msra.mxu1 %v10041_v28 }
 0x5a6   :  { %7310 = vmatprep.subr.bf16.mxu0 %v11170_v22  ;;  %7336 = vmatprep.subr.bf16.mxu1 %v11170_v22 }
 0x5a8   :  { %7323 = vmatmul.mubr.msk.bf16.vlgmr.msra.gmra.mrb[184].mxu1 %vm3151_vm15, %v7778_v8 }
 0x5a9   :  { %7311 = vmatpush3.bf16.msra.mxu0 %v10050_v17  ;;  %7337 = vmatpush3.bf16.msra.mxu1 %v10026_v57 }
 0x5aa   :  { %7326 = vmatprep.subr.bf16.mxu0 %v11170_v22  ;;  %7338 = vmatprep.subr.bf16.mxu1 %v11170_v22 }
 0x5ab   :  { %7342 = vmatprep.mubr.msk.bf16.mxu1 %vm8102_vm2, %v11170_v22 }
 0x5ac   :  { %7313 = vmatmul.mubr.msk.bf16.vlgmr.msra.gmra.mrb[184].mxu0 %vm3151_vm15, %v7778_v8 }
 0x5ad   :  { %7327 = vmatpush3.bf16.msra.mxu0 %v10035_v61  ;;  %7339 = vmatpush3.bf16.msra.mxu1 %v10028_v54 }
 0x5ae   :  { %7328 = vmatprep.subr.bf16.mxu0 %v11170_v22  ;;  %7340 = vmatprep.subr.bf16.mxu1 %v11170_v22 }
 0x5af   :  { %7332 = vmatprep.mubr.msk.bf16.mxu0 %vm8102_vm2, %v11170_v22 }
 0x5b1   :  { %7329 = vmatpush3.bf16.msra.mxu0 %v10033_v24  ;;  %7341 = vmatpush3.bf16.msra.mxu1 %v10041_v28 }
 0x5b2   :  { %7330 = vmatprep.subr.bf16.mxu0 %v11170_v22  ;;  %7356 = vmatprep.subr.bf16.mxu1 %v11170_v22 }
 0x5b4   :  { %7343 = vmatmul.mubr.msk.bf16.vlgmr.msra.gmra.mrb[188].mxu1 %vm3151_vm15, %v7779_v10 }
 0x5b5   :  { %7331 = vmatpush3.bf16.msra.mxu0 %v10050_v17  ;;  %7357 = vmatpush3.bf16.msra.mxu1 %v10026_v57 }
 0x5b6   :  { %7346 = vmatprep.subr.bf16.mxu0 %v11170_v22  ;;  %7358 = vmatprep.subr.bf16.mxu1 %v11170_v22 }
 0x5b7   :  { %7362 = vmatprep.mubr.msk.bf16.mxu1 %vm8102_vm2, %v11170_v22 }
 0x5b8   :  { %7333 = vmatmul.mubr.msk.bf16.vlgmr.msra.gmra.mrb[188].mxu0 %vm3151_vm15, %v7779_v10 }
 0x5b9   :  { %7347 = vmatpush3.bf16.msra.mxu0 %v10035_v61  ;;  %7359 = vmatpush3.bf16.msra.mxu1 %v10028_v54 }
 0x5ba   :  { %7348 = vmatprep.subr.bf16.mxu0 %v11170_v22  ;;  %7360 = vmatprep.subr.bf16.mxu1 %v11170_v22 }
 0x5bb   :  { %7352 = vmatprep.mubr.msk.bf16.mxu0 %vm8102_vm2, %v11170_v22 }
 0x5bd   :  { %7349 = vmatpush3.bf16.msra.mxu0 %v10033_v24  ;;  %7361 = vmatpush3.bf16.msra.mxu1 %v10041_v28 }
 0x5be   :  { %7350 = vmatprep.subr.bf16.mxu0 %v11170_v22  ;;  %7376 = vmatprep.subr.bf16.mxu1 %v11170_v22 }
 0x5c0   :  { %7363 = vmatmul.mubr.msk.bf16.vlgmr.msra.gmra.mrb[192].mxu1 %vm3151_vm15, %v7780_v40 }
 0x5c1   :  { %7351 = vmatpush3.bf16.msra.mxu0 %v10050_v17  ;;  %7377 = vmatpush3.bf16.msra.mxu1 %v10026_v57 }
 0x5c2   :  { %7366 = vmatprep.subr.bf16.mxu0 %v11170_v22  ;;  %7378 = vmatprep.subr.bf16.mxu1 %v11170_v22 }
 0x5c3   :  { %7382 = vmatprep.mubr.msk.bf16.mxu1 %vm8102_vm2, %v11170_v22 }
 0x5c4   :  { %7353 = vmatmul.mubr.msk.bf16.vlgmr.msra.gmra.mrb[192].mxu0 %vm3151_vm15, %v7780_v40 }
 0x5c5   :  { %7367 = vmatpush3.bf16.msra.mxu0 %v10035_v61  ;;  %7379 = vmatpush3.bf16.msra.mxu1 %v10028_v54 }
 0x5c6   :  { %7368 = vmatprep.subr.bf16.mxu0 %v11170_v22  ;;  %7380 = vmatprep.subr.bf16.mxu1 %v11170_v22 }
 0x5c7   :  { %7372 = vmatprep.mubr.msk.bf16.mxu0 %vm8102_vm2, %v11170_v22 }
 0x5c9   :  { %7369 = vmatpush3.bf16.msra.mxu0 %v10033_v24  ;;  %7381 = vmatpush3.bf16.msra.mxu1 %v10041_v28 }
 0x5ca   :  { %7370 = vmatprep.subr.bf16.mxu0 %v11170_v22  ;;  %7396 = vmatprep.subr.bf16.mxu1 %v11170_v22 }
 0x5cc   :  { %7383 = vmatmul.mubr.msk.bf16.vlgmr.msra.gmra.mrb[196].mxu1 %vm3151_vm15, %v7781_v23 }
 0x5cd   :  { %7371 = vmatpush3.bf16.msra.mxu0 %v10050_v17  ;;  %7397 = vmatpush3.bf16.msra.mxu1 %v10026_v57 }
 0x5ce   :  { %7386 = vmatprep.subr.bf16.mxu0 %v11170_v22  ;;  %7398 = vmatprep.subr.bf16.mxu1 %v11170_v22 }
 0x5cf   :  { %7402 = vmatprep.mubr.msk.bf16.mxu1 %vm8102_vm2, %v11170_v22 }
 0x5d0   :  { %7373 = vmatmul.mubr.msk.bf16.vlgmr.msra.gmra.mrb[196].mxu0 %vm3151_vm15, %v7781_v23 }
 0x5d1   :  { %7387 = vmatpush3.bf16.msra.mxu0 %v10035_v61  ;;  %7399 = vmatpush3.bf16.msra.mxu1 %v10028_v54 }
 0x5d2   :  { %7388 = vmatprep.subr.bf16.mxu0 %v11170_v22  ;;  %7400 = vmatprep.subr.bf16.mxu1 %v11170_v22 }
 0x5d3   :  { %7392 = vmatprep.mubr.msk.bf16.mxu0 %vm8102_vm2, %v11170_v22 }
 0x5d5   :  { %7389 = vmatpush3.bf16.msra.mxu0 %v10033_v24  ;;  %7401 = vmatpush3.bf16.msra.mxu1 %v10041_v28  ;;  %v10351_v28 = vld [vmem:[%s11147_s5 + $0xc0] sm:$0xff]  }
 0x5d6   :  { %7390 = vmatprep.subr.bf16.mxu0 %v11170_v22  ;;  %6994 = vmatprep.subr.bf16.mxu1 %v10351_v28 }
 0x5d8   :  { %7403 = vmatmul.mubr.msk.bf16.vlgmr.msra.gmra.mrb[200].mxu1 %vm3151_vm15, %v7782_v55 }
 0x5d9   :  { %7391 = vmatpush3.bf16.msra.mxu0 %v10050_v17  ;;  %6995 = vmatpush3.bf16.msra.mxu1 %v10356_v30 }
 0x5da   :  { %6972 = vmatprep.subr.bf16.mxu0 %v10225_v19 }
 0x5dc   :  { %7393 = vmatmul.mubr.msk.bf16.vlgmr.msra.gmra.mrb[200].mxu0 %vm3151_vm15, %v7782_v55  ;;  %v10372_v55 = vld [vmem:[%s11147_s5 + $0xc8] sm:$0xff]  }
 0x5dd   :  { %6973 = vmatpush3.bf16.msra.mxu0 %v10230_v33  ;;  %6996 = vmatprep.subr.bf16.mxu1 %v10372_v55 }
 0x5de   :  { %6974 = vmatprep.subr.bf16.mxu0 %v10245_v11 }
 0x5e1   :  { %6975 = vmatpush3.bf16.msra.mxu0 %v10250_v51 }
 0x5e2   :  { %6976 = vmatprep.subr.bf16.mxu0 %v10257_v26 }
 0x5e5   :  { %6977 = vmatpush3.bf16.msra.mxu0 %v10262_v14 }
 0x5e6   :  { %6978 = vmatprep.subr.bf16.mxu0 %v10269_v0 }
 0x5e9   :  { %6979 = vmatpush3.bf16.msra.mxu0 %v10280_v56 }
 0x5ea   :  { %6980 = vmatprep.subr.bf16.mxu0 %v10286_v47 }
 0x5ed   :  { %6981 = vmatpush3.bf16.msra.mxu0 %v10292_v31 }
 0x5ee   :  { %6982 = vmatprep.subr.bf16.mxu0 %v10298_v16 }
 0x5f1   :  { %6983 = vmatpush3.bf16.msra.mxu0 %v10305_v20 }
 0x5f2   :  { %6984 = vmatprep.subr.bf16.mxu0 %v10313_v35 }
 0x5f5   :  { %6985 = vmatpush3.bf16.msra.mxu0 %v10321_v4 }
 0x5f6   :  { %6986 = vmatprep.subr.bf16.mxu0 %v10332_v49 }
 0x5f9   :  { %6987 = vmatpush3.bf16.msra.mxu0 %v10337_v18 }
 0x5fa   :  { %7406 = vmatprep.subr.bf16.mxu0 %v11170_v22 }
 0x64b   :  { %v10234_v63 = vpop.f32.mrb[168].mxu1 }
 0x64c   :  { %v7244_v32 = vpop.f32.mrb[169].mxu1 }
 0x64d   :  { %v10236_v39 = vpop.f32.mrb[170].mxu1  ;;  %v10377_v32 = vld [vmem:[%s11147_s5 + $0x88] sm:$0xff]  }
 0x64e   :  { %v7245_v42 = vpop.f32.mrb[171].mxu1  ;;  %6997 = vmatpush3.bf16.msra.mxu1 %v10377_v32 }
 0x64f   :  { %v10238_v5 = vpop.f32.mrb[168].mxu0  ;;  %v10384_v42 = vld [vmem:[%s11147_s5 + $0xd0] sm:$0xff]  }
 0x650   :  { %v7234_v1 = vpop.f32.mrb[169].mxu0  ;;  %6998 = vmatprep.subr.bf16.mxu1 %v10384_v42 }
 0x651   :  { %v10240_v13 = vpop.f32.mrb[170].mxu0 }
 0x652   :  { %v7235_v36 = vpop.f32.mrb[171].mxu0 }
 0x653   :  { %v10389_v36 = vld [vmem:[%s11147_s5 + $0x90] sm:$0xff]  }
 0x654   :  { %6999 = vmatpush3.bf16.msra.mxu1 %v10389_v36 }
 0x657   :  { %v10264_v38 = vpop.f32.mrb[172].mxu1 }
 0x658   :  { %v7264_v46 = vpop.f32.mrb[173].mxu1 }
 0x659   :  { %v10272_v48 = vpop.f32.mrb[174].mxu1 }
 0x65a   :  { %v7649_v7 = vpack.i.bf16 %v10272_v48, %v10264_v38  ;;  %v7265_v53 = vpop.f32.mrb[175].mxu1 }
 0x65b   :  { %v3289_v3 = vpop.f32.mrb[172].mxu0 }
 0x65c   :  { %v7254_v12 = vpop.f32.mrb[173].mxu0 }
 0x65d   :  { %v3292_v25 = vpop.f32.mrb[174].mxu0 }
 0x65e   :  { %v7629_v45 = vpack.i.bf16 %v3292_v25, %v3289_v3  ;;  %v7255_v41 = vpop.f32.mrb[175].mxu0  ;;  %v10396_v25 = vld [vmem:[%s11147_s5 + $0xd8] sm:$0xff]  }
 0x65f   :  { %v10401_v41 = vld [vmem:[%s11147_s5 + $0x98] sm:$0xff]   ;;  %7000 = vmatprep.subr.bf16.mxu1 %v10396_v25 }
 0x660   :  { %7630 = vrot.lane.b32.xlu1 %v7629_v45, %s8105_s23  ;;  %7001 = vmatpush3.bf16.msra.mxu1 %v10401_v41 }
 0x663   :  { %v10307_v15 = vpop.f32.mrb[176].mxu1 }
 0x664   :  { %v7284_v43 = vpop.f32.mrb[177].mxu1 }
 0x665   :  { %v10315_v2 = vpop.f32.mrb[178].mxu1 }
 0x666   :  { %v7285_v50 = vpop.f32.mrb[179].mxu1 }
 0x667   :  { %v10323_v52 = vpop.f32.mrb[176].mxu0 }
 0x668   :  { %v7274_v57 = vpop.f32.mrb[177].mxu0 }
 0x669   :  { %v10326_v54 = vpop.f32.mrb[178].mxu0 }
 0x66a   :  { %v7275_v34 = vpop.f32.mrb[179].mxu0 }
 0x66f   :  { %v10341_v6 = vpop.f32.mrb[180].mxu1 }
 0x670   :  { %v7304_v21 = vpop.f32.mrb[181].mxu1 }
 0x671   :  { %v10344_v60 = vpop.f32.mrb[182].mxu1  ;;  %v10408_v21 = vld [vmem:[%s11147_s5 + $0xe0] sm:$0xff]  }
 0x672   :  { %v7644_v37 = vpack.i.bf16 %v10344_v60, %v10341_v6  ;;  %v7305_v62 = vpop.f32.mrb[183].mxu1  ;;  %7002 = vmatprep.subr.bf16.mxu1 %v10408_v21 }
 0x673   :  { %v3475_v24 = vpop.f32.mrb[180].mxu0  ;;  %v10413_v62 = vld [vmem:[%s11147_s5 + $0xa0] sm:$0xff]  }
 0x674   :  { %v7294_v61 = vpop.f32.mrb[181].mxu0  ;;  %7003 = vmatpush3.bf16.msra.mxu1 %v10413_v62 }
 0x675   :  { %v3478_v59 = vpop.f32.mrb[182].mxu0  ;;  %v10426_v61 = vld [vmem:[%s11147_s5 + $0xa8] sm:$0xff]  }
 0x676   :  { %v7624_v58 = vpack.i.bf16 %v3478_v59, %v3475_v24  ;;  %v7295_v44 = vpop.f32.mrb[183].mxu0  ;;  %v10418_v24 = vld [vmem:[%s11147_s5 + $0xe8] sm:$0xff]   ;;  %v10432_v59 = vld [vmem:[%s11147_s5 + $0xf0] sm:$0xff]  }
 0x677   :  { %7004 = vmatprep.subr.bf16.mxu1 %v10418_v24 }
 0x678   :  { %7625 = vrot.lane.b32.xlu0 %v7624_v58, %s8105_s23  ;;  %7005 = vmatpush3.bf16.msra.mxu1 %v10426_v61 }
 0x679   :  { %7006 = vmatprep.subr.bf16.mxu1 %v10432_v59 }
 0x67b   :  { %v10361_v17 = vpop.f32.mrb[184].mxu1 }
 0x67c   :  { %v7324_v9 = vpop.f32.mrb[185].mxu1 }
 0x67d   :  { %v10363_v29 = vpop.f32.mrb[186].mxu1 }
 0x67e   :  { %v7325_v27 = vpop.f32.mrb[187].mxu1 }
 0x67f   :  { %v10365_v8 = vpop.f32.mrb[184].mxu0  ;;  %v10446_v27 = vld [vmem:[%s11147_s5 + $0xb0] sm:$0xff]  }
 0x680   :  { %v7314_v10 = vpop.f32.mrb[185].mxu0  ;;  %7007 = vmatpush3.bf16.msra.mxu1 %v10446_v27 }
 0x681   :  { %v10367_v40 = vpop.f32.mrb[186].mxu0 }
 0x682   :  { %v7315_v23 = vpop.f32.mrb[187].mxu0 }
 0x687   :  { %v3702_v1 = vpop.f32.mrb[188].mxu1 }
 0x688   :  { %v7344_v46 = vpop.f32.mrb[189].mxu1 }
 0x689   :  { %v3705_v53 = vpop.f32.mrb[190].mxu1  ;;  %v10463_v46 = vld [vmem:[%s11147_s5 + $0xb8] sm:$0xff]  }
 0x68a   :  { %v7659_v3 = vpack.i.bf16 %v3705_v53, %v3702_v1  ;;  %v7345_v12 = vpop.f32.mrb[191].mxu1 }
 0x68b   :  { %v3661_v45 = vpop.f32.mrb[188].mxu0 }
 0x68c   :  { %v7334_v43 = vpop.f32.mrb[189].mxu0 }
 0x68d   :  { %v3664_v50 = vpop.f32.mrb[190].mxu0 }
 0x68e   :  { %v7639_v57 = vpack.i.bf16 %v3664_v50, %v3661_v45  ;;  %v7335_v34 = vpop.f32.mrb[191].mxu0 }
 0x690   :  { %7640 = vrot.lane.b32.xlu1 %v7639_v57, %s8105_s23 }
 0x693   :  { %v10434_v58 = vpop.f32.mrb[192].mxu1 }
 0x694   :  { %7650 = vrot.lane.b32.xlu1 %v7649_v7, %s8105_s23  ;;  %v7364_v44 = vpop.f32.mrb[193].mxu1  ;;  %v10458_v7 = vld [vmem:[%s11147_s5 + $0xf8] sm:$0xff]  }
 0x695   :  { %v10440_v9 = vpop.f32.mrb[194].mxu1  ;;  %7008 = vmatprep.subr.bf16.mxu1 %v10458_v7 }
 0x696   :  { %v7365_v10 = vpop.f32.mrb[195].mxu1  ;;  %7009 = vmatpush3.bf16.msra.mxu1 %v10463_v46 }
 0x697   :  { %v10449_v23 = vpop.f32.mrb[192].mxu0  ;;  %7021 = vmatprep.subr.bf16.mxu1 %v10225_v19 }
 0x698   :  { %7660 = vrot.lane.b32.xlu1 %v7659_v3, %s8105_s23  ;;  %v7354_v1 = vpop.f32.mrb[193].mxu0 }
 0x699   :  { %v10452_v38 = vpop.f32.mrb[194].mxu0 }
 0x69a   :  { %v7355_v48 = vpop.f32.mrb[195].mxu0 }
 0x69f   :  { %v3888_v53 = vpop.f32.mrb[196].mxu1 }
 0x6a0   :  { %v7384_v3 = vpop.f32.mrb[197].mxu1 }
 0x6a1   :  { %v3891_v12 = vpop.f32.mrb[198].mxu1 }
 0x6a2   :  { %v7654_v45 = vpack.i.bf16 %v3891_v12, %v3888_v53  ;;  %v7385_v43 = vpop.f32.mrb[199].mxu1 }
 0x6a3   :  { %v3847_v50 = vpop.f32.mrb[196].mxu0 }
 0x6a4   :  { %v7374_v57 = vpop.f32.mrb[197].mxu0 }
 0x6a5   :  { %v3850_v34 = vpop.f32.mrb[198].mxu0 }
 0x6a6   :  { %v7634_v44 = vpack.i.bf16 %v3850_v34, %v3847_v50  ;;  %v7375_v10 = vpop.f32.mrb[199].mxu0 }
 0x6a8   :  { %7635 = vrot.lane.b32.xlu0 %v7634_v44, %s8105_s23 }
 0x6ab   :  { %v10474_v12 = vpop.f32.mrb[200].mxu1 }
 0x6ac   :  { %7645 = vrot.lane.b32.xlu0 %v7644_v37, %s8105_s23  ;;  %v7404_v43 = vpop.f32.mrb[201].mxu1 }
 0x6ad   :  { %v10476_v57 = vpop.f32.mrb[202].mxu1 }
 0x6ae   :  { %v4077_v50 = vpack.c.bf16 %v10476_v57, %v10474_v12  ;;  %v7405_v34 = vpop.f32.mrb[203].mxu1  ;;  %v7837_v12 = vld [vmem:[%s11148_s6 + $0x60] ss:$8 sps:$4 sm:$0xff]   ;;  %v7842_v57 = vld [vmem:[%s11148_s6 + $0x74] ss:$8 sps:$4 sm:$0xff]  }
 0x6af   :  { %v3940_v1 = vpop.f32.mrb[200].mxu0 }
 0x6b0   :  { %7655 = vrot.lane.b32.xlu0 %v7654_v45, %s8105_s23  ;;  %v7394_v19 = vpop.f32.mrb[201].mxu0  ;;  %s8073_s23 = scalar_lea.vmem %s6333_s15, 32 }
 0x6b1   :  { %v3943_v48 = vpop.f32.mrb[202].mxu0  ;;  %p8074_p5 = scmp.ne.s32.totalorder %s6333_s15, %s8073_s23  ;;  %p8079_p7 = scmp.lt.s32.totalorder %s8073_s23, %s8073_s23 }
 0x6b2   :  { %v4072_v3 = vpack.c.bf16 %v3943_v48, %v3940_v1  ;;  %v7395_v53 = vpop.f32.mrb[203].mxu0 }
 0x6b3   :  { %p8080_p8 = por %p8079_p7, %p8078_p6 }
 0x6b5   :  { %p8081_p9 = pnand %p8080_p8, %p8074_p5 }
 0x6d2   :  { %v7631_v44 = vpop.permute.xlu1 %7630 }
 0x6d3   :  { %v7633_v10 = vunpack.i.h.bf16 %v7631_v44  ;;  %v7632_v6 = vunpack.i.l.bf16 %v7631_v44  ;;  %v10491_v44 = vld [vmem:[%s11147_s5 + $0x100] sm:$0xff]  }
 0x6d5   :  { %v4053_v60 = vsel %vm2531_vm5, %v10240_v13, %v7633_v10  ;;  %v4052_v37 = vsel %vm2531_vm5, %v10238_v5, %v7632_v6  ;;  %v10497_v5 = vld [vmem:[%s11147_s5 + $0x108] sm:$0xff]   ;;  %v10506_v13 = vld [vmem:[%s11147_s5 + $0x110] sm:$0xff]  }
 0x6d6   :  { %v4068_v45 = vpack.c.bf16 %v4053_v60, %v4052_v37 }
 0x6ea   :  { %v7626_v1 = vpop.permute.xlu0 %7625 }
 0x6eb   :  { %v7628_v19 = vunpack.i.h.bf16 %v7626_v1  ;;  %v7627_v48 = vunpack.i.l.bf16 %v7626_v1 }
 0x6ed   :  { %v4056_v53 = vsel %vm2531_vm5, %v10323_v52, %v7627_v48  ;;  %v4057_v43 = vsel %vm2531_vm5, %v10326_v54, %v7628_v19  ;;  %v10513_v52 = vld [vmem:[%s11147_s5 + $0x118] sm:$0xff]  }
 0x6ee   :  { %v4069_v34 = vpack.c.bf16 %v4057_v43, %v4056_v53  ;;  %v7845_v43 = vld [vmem:[%s11148_s6 + $0x84] ss:$8 sps:$4 sm:$0xff]  }
 0x6f0   :  { %4401 = vmatprep.mubr.bf16.mxu0 %v4069_v34  ;;  %v7843_v34 = vld [vmem:[%s11148_s6 + $0x80] ss:$8 sps:$4 sm:$0xff]  }
 0x6f1   :  { %4402 = vmatmul.mubr.bf16.vlgmr.msra.gmra.mrb[204].mxu0 %v4068_v45 }
 0x6f2   :  { %7407 = vmatpush3.bf16.msra.mxu0 %v10491_v44  ;;  %7414 = vmatprep.mubr.msk.bf16.mxu0 %vm8102_vm2, %v11170_v22 }
 0x6f3   :  { %7408 = vmatprep.subr.bf16.mxu0 %v11170_v22 }
 0x6f6   :  { %7409 = vmatpush3.bf16.msra.mxu0 %v10497_v5 }
 0x6f7   :  { %7410 = vmatprep.subr.bf16.mxu0 %v11170_v22 }
 0x6fa   :  { %7411 = vmatpush3.bf16.msra.mxu0 %v10506_v13 }
 0x6fb   :  { %7412 = vmatprep.subr.bf16.mxu0 %v11170_v22 }
 0x6fe   :  { %7413 = vmatpush3.bf16.msra.mxu0 %v10513_v52 }
 0x6ff   :  { %7043 = vmatprep.subr.bf16.mxu0 %v10351_v28 }
 0x701   :  { %7415 = vmatmul.mubr.msk.bf16.vlgmr.msra.gmra.mrb[208].mxu0 %vm2531_vm5, %v4072_v3 }
 0x702   :  { %v7641_v54 = vpop.permute.xlu1 %7640  ;;  %7044 = vmatpush3.bf16.msra.mxu0 %v10356_v30 }
 0x703   :  { %v7643_v10 = vunpack.i.h.bf16 %v7641_v54  ;;  %v7642_v6 = vunpack.i.l.bf16 %v7641_v54  ;;  %7045 = vmatprep.subr.bf16.mxu0 %v10372_v55 }
 0x705   :  { %v4061_v60 = vsel %vm2531_vm5, %v10367_v40, %v7643_v10  ;;  %v4060_v37 = vsel %vm2531_vm5, %v10365_v8, %v7642_v6  ;;  %v7851_v6 = vld [vmem:[%s11148_s6 + $0xa4] ss:$8 sps:$4 sm:$0xff]  }
 0x706   :  { %v4070_v45 = vpack.c.bf16 %v4061_v60, %v4060_v37  ;;  %v7651_v1 = vpop.permute.xlu1 %7650  ;;  %7046 = vmatpush3.bf16.msra.mxu0 %v10377_v32  ;;  %v7849_v60 = vld [vmem:[%s11148_s6 + $0xa0] ss:$8 sps:$4 sm:$0xff]   ;;  %v7854_v37 = vld [vmem:[%s11148_s6 + $0xb4] ss:$8 sps:$4 sm:$0xff]  }
 0x707   :  { %v7653_v28 = vunpack.i.h.bf16 %v7651_v1  ;;  %v7652_v19 = vunpack.i.l.bf16 %v7651_v1  ;;  %7047 = vmatprep.subr.bf16.mxu0 %v10384_v42  ;;  %v7857_v1 = vld [vmem:[%s11148_s6 + $0xc4] ss:$8 sps:$4 sm:$0xff]  }
 0x709   :  { %v4055_v30 = vsel %vm2531_vm5, %v10236_v39, %v7653_v28  ;;  %v4054_v55 = vsel %vm2531_vm5, %v10234_v63, %v7652_v19  ;;  %v7855_v28 = vld [vmem:[%s11148_s6 + $0xc0] ss:$8 sps:$4 sm:$0xff]   ;;  %v7860_v19 = vld [vmem:[%s11148_s6 + $0xd4] ss:$8 sps:$4 sm:$0xff]  }
 0x70a   :  { %v4073_v3 = vpack.c.bf16 %v4055_v30, %v4054_v55  ;;  %v7661_v48 = vpop.permute.xlu1 %7660  ;;  %7048 = vmatpush3.bf16.msra.mxu0 %v10389_v36  ;;  %v7858_v30 = vld [vmem:[%s11148_s6 + $0xd0] ss:$8 sps:$4 sm:$0xff]   ;;  %v7863_v55 = vld [vmem:[%s11148_s6 + $0xe4] ss:$8 sps:$4 sm:$0xff]  }
 0x70b   :  { %v7663_v40 = vunpack.i.h.bf16 %v7661_v48  ;;  %v7662_v8 = vunpack.i.l.bf16 %v7661_v48  ;;  %7049 = vmatprep.subr.bf16.mxu0 %v10396_v25  ;;  %v7866_v48 = vld [vmem:[%s11148_s6 + $0xf4] ss:$8 sps:$4 sm:$0xff]  }
 0x70d   :  { %v4063_v32 = vsel %vm2531_vm5, %v10363_v29, %v7663_v40  ;;  %v4062_v42 = vsel %vm2531_vm5, %v10361_v17, %v7662_v8  ;;  %v7864_v40 = vld [vmem:[%s11148_s6 + $0xf0] ss:$8 sps:$4 sm:$0xff]   ;;  %v7869_v8 = vld [vmem:[%s11148_s6 + $0x104] ss:$8 sps:$4 sm:$0xff]  }
 0x70e   :  { %v4075_v53 = vpack.c.bf16 %v4063_v32, %v4062_v42  ;;  %7050 = vmatpush3.bf16.msra.mxu0 %v10401_v41 }
 0x70f   :  { %7051 = vmatprep.subr.bf16.mxu0 %v10408_v21 }
 0x712   :  { %7052 = vmatpush3.bf16.msra.mxu0 %v10413_v62 }
 0x713   :  { %7053 = vmatprep.subr.bf16.mxu0 %v10418_v24 }
 0x716   :  { %7054 = vmatpush3.bf16.msra.mxu0 %v10426_v61 }
 0x717   :  { %7055 = vmatprep.subr.bf16.mxu0 %v10432_v59 }
 0x71a   :  { %v7636_v63 = vpop.permute.xlu0 %7635  ;;  %7056 = vmatpush3.bf16.msra.mxu0 %v10446_v27 }
 0x71b   :  { %v7638_v39 = vunpack.i.h.bf16 %v7636_v63  ;;  %v7637_v29 = vunpack.i.l.bf16 %v7636_v63  ;;  %7057 = vmatprep.subr.bf16.mxu0 %v10458_v7 }
 0x71d   :  { %v4064_v17 = vsel %vm2531_vm5, %v10449_v23, %v7637_v29  ;;  %v4065_v36 = vsel %vm2531_vm5, %v10452_v38, %v7638_v39 }
 0x71e   :  { %v7646_v25 = vpop.permute.xlu0 %7645  ;;  %v4071_v41 = vpack.c.bf16 %v4065_v36, %v4064_v17  ;;  %7058 = vmatpush3.bf16.msra.mxu0 %v10463_v46 }
 0x71f   :  { %v7648_v21 = vunpack.i.h.bf16 %v7646_v25  ;;  %v7647_v62 = vunpack.i.l.bf16 %v7646_v25 }
 0x720   :  { %4442 = vmatprep.mubr.bf16.mxu1 %v4071_v41 }
 0x721   :  { %4443 = vmatmul.mubr.bf16.vlgmr.msra.gmra.mrb[204].mxu1 %v4070_v45  ;;  %v4058_v24 = vsel %vm2531_vm5, %v10307_v15, %v7647_v62  ;;  %v4059_v61 = vsel %vm2531_vm5, %v10315_v2, %v7648_v21  ;;  %v7834_v2 = vld [vmem:[%s11148_s6 + $0x50] ss:$8 sps:$4 sm:$0xff]  }
 0x722   :  { %7022 = vmatpush3.bf16.msra.mxu1 %v10230_v33  ;;  %v7656_v59 = vpop.permute.xlu0 %7655  ;;  %v4074_v27 = vpack.c.bf16 %v4059_v61, %v4058_v24  ;;  %v7821_v33 = vld [vmem:[%s11148_s6 + $0x4] ss:$8 sps:$4 sm:$0xff]   ;;  %v7852_v45 = vld [vmem:[%s11148_s6 + $0xb0] ss:$8 sps:$4 sm:$0xff]  }
 0x723   :  { %v7658_v23 = vunpack.i.h.bf16 %v7656_v59  ;;  %v7657_v38 = vunpack.i.l.bf16 %v7656_v59  ;;  %7023 = vmatprep.subr.bf16.mxu1 %v10245_v11  ;;  %v7819_v11 = vld [vmem:[%s11148_s6] ss:$8 sps:$4 sm:$0xff]   ;;  %5599 = vmatprep.subr.bf16.mxu0 %v7821_v33 }
 0x724   :  { %4527 = vmatprep.mubr.bf16.mxu1 %v4074_v27 }
 0x725   :  { %v4066_v7 = vsel %vm2531_vm5, %v10434_v58, %v7657_v38  ;;  %v4067_v46 = vsel %vm2531_vm5, %v10440_v9, %v7658_v23  ;;  %v7839_v9 = vld [vmem:[%s11148_s6 + $0x64] ss:$8 sps:$4 sm:$0xff]  }
 0x726   :  { %7024 = vmatpush3.bf16.msra.mxu1 %v10250_v51  ;;  %v4076_v15 = vpack.c.bf16 %v4067_v46, %v4066_v7  ;;  %v7822_v51 = vld [vmem:[%s11148_s6 + $0x10] ss:$8 sps:$4 sm:$0xff]  }
 0x727   :  { %7025 = vmatprep.subr.bf16.mxu1 %v10257_v26  ;;  %v7827_v26 = vld [vmem:[%s11148_s6 + $0x24] ss:$8 sps:$4 sm:$0xff]  }
 0x728   :  { %4568 = vmatprep.mubr.bf16.mxu0 %v4076_v15 }
 0x729   :  { %4569 = vmatmul.mubr.bf16.vlgmr.msra.gmra.mrb[212].mxu0 %v4075_v53 }
 0x72a   :  { %7026 = vmatpush3.bf16.msra.mxu1 %v10262_v14  ;;  %5600 = vmatpush1.bf16.msra.mxu0 %v7819_v11  ;;  %v7825_v14 = vld [vmem:[%s11148_s6 + $0x20] ss:$8 sps:$4 sm:$0xff]  }
 0x72b   :  { %7027 = vmatprep.subr.bf16.mxu1 %v10269_v0  ;;  %v7830_v0 = vld [vmem:[%s11148_s6 + $0x34] ss:$8 sps:$4 sm:$0xff]  }
 0x72e   :  { %7028 = vmatpush3.bf16.msra.mxu1 %v10280_v56  ;;  %v7828_v56 = vld [vmem:[%s11148_s6 + $0x30] ss:$8 sps:$4 sm:$0xff]  }
 0x72f   :  { %7029 = vmatprep.subr.bf16.mxu1 %v10286_v47  ;;  %v7833_v47 = vld [vmem:[%s11148_s6 + $0x44] ss:$8 sps:$4 sm:$0xff]  }
 0x732   :  { %7030 = vmatpush3.bf16.msra.mxu1 %v10292_v31  ;;  %v7831_v31 = vld [vmem:[%s11148_s6 + $0x40] ss:$8 sps:$4 sm:$0xff]  }
 0x733   :  { %7031 = vmatprep.subr.bf16.mxu1 %v10298_v16 }
 0x736   :  { %7032 = vmatpush3.bf16.msra.mxu1 %v10305_v20  ;;  %v7836_v20 = vld [vmem:[%s11148_s6 + $0x54] ss:$8 sps:$4 sm:$0xff]  }
 0x737   :  { %7033 = vmatprep.subr.bf16.mxu1 %v10313_v35 }
 0x73a   :  { %7034 = vmatpush3.bf16.msra.mxu1 %v10321_v4 }
 0x73b   :  { %7035 = vmatprep.subr.bf16.mxu1 %v10332_v49 }
 0x73e   :  { %7036 = vmatpush3.bf16.msra.mxu1 %v10337_v18 }
 0x73f   :  { %7418 = vmatprep.subr.bf16.mxu1 %v11170_v22 }
 0x741   :  { %4528 = vmatmul.mubr.bf16.vlgmr.msra.gmra.mrb[208].mxu1 %v4073_v3  ;;  %v7861_v3 = vld [vmem:[%s11148_s6 + $0xe0] ss:$8 sps:$4 sm:$0xff]  }
 0x742   :  { %7419 = vmatpush3.bf16.msra.mxu1 %v10491_v44  ;;  %7426 = vmatprep.mubr.msk.bf16.mxu1 %vm8102_vm2, %v11170_v22  ;;  %vm4620_vm2 = vcmask 1040384  }
 0x743   :  { %7420 = vmatprep.subr.bf16.mxu1 %v11170_v22 }
 0x746   :  { %7421 = vmatpush3.bf16.msra.mxu1 %v10497_v5  ;;  %v7848_v5 = vld [vmem:[%s11148_s6 + $0x94] ss:$8 sps:$4 sm:$0xff]  }
 0x747   :  { %7422 = vmatprep.subr.bf16.mxu1 %v11170_v22 }
 0x74a   :  { %7423 = vmatpush3.bf16.msra.mxu1 %v10506_v13 }
 0x74b   :  { %7424 = vmatprep.subr.bf16.mxu1 %v11170_v22  ;;  %v7824_v22 = vld [vmem:[%s11148_s6 + $0x14] ss:$8 sps:$4 sm:$0xff]  }
 0x74c   :  { %5601 = vmatprep.subr.bf16.mxu0 %v7824_v22 }
 0x74d   :  { %5602 = vmatpush1.bf16.msra.mxu0 %v7822_v51 }
 0x74e   :  { %7425 = vmatpush3.bf16.msra.mxu1 %v10513_v52  ;;  %5603 = vmatprep.subr.bf16.mxu0 %v7827_v26  ;;  %v7846_v52 = vld [vmem:[%s11148_s6 + $0x90] ss:$8 sps:$4 sm:$0xff]  }
 0x74f   :  { %5804 = vmatprep.subr.bf16.mxu1 %v7821_v33 }
 0x751   :  { %7427 = vmatmul.mubr.msk.bf16.vlgmr.msra.gmra.mrb[212].mxu1 %vm2531_vm5, %v4077_v50  ;;  %5604 = vmatpush1.bf16.msra.mxu0 %v7825_v14  ;;  %v7840_v50 = vld [vmem:[%s11148_s6 + $0x70] ss:$8 sps:$4 sm:$0xff]  }
 0x752   :  { %5805 = vmatpush1.bf16.msra.mxu1 %v7819_v11  ;;  %5605 = vmatprep.subr.bf16.mxu0 %v7830_v0 }
 0x753   :  { %5806 = vmatprep.subr.bf16.mxu1 %v7824_v22 }
 0x755   :  { %5606 = vmatpush1.bf16.msra.mxu0 %v7828_v56 }
 0x756   :  { %5807 = vmatpush1.bf16.msra.mxu1 %v7822_v51  ;;  %5607 = vmatprep.subr.bf16.mxu0 %v7833_v47 }
 0x757   :  { %5808 = vmatprep.subr.bf16.mxu1 %v7827_v26 }
 0x759   :  { %5608 = vmatpush1.bf16.msra.mxu0 %v7831_v31 }
 0x75a   :  { %5809 = vmatpush1.bf16.msra.mxu1 %v7825_v14  ;;  %5609 = vmatprep.subr.bf16.mxu0 %v7836_v20 }
 0x75b   :  { %5810 = vmatprep.subr.bf16.mxu1 %v7830_v0 }
 0x75d   :  { %5610 = vmatpush1.bf16.msra.mxu0 %v7834_v2 }
 0x75e   :  { %5811 = vmatpush1.bf16.msra.mxu1 %v7828_v56  ;;  %5611 = vmatprep.subr.bf16.mxu0 %v7839_v9 }
 0x75f   :  { %5812 = vmatprep.subr.bf16.mxu1 %v7833_v47 }
 0x761   :  { %5612 = vmatpush1.bf16.msra.mxu0 %v7837_v12 }
 0x762   :  { %5813 = vmatpush1.bf16.msra.mxu1 %v7831_v31  ;;  %5613 = vmatprep.subr.bf16.mxu0 %v7842_v57 }
 0x763   :  { %5814 = vmatprep.subr.bf16.mxu1 %v7836_v20 }
 0x765   :  { %5614 = vmatpush1.bf16.msra.mxu0 %v7840_v50 }
 0x766   :  { %5815 = vmatpush1.bf16.msra.mxu1 %v7834_v2  ;;  %5615 = vmatprep.subr.bf16.mxu0 %v7845_v43 }
 0x767   :  { %5816 = vmatprep.subr.bf16.mxu1 %v7839_v9 }
 0x769   :  { %5616 = vmatpush1.bf16.msra.mxu0 %v7843_v34 }
 0x76a   :  { %5817 = vmatpush1.bf16.msra.mxu1 %v7837_v12  ;;  %5617 = vmatprep.subr.bf16.mxu0 %v7848_v5 }
 0x76b   :  { %5818 = vmatprep.subr.bf16.mxu1 %v7842_v57 }
 0x76d   :  { %5618 = vmatpush1.bf16.msra.mxu0 %v7846_v52 }
 0x76e   :  { %5819 = vmatpush1.bf16.msra.mxu1 %v7840_v50  ;;  %5619 = vmatprep.subr.bf16.mxu0 %v7851_v6 }
 0x76f   :  { %5820 = vmatprep.subr.bf16.mxu1 %v7845_v43 }
 0x771   :  { %5620 = vmatpush1.bf16.msra.mxu0 %v7849_v60 }
 0x772   :  { %5821 = vmatpush1.bf16.msra.mxu1 %v7843_v34  ;;  %5621 = vmatprep.subr.bf16.mxu0 %v7854_v37 }
 0x773   :  { %5822 = vmatprep.subr.bf16.mxu1 %v7848_v5 }
 0x775   :  { %5622 = vmatpush1.bf16.msra.mxu0 %v7852_v45 }
 0x776   :  { %5823 = vmatpush1.bf16.msra.mxu1 %v7846_v52  ;;  %5623 = vmatprep.subr.bf16.mxu0 %v7857_v1 }
 0x777   :  { %5824 = vmatprep.subr.bf16.mxu1 %v7851_v6 }
 0x779   :  { %5624 = vmatpush1.bf16.msra.mxu0 %v7855_v28 }
 0x77a   :  { %5825 = vmatpush1.bf16.msra.mxu1 %v7849_v60  ;;  %5625 = vmatprep.subr.bf16.mxu0 %v7860_v19 }
 0x77b   :  { %5826 = vmatprep.subr.bf16.mxu1 %v7854_v37 }
 0x77d   :  { %5626 = vmatpush1.bf16.msra.mxu0 %v7858_v30 }
 0x77e   :  { %5827 = vmatpush1.bf16.msra.mxu1 %v7852_v45  ;;  %5627 = vmatprep.subr.bf16.mxu0 %v7863_v55 }
 0x77f   :  { %5828 = vmatprep.subr.bf16.mxu1 %v7857_v1 }
 0x781   :  { %5628 = vmatpush1.bf16.msra.mxu0 %v7861_v3 }
 0x782   :  { %5829 = vmatpush1.bf16.msra.mxu1 %v7855_v28  ;;  %5629 = vmatprep.subr.bf16.mxu0 %v7866_v48 }
 0x783   :  { %5830 = vmatprep.subr.bf16.mxu1 %v7860_v19 }
 0x785   :  { %5630 = vmatpush1.bf16.msra.mxu0 %v7864_v40 }
 0x786   :  { %5831 = vmatpush1.bf16.msra.mxu1 %v7858_v30  ;;  %5640 = vmatprep.subr.bf16.mxu0 %v7869_v8 }
 0x787   :  { %5832 = vmatprep.subr.bf16.mxu1 %v7863_v55 }
 0x78a   :  { %5833 = vmatpush1.bf16.msra.mxu1 %v7861_v3 }
 0x78b   :  { %5834 = vmatprep.subr.bf16.mxu1 %v7866_v48 }
 0x78e   :  { %5835 = vmatpush1.bf16.msra.mxu1 %v7864_v40 }
 0x78f   :  { %5845 = vmatprep.subr.bf16.mxu1 %v7869_v8 }
 0x7c4   :  { %v6988_v16 = vpop.f32.mrb[204].mxu0 }
 0x7c5   :  { %v6989_v35 = vpop.f32.mrb[205].mxu0 }
 0x7c6   :  { %v10623_v4 = vadd.f32 %v6989_v35, %v6988_v16  ;;  %v6991_v49 = vpop.f32.mrb[206].mxu0 }
 0x7c7   :  { %v6992_v18 = vpop.f32.mrb[207].mxu0 }
 0x7c8   :  { %v10625_v58 = vadd.f32 %v6992_v18, %v6991_v49 }
 0x7d4   :  { %v4485_v44 = vpop.f32.mrb[208].mxu0 }
 0x7d5   :  { %v7416_v13 = vpop.f32.mrb[209].mxu0 }
 0x7d6   :  { %v4488_v54 = vpop.f32.mrb[210].mxu0 }
 0x7d7   :  { %v7417_v10 = vpop.f32.mrb[211].mxu0 }
 0x7f4   :  { %v7010_v32 = vpop.f32.mrb[204].mxu1 }
 0x7f5   :  { %v7011_v42 = vpop.f32.mrb[205].mxu1 }
 0x7f6   :  { %v7012_v53 = vadd.f32 %v7011_v42, %v7010_v32  ;;  %v7013_v63 = vpop.f32.mrb[206].mxu1 }
 0x7f7   :  { %v7014_v39 = vpop.f32.mrb[207].mxu1 }
 0x7f8   :  { %v7015_v29 = vadd.f32 %v7014_v39, %v7013_v63  ;;  %v4445_v17 = vadd.f32 %v7012_v53, %v10623_v4 }
 0x7fa   :  { %v4486_v36 = vadd.f32 %v4485_v44, %v4445_v17  ;;  %v4448_v25 = vadd.f32 %v7015_v29, %v10625_v58 }
 0x7fc   :  { %v4489_v41 = vadd.f32 %v4488_v54, %v4448_v25  ;;  %v7059_v21 = vpop.f32.mrb[212].mxu0 }
 0x7fd   :  { %v7060_v62 = vpop.f32.mrb[213].mxu0 }
 0x7fe   :  { %v4621_v24 = vsel %vm4620_vm2, %v4489_v41, 0.0  ;;  %v7061_v61 = vadd.f32 %v7060_v62, %v7059_v21  ;;  %v7062_v59 = vpop.f32.mrb[214].mxu0 }
 0x7ff   :  { %v4622_v27 = vadd.f32 %v4621_v24, %v4486_v36  ;;  %v7063_v23 = vpop.f32.mrb[215].mxu0 }
 0x800   :  { %v7064_v38 = vadd.f32 %v7063_v23, %v7062_v59 }
 0x801   :  { %v4623_v14 = vrot.slane %v4622_v27, 4 }
 0x803   :  { %v4624_v0 = vadd.f32 %v4623_v14, %v4622_v27  ;;  %v4618_v27 = vld [vmem:[%s11151_s9 + $0x4] ss:$0 sm:$0xff] }
 0x805   :  { %v4625_v2 = vrot.slane %v4624_v0, 2 }
 0x807   :  { %v4626_v18 = vadd.f32 %v4625_v2, %v4624_v0 }
 0x809   :  { %v4627_v12 = vrot.slane %v4626_v18, 1 }
 0x80b   :  { %v4628_v43 = vadd.f32 %v4627_v12, %v4626_v18 }
 0x80d   :  { %v4638_v5 = vmul.f32 0.11111111, %v4628_v43  ;;  %v7872_v43 = vld [vmem:[%s11148_s6 + $0x114] ss:$8 sps:$4 sm:$0xff]  }
 0x814   :  { %v7037_v7 = vpop.f32.mrb[208].mxu1 }
 0x815   :  { %v7038_v46 = vpop.f32.mrb[209].mxu1 }
 0x816   :  { %v7039_v15 = vadd.f32 %v7038_v46, %v7037_v7  ;;  %v7040_v33 = vpop.f32.mrb[210].mxu1  ;;  %v4619_v7 = vld [vmem:[%s11151_s9 + $0x5] ss:$0 sm:$0xff] }
 0x817   :  { %v7041_v11 = vpop.f32.mrb[211].mxu1 }
 0x818   :  { %v7042_v22 = vadd.f32 %v7041_v11, %v7040_v33  ;;  %v4571_v51 = vadd.f32 %v7061_v61, %v7039_v15 }
 0x81a   :  { %v4574_v26 = vadd.f32 %v7064_v38, %v7042_v22  ;;  %v4686_v22 = vstv %s6636_s30 }
 0x824   :  { %v4611_v56 = vpop.f32.mrb[212].mxu1 }
 0x825   :  { %v4612_v47 = vadd.f32 %v4611_v56, %v4571_v51  ;;  %v7428_v31 = vpop.f32.mrb[213].mxu1 }
 0x826   :  { %v4614_v16 = vpop.f32.mrb[214].mxu1 }
 0x827   :  { %v4615_v20 = vadd.f32 %v4614_v16, %v4574_v26  ;;  %v7429_v35 = vpop.f32.mrb[215].mxu1 }
 0x829   :  { %v4629_v4 = vsel %vm4620_vm2, %v4615_v20, 0.0 }
 0x82a   :  { %v4630_v49 = vadd.f32 %v4629_v4, %v4612_v47 }
 0x82c   :  { %v4631_v58 = vrot.slane %v4630_v49, 4 }
 0x82e   :  { %v4632_v9 = vadd.f32 %v4631_v58, %v4630_v49 }
 0x830   :  { %v4633_v57 = vrot.slane %v4632_v9, 2 }
 0x832   :  { %v4634_v50 = vadd.f32 %v4633_v57, %v4632_v9  ;;  %v7867_v9 = vld [vmem:[%s11148_s6 + $0x100] ss:$8 sps:$4 sm:$0xff]  }
 0x834   :  { %v4635_v34 = vrot.slane %v4634_v50, 1 }
 0x836   :  { %v4636_v44 = vadd.f32 %v4635_v34, %v4634_v50  ;;  %v7870_v34 = vld [vmem:[%s11148_s6 + $0x110] ss:$8 sps:$4 sm:$0xff]  }
 0x838   :  { %v4639_v13 = vmul.f32 0.11111111, %v4636_v44  ;;  %v7875_v44 = vld [vmem:[%s11148_s6 + $0x124] ss:$8 sps:$4 sm:$0xff]  }
 0x83a   :  { %v4640_v52 = vadd.f32 %v4639_v13, %v4638_v5  ;;  %v7873_v5 = vld [vmem:[%s11148_s6 + $0x120] ss:$8 sps:$4 sm:$0xff]   ;;  %v7878_v13 = vld [vmem:[%s11148_s6 + $0x134] ss:$8 sps:$4 sm:$0xff]  }
 0x83c   :  { %v4641_v54 = vmul.f32 0.5, %v4640_v52  ;;  %v7876_v52 = vld [vmem:[%s11148_s6 + $0x130] ss:$8 sps:$4 sm:$0xff]  }
 0x83e   :  { %v4642_v10 = vsub.f32 %v4486_v36, %v4641_v54  ;;  %v4643_v6 = vsub.f32 %v4489_v41, %v4641_v54  ;;  %v4644_v60 = vsub.f32 %v4612_v47, %v4641_v54  ;;  %v4645_v37 = vsub.f32 %v4615_v20, %v4641_v54  ;;  %v7881_v54 = vld [vmem:[%s11148_s6 + $0x144] ss:$8 sps:$4 sm:$0xff]  }
 0x840   :  { %v4646_v45 = vmul.f32 %v4642_v10, %v4642_v10  ;;  %v4647_v1 = vmul.f32 %v4643_v6, %v4643_v6  ;;  %v4648_v28 = vmul.f32 %v4644_v60, %v4644_v60  ;;  %v4649_v19 = vmul.f32 %v4645_v37, %v4645_v37 }
 0x842   :  { %v4650_v30 = vsel %vm4620_vm2, %v4647_v1, 0.0  ;;  %v4658_v55 = vsel %vm4620_vm2, %v4649_v19, 0.0  ;;  %v7890_v1 = vld [vmem:[%s11148_s6 + $0x174] ss:$8 sps:$4 sm:$0xff]   ;;  %v7893_v19 = vld [vmem:[%s11148_s6 + $0x184] ss:$8 sps:$4 sm:$0xff]  }
 0x843   :  { %v4651_v3 = vadd.f32 %v4650_v30, %v4646_v45  ;;  %v4659_v48 = vadd.f32 %v4658_v55, %v4648_v28  ;;  %v7885_v45 = vld [vmem:[%s11148_s6 + $0x160] ss:$8 sps:$4 sm:$0xff]   ;;  %v7888_v28 = vld [vmem:[%s11148_s6 + $0x170] ss:$8 sps:$4 sm:$0xff]   ;;  %v7896_v55 = vld [vmem:[%s11148_s6 + $0x194] ss:$8 sps:$4 sm:$0xff]  }
 0x844   :  { %v7891_v30 = vld [vmem:[%s11148_s6 + $0x180] ss:$8 sps:$4 sm:$0xff]  }
 0x845   :  { %v4652_v40 = vrot.slane %v4651_v3, 4  ;;  %v4660_v8 = vrot.slane %v4659_v48, 4 }
 0x847   :  { %v4653_v32 = vadd.f32 %v4652_v40, %v4651_v3  ;;  %v4661_v42 = vadd.f32 %v4660_v8, %v4659_v48  ;;  %v7894_v3 = vld [vmem:[%s11148_s6 + $0x190] ss:$8 sps:$4 sm:$0xff]   ;;  %v7899_v48 = vld [vmem:[%s11148_s6 + $0x1a4] ss:$8 sps:$4 sm:$0xff]   ;;  %v7897_v40 = vld [vmem:[%s11148_s6 + $0x1a0] ss:$8 sps:$4 sm:$0xff]  }
 0x848   :  { %v7902_v8 = vld [vmem:[%s11148_s6 + $0x1b4] ss:$8 sps:$4 sm:$0xff]  }
 0x849   :  { %v4654_v53 = vrot.slane %v4653_v32, 2  ;;  %v4662_v63 = vrot.slane %v4661_v42, 2 }
 0x84b   :  { %v4655_v39 = vadd.f32 %v4654_v53, %v4653_v32  ;;  %v4663_v29 = vadd.f32 %v4662_v63, %v4661_v42  ;;  %v7900_v32 = vld [vmem:[%s11148_s6 + $0x1b0] ss:$8 sps:$4 sm:$0xff]   ;;  %v7905_v42 = vld [vmem:[%s11148_s6 + $0x1c4] ss:$8 sps:$4 sm:$0xff]   ;;  %v7903_v53 = vld [vmem:[%s11148_s6 + $0x1c0] ss:$8 sps:$4 sm:$0xff]  }
 0x84c   :  { %v7908_v63 = vld [vmem:[%s11148_s6 + $0x1d4] ss:$8 sps:$4 sm:$0xff]  }
 0x84d   :  { %v4656_v17 = vrot.slane %v4655_v39, 1  ;;  %v4664_v36 = vrot.slane %v4663_v29, 1 }
 0x84f   :  { %v4657_v25 = vadd.f32 %v4656_v17, %v4655_v39  ;;  %v4665_v41 = vadd.f32 %v4664_v36, %v4663_v29  ;;  %v7906_v39 = vld [vmem:[%s11148_s6 + $0x1d0] ss:$8 sps:$4 sm:$0xff]   ;;  %v7911_v29 = vld [vmem:[%s11148_s6 + $0x1e4] ss:$8 sps:$4 sm:$0xff]   ;;  %v7909_v17 = vld [vmem:[%s11148_s6 + $0x1e0] ss:$8 sps:$4 sm:$0xff]  }
 0x850   :  { %v7914_v36 = vld [vmem:[%s11148_s6 + $0x1f4] ss:$8 sps:$4 sm:$0xff]  }
 0x851   :  { %v4666_v21 = vmul.f32 0.11111111, %v4657_v25  ;;  %v4667_v62 = vmul.f32 0.11111111, %v4665_v41  ;;  %v7912_v25 = vld [vmem:[%s11148_s6 + $0x1f0] ss:$8 sps:$4 sm:$0xff]  }
 0x852   :  { %v7917_v41 = vld [vmem:[%s11148_s6 + $0x204] ss:$8 sps:$4 sm:$0xff]  }
 0x853   :  { %v4668_v24 = vadd.f32 %v4667_v62, %v4666_v21  ;;  %v7915_v21 = vld [vmem:[%s11148_s6 + $0x200] ss:$8 sps:$4 sm:$0xff]  }
 0x855   :  { %v4669_v61 = vmul.f32 0.5, %v4668_v24 }
 0x857   :  { %v4670_v59 = vadd.f32 1e-05, %v4669_v61 }
 0x859   :  { %8055 = vrsqrt.f32 %v4670_v59  ;;  %v7920_v59 = vld [vmem:[%s11148_s6 + $0x214] ss:$8 sps:$4 sm:$0xff]  }
 0x863   :  { %v8056_v23 = vpop.eup %8055 }
 0x864   :  { %v4672_v38 = vmul.f32 %v8056_v23, %v4618_v27  ;;  %v7918_v23 = vld [vmem:[%s11148_s6 + $0x210] ss:$8 sps:$4 sm:$0xff]  }
 0x866   :  { %v4673_v46 = vmul.f32 %v4672_v38, %v4642_v10  ;;  %v4674_v15 = vmul.f32 %v4672_v38, %v4643_v6  ;;  %v4675_v33 = vmul.f32 %v4672_v38, %v4644_v60  ;;  %v4676_v11 = vmul.f32 %v4672_v38, %v4645_v37  ;;  %v7879_v10 = vld [vmem:[%s11148_s6 + $0x140] ss:$8 sps:$4 sm:$0xff]   ;;  %v7884_v6 = vld [vmem:[%s11148_s6 + $0x154] ss:$8 sps:$4 sm:$0xff]   ;;  %v7882_v60 = vld [vmem:[%s11148_s6 + $0x150] ss:$8 sps:$4 sm:$0xff]  }
 0x867   :  { %v7887_v37 = vld [vmem:[%s11148_s6 + $0x164] ss:$8 sps:$4 sm:$0xff]  }
 0x868   :  { %v4677_v51 = vadd.f32 %v4673_v46, %v4619_v7  ;;  %v4678_v26 = vadd.f32 %v4674_v15, %v4619_v7  ;;  %v4679_v14 = vadd.f32 %v4675_v33, %v4619_v7  ;;  %v4680_v0 = vadd.f32 %v4676_v11, %v4619_v7  ;;  %v7923_v38 = vld [vmem:[%s11148_s6 + $0x224] ss:$8 sps:$4 sm:$0xff]   ;;  %v7921_v7 = vld [vmem:[%s11148_s6 + $0x220] ss:$8 sps:$4 sm:$0xff]   ;;  %v7926_v46 = vld [vmem:[%s11148_s6 + $0x234] ss:$8 sps:$4 sm:$0xff]  }
 0x869   :  { %v7924_v15 = vld [vmem:[%s11148_s6 + $0x230] ss:$8 sps:$4 sm:$0xff]   ;;  %v7929_v33 = vld [vmem:[%s11148_s6 + $0x244] ss:$8 sps:$4 sm:$0xff]   ;;  %v7927_v11 = vld [vmem:[%s11148_s6 + $0x240] ss:$8 sps:$4 sm:$0xff]  }
 0x86a   :  { %vm4682_vm5 = vcmp.gt.f32.partialorder %v4677_v51, 0.0  ;;  %vm4683_vm0 = vcmp.gt.f32.partialorder %v4678_v26, 0.0  ;;  %vm4684_vm4 = vcmp.gt.f32.partialorder %v4679_v14, 0.0  ;;  %vm4685_vm1 = vcmp.gt.f32.partialorder %v4680_v0, 0.0 }
 0x86b   :  { %v4687_v56 = vmul.f32 %v4686_v22, %v4677_v51  ;;  %v4688_v47 = vmul.f32 %v4686_v22, %v4678_v26  ;;  %v4689_v31 = vmul.f32 %v4686_v22, %v4679_v14  ;;  %v4690_v16 = vmul.f32 %v4686_v22, %v4680_v0  ;;  %v7932_v22 = vld [vmem:[%s11148_s6 + $0x254] ss:$8 sps:$4 sm:$0xff]  }
 0x86d   :  { %v4691_v20 = vsel %vm4682_vm5, %v4677_v51, %v4687_v56  ;;  %v4692_v35 = vsel %vm4683_vm0, %v4678_v26, %v4688_v47  ;;  %v4693_v2 = vsel %vm4684_vm4, %v4679_v14, %v4689_v31  ;;  %v4694_v4 = vsel %vm4685_vm1, %v4680_v0, %v4690_v16  ;;  %v7930_v51 = vld [vmem:[%s11148_s6 + $0x250] ss:$8 sps:$4 sm:$0xff]   ;;  %v7935_v26 = vld [vmem:[%s11148_s6 + $0x264] ss:$8 sps:$4 sm:$0xff]   ;;  %v7933_v14 = vld [vmem:[%s11148_s6 + $0x260] ss:$8 sps:$4 sm:$0xff]  }
 0x86e   :  { %v10702_v49 = vpack.c.bf16 %v4692_v35, %v4691_v20  ;;  %v10704_v18 = vpack.c.bf16 %v4694_v4, %v4693_v2  ;;  %v7938_v0 = vld [vmem:[%s11148_s6 + $0x274] ss:$8 sps:$4 sm:$0xff]   ;;  %v7936_v56 = vld [vmem:[%s11148_s6 + $0x270] ss:$8 sps:$4 sm:$0xff]   ;;  %v7941_v47 = vld [vmem:[%s11148_s6 + $0x284] ss:$8 sps:$4 sm:$0xff]  }
 0x86f   :  { %v7939_v31 = vld [vmem:[%s11148_s6 + $0x280] ss:$8 sps:$4 sm:$0xff]   ;;  %v7944_v16 = vld [vmem:[%s11148_s6 + $0x294] ss:$8 sps:$4 sm:$0xff]   ;;  %v7942_v20 = vld [vmem:[%s11148_s6 + $0x290] ss:$8 sps:$4 sm:$0xff]  }
 0x870   :  { %v10707_v58 = vshrl.u32 %v10702_v49, 16  ;;  %v10713_v12 = vshrl.u32 %v10704_v18, 16  ;;  %v4707_v62 = vrot.slane %v10702_v49, 1  ;;  %v4708_v24 = vrot.slane %v10704_v18, 1  ;;  %v7947_v35 = vld [vmem:[%s11148_s6 + $0x2a4] ss:$8 sps:$4 sm:$0xff]  }
 0x871   :  { %v7945_v2 = vld [vmem:[%s11148_s6 + $0x2a0] ss:$8 sps:$4 sm:$0xff]   ;;  %v7950_v4 = vld [vmem:[%s11148_s6 + $0x2b4] ss:$8 sps:$4 sm:$0xff]  }
 0x872   :  { %5631 = vmatprep.mubr.bf16.mxu0 %v10707_v58  ;;  %5836 = vmatprep.mubr.bf16.mxu1 %v10713_v12  ;;  %v4711_v57 = vrot.slane %v10707_v58, 1  ;;  %v4712_v50 = vrot.slane %v10713_v12, 1  ;;  %v4719_v61 = vrot.slane %v10707_v58, 2  ;;  %v4720_v27 = vrot.slane %v10713_v12, 2 }
 0x873   :  { %5632 = vmatmul.mubr.bf16.vlgmr.msra.gmra.mrb[216].mxu0 %v10702_v49  ;;  %5837 = vmatmul.mubr.bf16.vlgmr.msra.gmra.mrb[216].mxu1 %v10704_v18 }
 0x874   :  { %5641 = vmatpush1.bf16.msra.mxu0 %v7867_v9  ;;  %5846 = vmatpush1.bf16.msra.mxu1 %v7867_v9  ;;  %v7948_v9 = vld [vmem:[%s11148_s6 + $0x2b0] ss:$8 sps:$4 sm:$0xff]  }
 0x875   :  { %5672 = vmatprep.mubr.bf16.mxu0 %v4711_v57  ;;  %5877 = vmatprep.mubr.bf16.mxu1 %v4712_v50  ;;  %v7953_v57 = vld [vmem:[%s11148_s6 + $0x2c4] ss:$8 sps:$4 sm:$0xff]   ;;  %v7951_v50 = vld [vmem:[%s11148_s6 + $0x2c0] ss:$8 sps:$4 sm:$0xff]  }
 0x876   :  { %5642 = vmatprep.subr.bf16.mxu0 %v7872_v43  ;;  %5847 = vmatprep.subr.bf16.mxu1 %v7872_v43  ;;  %v7956_v43 = vld [vmem:[%s11148_s6 + $0x2d4] ss:$8 sps:$4 sm:$0xff]  }
 0x878   :  { %5643 = vmatpush1.bf16.msra.mxu0 %v7870_v34  ;;  %5848 = vmatpush1.bf16.msra.mxu1 %v7870_v34  ;;  %v7954_v34 = vld [vmem:[%s11148_s6 + $0x2d0] ss:$8 sps:$4 sm:$0xff]  }
 0x879   :  { %5644 = vmatprep.subr.bf16.mxu0 %v7875_v44  ;;  %5849 = vmatprep.subr.bf16.mxu1 %v7875_v44  ;;  %v7959_v44 = vld [vmem:[%s11148_s6 + $0x2e4] ss:$8 sps:$4 sm:$0xff]  }
 0x87c   :  { %5645 = vmatpush1.bf16.msra.mxu0 %v7873_v5  ;;  %5850 = vmatpush1.bf16.msra.mxu1 %v7873_v5  ;;  %v7957_v5 = vld [vmem:[%s11148_s6 + $0x2e0] ss:$8 sps:$4 sm:$0xff]  }
 0x87d   :  { %5646 = vmatprep.subr.bf16.mxu0 %v7878_v13  ;;  %5851 = vmatprep.subr.bf16.mxu1 %v7878_v13  ;;  %v7962_v13 = vld [vmem:[%s11148_s6 + $0x2f4] ss:$8 sps:$4 sm:$0xff]  }
 0x880   :  { %5647 = vmatpush1.bf16.msra.mxu0 %v7876_v52  ;;  %5852 = vmatpush1.bf16.msra.mxu1 %v7876_v52  ;;  %v7960_v52 = vld [vmem:[%s11148_s6 + $0x2f0] ss:$8 sps:$4 sm:$0xff]  }
 0x881   :  { %5648 = vmatprep.subr.bf16.mxu0 %v7881_v54  ;;  %5853 = vmatprep.subr.bf16.mxu1 %v7881_v54  ;;  %v7965_v54 = vld [vmem:[%s11148_s6 + $0x304] ss:$8 sps:$4 sm:$0xff]  }
 0x884   :  { %5649 = vmatpush1.bf16.msra.mxu0 %v7879_v10  ;;  %5854 = vmatpush1.bf16.msra.mxu1 %v7879_v10  ;;  %v7963_v10 = vld [vmem:[%s11148_s6 + $0x300] ss:$8 sps:$4 sm:$0xff]  }
 0x885   :  { %5650 = vmatprep.subr.bf16.mxu0 %v7884_v6  ;;  %5855 = vmatprep.subr.bf16.mxu1 %v7884_v6  ;;  %v4715_v6 = vrot.slane %v10702_v49, 2 }
 0x888   :  { %5651 = vmatpush1.bf16.msra.mxu0 %v7882_v60  ;;  %5856 = vmatpush1.bf16.msra.mxu1 %v7882_v60  ;;  %v4716_v60 = vrot.slane %v10704_v18, 2 }
 0x889   :  { %5652 = vmatprep.subr.bf16.mxu0 %v7887_v37  ;;  %5857 = vmatprep.subr.bf16.mxu1 %v7887_v37  ;;  %v7968_v37 = vld [vmem:[%s11148_s6 + $0x314] ss:$8 sps:$4 sm:$0xff]  }
 0x88c   :  { %5653 = vmatpush1.bf16.msra.mxu0 %v7885_v45  ;;  %5858 = vmatpush1.bf16.msra.mxu1 %v7885_v45  ;;  %v4727_v45 = vrot.slane %v10707_v58, 3  ;;  %v7969_v58 = vld [vmem:[%s11148_s6 + $0x320] ss:$8 sps:$4 sm:$0xff]  }
 0x88d   :  { %5654 = vmatprep.subr.bf16.mxu0 %v7890_v1  ;;  %5859 = vmatprep.subr.bf16.mxu1 %v7890_v1  ;;  %v4728_v1 = vrot.slane %v10713_v12, 3  ;;  %v7974_v12 = vld [vmem:[%s11148_s6 + $0x334] ss:$8 sps:$4 sm:$0xff]  }
 0x890   :  { %5655 = vmatpush1.bf16.msra.mxu0 %v7888_v28  ;;  %5860 = vmatpush1.bf16.msra.mxu1 %v7888_v28  ;;  %v7966_v28 = vld [vmem:[%s11148_s6 + $0x310] ss:$8 sps:$4 sm:$0xff]  }
 0x891   :  { %5656 = vmatprep.subr.bf16.mxu0 %v7893_v19  ;;  %5861 = vmatprep.subr.bf16.mxu1 %v7893_v19  ;;  %v7971_v19 = vld [vmem:[%s11148_s6 + $0x324] ss:$8 sps:$4 sm:$0xff]  }
 0x894   :  { %5657 = vmatpush1.bf16.msra.mxu0 %v7891_v30  ;;  %5862 = vmatpush1.bf16.msra.mxu1 %v7891_v30  ;;  %v7972_v30 = vld [vmem:[%s11148_s6 + $0x330] ss:$8 sps:$4 sm:$0xff]  }
 0x895   :  { %5658 = vmatprep.subr.bf16.mxu0 %v7896_v55  ;;  %5863 = vmatprep.subr.bf16.mxu1 %v7896_v55  ;;  %v7977_v55 = vld [vmem:[%s11148_s6 + $0x344] ss:$8 sps:$4 sm:$0xff]  }
 0x898   :  { %5659 = vmatpush1.bf16.msra.mxu0 %v7894_v3  ;;  %5864 = vmatpush1.bf16.msra.mxu1 %v7894_v3  ;;  %v7975_v3 = vld [vmem:[%s11148_s6 + $0x340] ss:$8 sps:$4 sm:$0xff]  }
 0x899   :  { %5660 = vmatprep.subr.bf16.mxu0 %v7899_v48  ;;  %5865 = vmatprep.subr.bf16.mxu1 %v7899_v48  ;;  %v7980_v48 = vld [vmem:[%s11148_s6 + $0x354] ss:$8 sps:$4 sm:$0xff]  }
 0x89c   :  { %5661 = vmatpush1.bf16.msra.mxu0 %v7897_v40  ;;  %5866 = vmatpush1.bf16.msra.mxu1 %v7897_v40  ;;  %v7978_v40 = vld [vmem:[%s11148_s6 + $0x350] ss:$8 sps:$4 sm:$0xff]  }
 0x89d   :  { %5662 = vmatprep.subr.bf16.mxu0 %v7902_v8  ;;  %5867 = vmatprep.subr.bf16.mxu1 %v7902_v8  ;;  %v7983_v8 = vld [vmem:[%s11148_s6 + $0x364] ss:$8 sps:$4 sm:$0xff]  }
 0x8a0   :  { %5663 = vmatpush1.bf16.msra.mxu0 %v7900_v32  ;;  %5868 = vmatpush1.bf16.msra.mxu1 %v7900_v32  ;;  %v7981_v32 = vld [vmem:[%s11148_s6 + $0x360] ss:$8 sps:$4 sm:$0xff]  }
 0x8a1   :  { %5664 = vmatprep.subr.bf16.mxu0 %v7905_v42  ;;  %5869 = vmatprep.subr.bf16.mxu1 %v7905_v42  ;;  %v7986_v42 = vld [vmem:[%s11148_s6 + $0x374] ss:$8 sps:$4 sm:$0xff]  }
 0x8a4   :  { %5665 = vmatpush1.bf16.msra.mxu0 %v7903_v53  ;;  %5870 = vmatpush1.bf16.msra.mxu1 %v7903_v53  ;;  %v7984_v53 = vld [vmem:[%s11148_s6 + $0x370] ss:$8 sps:$4 sm:$0xff]  }
 0x8a5   :  { %5666 = vmatprep.subr.bf16.mxu0 %v7908_v63  ;;  %5871 = vmatprep.subr.bf16.mxu1 %v7908_v63  ;;  %v7989_v63 = vld [vmem:[%s11148_s6 + $0x384] ss:$8 sps:$4 sm:$0xff]  }
 0x8a8   :  { %5667 = vmatpush1.bf16.msra.mxu0 %v7906_v39  ;;  %5872 = vmatpush1.bf16.msra.mxu1 %v7906_v39  ;;  %v7987_v39 = vld [vmem:[%s11148_s6 + $0x380] ss:$8 sps:$4 sm:$0xff]  }
 0x8a9   :  { %5668 = vmatprep.subr.bf16.mxu0 %v7911_v29  ;;  %5873 = vmatprep.subr.bf16.mxu1 %v7911_v29  ;;  %v7992_v29 = vld [vmem:[%s11148_s6 + $0x394] ss:$8 sps:$4 sm:$0xff]  }
 0x8ac   :  { %5669 = vmatpush1.bf16.msra.mxu0 %v7909_v17  ;;  %5874 = vmatpush1.bf16.msra.mxu1 %v7909_v17  ;;  %v7990_v17 = vld [vmem:[%s11148_s6 + $0x390] ss:$8 sps:$4 sm:$0xff]  }
 0x8ad   :  { %5670 = vmatprep.subr.bf16.mxu0 %v7914_v36  ;;  %5875 = vmatprep.subr.bf16.mxu1 %v7914_v36  ;;  %v7995_v36 = vld [vmem:[%s11148_s6 + $0x3a4] ss:$8 sps:$4 sm:$0xff]  }
 0x8b0   :  { %5671 = vmatpush1.bf16.msra.mxu0 %v7912_v25  ;;  %5876 = vmatpush1.bf16.msra.mxu1 %v7912_v25  ;;  %v7993_v25 = vld [vmem:[%s11148_s6 + $0x3a0] ss:$8 sps:$4 sm:$0xff]  }
 0x8b1   :  { %5681 = vmatprep.subr.bf16.mxu0 %v7917_v41  ;;  %5886 = vmatprep.subr.bf16.mxu1 %v7917_v41  ;;  %v7998_v41 = vld [vmem:[%s11148_s6 + $0x3b4] ss:$8 sps:$4 sm:$0xff]  }
 0x8b3   :  { %5673 = vmatmul.mubr.bf16.vlgmr.msra.gmra.mrb[216].mxu0 %v4707_v62  ;;  %5878 = vmatmul.mubr.bf16.vlgmr.msra.gmra.mrb[216].mxu1 %v4708_v24  ;;  %v8001_v62 = vld [vmem:[%s11148_s6 + $0x3c4] ss:$8 sps:$4 sm:$0xff]   ;;  %v7999_v24 = vld [vmem:[%s11148_s6 + $0x3c0] ss:$8 sps:$4 sm:$0xff]  }
 0x8b4   :  { %5682 = vmatpush1.bf16.msra.mxu0 %v7915_v21  ;;  %5713 = vmatprep.mubr.bf16.mxu0 %v4719_v61  ;;  %v8004_v61 = vld [vmem:[%s11148_s6 + $0x3d4] ss:$8 sps:$4 sm:$0xff]  }
 0x8b5   :  { %5887 = vmatpush1.bf16.msra.mxu1 %v7915_v21  ;;  %5918 = vmatprep.mubr.bf16.mxu1 %v4720_v27  ;;  %v7996_v21 = vld [vmem:[%s11148_s6 + $0x3b0] ss:$8 sps:$4 sm:$0xff]   ;;  %v8007_v27 = vld [vmem:[%s11148_s6 + $0x3e4] ss:$8 sps:$4 sm:$0xff]  }
 0x8b6   :  { %5683 = vmatprep.subr.bf16.mxu0 %v7920_v59  ;;  %5888 = vmatprep.subr.bf16.mxu1 %v7920_v59  ;;  %v8002_v59 = vld [vmem:[%s11148_s6 + $0x3d0] ss:$8 sps:$4 sm:$0xff]  }
 0x8b8   :  { %5684 = vmatpush1.bf16.msra.mxu0 %v7918_v23 }
 0x8b9   :  { %5889 = vmatpush1.bf16.msra.mxu1 %v7918_v23  ;;  %5685 = vmatprep.subr.bf16.mxu0 %v7923_v38  ;;  %v8005_v23 = vld [vmem:[%s11148_s6 + $0x3e0] ss:$8 sps:$4 sm:$0xff]  }
 0x8ba   :  { %5890 = vmatprep.subr.bf16.mxu1 %v7923_v38  ;;  %v8010_v38 = vld [vmem:[%s11148_s6 + $0x3f4] ss:$8 sps:$4 sm:$0xff]  }
 0x8bc   :  { %5686 = vmatpush1.bf16.msra.mxu0 %v7921_v7 }
 0x8bd   :  { %5891 = vmatpush1.bf16.msra.mxu1 %v7921_v7  ;;  %5687 = vmatprep.subr.bf16.mxu0 %v7926_v46  ;;  %v8008_v7 = vld [vmem:[%s11148_s6 + $0x3f0] ss:$8 sps:$4 sm:$0xff]  }
 0x8be   :  { %5892 = vmatprep.subr.bf16.mxu1 %v7926_v46  ;;  %v8013_v46 = vld [vmem:[%s11148_s6 + $0x404] ss:$8 sps:$4 sm:$0xff]  }
 0x8c0   :  { %5688 = vmatpush1.bf16.msra.mxu0 %v7924_v15 }
 0x8c1   :  { %5893 = vmatpush1.bf16.msra.mxu1 %v7924_v15  ;;  %5689 = vmatprep.subr.bf16.mxu0 %v7929_v33  ;;  %v8011_v15 = vld [vmem:[%s11148_s6 + $0x400] ss:$8 sps:$4 sm:$0xff]  }
 0x8c2   :  { %5894 = vmatprep.subr.bf16.mxu1 %v7929_v33  ;;  %v4723_v33 = vrot.slane %v10702_v49, 3 }
 0x8c4   :  { %5690 = vmatpush1.bf16.msra.mxu0 %v7927_v11 }
 0x8c5   :  { %5895 = vmatpush1.bf16.msra.mxu1 %v7927_v11  ;;  %5691 = vmatprep.subr.bf16.mxu0 %v7932_v22  ;;  %v8016_v11 = vld [vmem:[%s11148_s6 + $0x414] ss:$8 sps:$4 sm:$0xff]  }
 0x8c6   :  { %5896 = vmatprep.subr.bf16.mxu1 %v7932_v22  ;;  %v4724_v22 = vrot.slane %v10704_v18, 3 }
 0x8c8   :  { %5692 = vmatpush1.bf16.msra.mxu0 %v7930_v51 }
 0x8c9   :  { %5897 = vmatpush1.bf16.msra.mxu1 %v7930_v51  ;;  %5693 = vmatprep.subr.bf16.mxu0 %v7935_v26  ;;  %v8014_v51 = vld [vmem:[%s11148_s6 + $0x410] ss:$8 sps:$4 sm:$0xff]  }
 0x8ca   :  { %5898 = vmatprep.subr.bf16.mxu1 %v7935_v26  ;;  %v8019_v26 = vld [vmem:[%s11148_s6 + $0x424] ss:$8 sps:$4 sm:$0xff]  }
 0x8cc   :  { %5694 = vmatpush1.bf16.msra.mxu0 %v7933_v14 }
 0x8cd   :  { %5899 = vmatpush1.bf16.msra.mxu1 %v7933_v14  ;;  %5695 = vmatprep.subr.bf16.mxu0 %v7938_v0  ;;  %v11197_v14 = vmov 0  }
 0x8ce   :  { %5900 = vmatprep.subr.bf16.mxu1 %v7938_v0  ;;  %v8017_v0 = vld [vmem:[%s11148_s6 + $0x420] ss:$8 sps:$4 sm:$0xff]  }
 0x8d0   :  { %5696 = vmatpush1.bf16.msra.mxu0 %v7936_v56 }
 0x8d1   :  { %5901 = vmatpush1.bf16.msra.mxu1 %v7936_v56  ;;  %5697 = vmatprep.subr.bf16.mxu0 %v7941_v47  ;;  %v8022_v56 = vld [vmem:[%s11148_s6 + $0x434] ss:$8 sps:$4 sm:$0xff]  }
 0x8d2   :  { %5902 = vmatprep.subr.bf16.mxu1 %v7941_v47  ;;  %v8020_v47 = vld [vmem:[%s11148_s6 + $0x430] ss:$8 sps:$4 sm:$0xff]  }
 0x8d4   :  { %5698 = vmatpush1.bf16.msra.mxu0 %v7939_v31 }
 0x8d5   :  { %5903 = vmatpush1.bf16.msra.mxu1 %v7939_v31  ;;  %5699 = vmatprep.subr.bf16.mxu0 %v7944_v16  ;;  %v8025_v31 = vld [vmem:[%s11148_s6 + $0x444] ss:$8 sps:$4 sm:$0xff]  }
 0x8d6   :  { %5904 = vmatprep.subr.bf16.mxu1 %v7944_v16  ;;  %v8023_v16 = vld [vmem:[%s11148_s6 + $0x440] ss:$8 sps:$4 sm:$0xff]  }
 0x8d8   :  { %5700 = vmatpush1.bf16.msra.mxu0 %v7942_v20 }
 0x8d9   :  { %5905 = vmatpush1.bf16.msra.mxu1 %v7942_v20  ;;  %5701 = vmatprep.subr.bf16.mxu0 %v7947_v35  ;;  %v8028_v20 = vld [vmem:[%s11148_s6 + $0x454] ss:$8 sps:$4 sm:$0xff]  }
 0x8da   :  { %5906 = vmatprep.subr.bf16.mxu1 %v7947_v35  ;;  %v8026_v35 = vld [vmem:[%s11148_s6 + $0x450] ss:$8 sps:$4 sm:$0xff]  }
 0x8dc   :  { %5702 = vmatpush1.bf16.msra.mxu0 %v7945_v2 }
 0x8dd   :  { %5907 = vmatpush1.bf16.msra.mxu1 %v7945_v2  ;;  %5703 = vmatprep.subr.bf16.mxu0 %v7950_v4  ;;  %v8031_v2 = vld [vmem:[%s11148_s6 + $0x464] ss:$8 sps:$4 sm:$0xff]  }
 0x8de   :  { %5908 = vmatprep.subr.bf16.mxu1 %v7950_v4  ;;  %v8029_v4 = vld [vmem:[%s11148_s6 + $0x460] ss:$8 sps:$4 sm:$0xff]  }
 0x8e0   :  { %5704 = vmatpush1.bf16.msra.mxu0 %v7948_v9 }
 0x8e1   :  { %5909 = vmatpush1.bf16.msra.mxu1 %v7948_v9  ;;  %5705 = vmatprep.subr.bf16.mxu0 %v7953_v57  ;;  %v8034_v9 = vld [vmem:[%s11148_s6 + $0x474] ss:$8 sps:$4 sm:$0xff]  }
 0x8e2   :  { %5910 = vmatprep.subr.bf16.mxu1 %v7953_v57  ;;  %v8032_v57 = vld [vmem:[%s11148_s6 + $0x470] ss:$8 sps:$4 sm:$0xff]  }
 0x8e4   :  { %5706 = vmatpush1.bf16.msra.mxu0 %v7951_v50 }
 0x8e5   :  { %5911 = vmatpush1.bf16.msra.mxu1 %v7951_v50  ;;  %5707 = vmatprep.subr.bf16.mxu0 %v7956_v43  ;;  %v4731_v50 = vrot.slane %v10702_v49, 4  ;;  %v8037_v49 = vld [vmem:[%s11149_s7 + $0x48] sm:$0xff]  }
 0x8e6   :  { %5912 = vmatprep.subr.bf16.mxu1 %v7956_v43  ;;  %v4732_v43 = vrot.slane %v10704_v18, 4  ;;  %v8038_v18 = vld [vmem:[%s11149_s7 + $0x8] sm:$0xff]  }
 0x8e8   :  { %5708 = vmatpush1.bf16.msra.mxu0 %v7954_v34 }
 0x8e9   :  { %5913 = vmatpush1.bf16.msra.mxu1 %v7954_v34  ;;  %5709 = vmatprep.subr.bf16.mxu0 %v7959_v44  ;;  %v8035_v34 = vld [vmem:[%s11149_s7 + $0x40] sm:$0xff]  }
 0x8ea   :  { %5914 = vmatprep.subr.bf16.mxu1 %v7959_v44  ;;  %v8036_v44 = vld [vmem:[%s11149_s7] sm:$0xff]  }
 0x8ec   :  { %5710 = vmatpush1.bf16.msra.mxu0 %v7957_v5 }
 0x8ed   :  { %5915 = vmatpush1.bf16.msra.mxu1 %v7957_v5  ;;  %5711 = vmatprep.subr.bf16.mxu0 %v7962_v13  ;;  %v8039_v5 = vld [vmem:[%s11149_s7 + $0x50] sm:$0xff]  }
 0x8ee   :  { %5916 = vmatprep.subr.bf16.mxu1 %v7962_v13  ;;  %v8040_v13 = vld [vmem:[%s11149_s7 + $0x10] sm:$0xff]  }
 0x8f0   :  { %5712 = vmatpush1.bf16.msra.mxu0 %v7960_v52 }
 0x8f1   :  { %5917 = vmatpush1.bf16.msra.mxu1 %v7960_v52  ;;  %5722 = vmatprep.subr.bf16.mxu0 %v7965_v54  ;;  %v8041_v52 = vld [vmem:[%s11149_s7 + $0x58] sm:$0xff]  }
 0x8f2   :  { %5927 = vmatprep.subr.bf16.mxu1 %v7965_v54  ;;  %v8042_v54 = vld [vmem:[%s11149_s7 + $0x18] sm:$0xff]  }
 0x8f3   :  { %5714 = vmatmul.mubr.bf16.vlgmr.msra.gmra.mrb[216].mxu0 %v4715_v6  ;;  %v8044_v6 = vld [vmem:[%s11149_s7 + $0x20] sm:$0xff]  }
 0x8f4   :  { %5919 = vmatmul.mubr.bf16.vlgmr.msra.gmra.mrb[216].mxu1 %v4716_v60  ;;  %5723 = vmatpush1.bf16.msra.mxu0 %v7963_v10  ;;  %v8045_v60 = vld [vmem:[%s11149_s7 + $0x68] sm:$0xff]  }
 0x8f5   :  { %5754 = vmatprep.mubr.bf16.mxu0 %v4727_v45  ;;  %5928 = vmatpush1.bf16.msra.mxu1 %v7963_v10  ;;  %v8043_v10 = vld [vmem:[%s11149_s7 + $0x60] sm:$0xff]   ;;  %v8047_v45 = vld [vmem:[%s11149_s7 + $0x70] sm:$0xff]  }
 0x8f6   :  { %5959 = vmatprep.mubr.bf16.mxu1 %v4728_v1  ;;  %5724 = vmatprep.subr.bf16.mxu0 %v7968_v37  ;;  %v8048_v1 = vld [vmem:[%s11149_s7 + $0x30] sm:$0xff]  }
 0x8f7   :  { %5929 = vmatprep.subr.bf16.mxu1 %v7968_v37  ;;  %v8046_v37 = vld [vmem:[%s11149_s7 + $0x28] sm:$0xff]  }
 0x8f8   :  { %5725 = vmatpush1.bf16.msra.mxu0 %v7966_v28 }
 0x8f9   :  { %5930 = vmatpush1.bf16.msra.mxu1 %v7966_v28  ;;  %5726 = vmatprep.subr.bf16.mxu0 %v7971_v19  ;;  %v8049_v28 = vld [vmem:[%s11149_s7 + $0x78] sm:$0xff]  }
 0x8fa   :  { %5931 = vmatprep.subr.bf16.mxu1 %v7971_v19  ;;  %v8050_v19 = vld [vmem:[%s11149_s7 + $0x38] sm:$0xff]  }
 0x8fc   :  { %5727 = vmatpush1.bf16.msra.mxu0 %v7969_v58 }
 0x8fd   :  { %5932 = vmatpush1.bf16.msra.mxu1 %v7969_v58  ;;  %5728 = vmatprep.subr.bf16.mxu0 %v7974_v12 }
 0x8fe   :  { %5933 = vmatprep.subr.bf16.mxu1 %v7974_v12 }
 0x900   :  { %5729 = vmatpush1.bf16.msra.mxu0 %v7972_v30 }
 0x901   :  { %5934 = vmatpush1.bf16.msra.mxu1 %v7972_v30  ;;  %5730 = vmatprep.subr.bf16.mxu0 %v7977_v55 }
 0x902   :  { %5935 = vmatprep.subr.bf16.mxu1 %v7977_v55 }
 0x904   :  { %5731 = vmatpush1.bf16.msra.mxu0 %v7975_v3 }
 0x905   :  { %5936 = vmatpush1.bf16.msra.mxu1 %v7975_v3  ;;  %5732 = vmatprep.subr.bf16.mxu0 %v7980_v48 }
 0x906   :  { %5937 = vmatprep.subr.bf16.mxu1 %v7980_v48 }
 0x908   :  { %5733 = vmatpush1.bf16.msra.mxu0 %v7978_v40 }
 0x909   :  { %5938 = vmatpush1.bf16.msra.mxu1 %v7978_v40  ;;  %5734 = vmatprep.subr.bf16.mxu0 %v7983_v8 }
 0x90a   :  { %5939 = vmatprep.subr.bf16.mxu1 %v7983_v8 }
 0x90c   :  { %5735 = vmatpush1.bf16.msra.mxu0 %v7981_v32 }
 0x90d   :  { %5940 = vmatpush1.bf16.msra.mxu1 %v7981_v32  ;;  %5736 = vmatprep.subr.bf16.mxu0 %v7986_v42 }
 0x90e   :  { %5941 = vmatprep.subr.bf16.mxu1 %v7986_v42 }
 0x910   :  { %5737 = vmatpush1.bf16.msra.mxu0 %v7984_v53 }
 0x911   :  { %5942 = vmatpush1.bf16.msra.mxu1 %v7984_v53  ;;  %5738 = vmatprep.subr.bf16.mxu0 %v7989_v63 }
 0x912   :  { %5943 = vmatprep.subr.bf16.mxu1 %v7989_v63 }
 0x914   :  { %5739 = vmatpush1.bf16.msra.mxu0 %v7987_v39 }
 0x915   :  { %5944 = vmatpush1.bf16.msra.mxu1 %v7987_v39  ;;  %5740 = vmatprep.subr.bf16.mxu0 %v7992_v29 }
 0x916   :  { %5945 = vmatprep.subr.bf16.mxu1 %v7992_v29 }
 0x918   :  { %5741 = vmatpush1.bf16.msra.mxu0 %v7990_v17 }
 0x919   :  { %5946 = vmatpush1.bf16.msra.mxu1 %v7990_v17  ;;  %5742 = vmatprep.subr.bf16.mxu0 %v7995_v36 }
 0x91a   :  { %5947 = vmatprep.subr.bf16.mxu1 %v7995_v36 }
 0x91c   :  { %5743 = vmatpush1.bf16.msra.mxu0 %v7993_v25 }
 0x91d   :  { %5948 = vmatpush1.bf16.msra.mxu1 %v7993_v25  ;;  %5744 = vmatprep.subr.bf16.mxu0 %v7998_v41 }
 0x91e   :  { %5949 = vmatprep.subr.bf16.mxu1 %v7998_v41 }
 0x920   :  { %5745 = vmatpush1.bf16.msra.mxu0 %v7996_v21 }
 0x921   :  { %5950 = vmatpush1.bf16.msra.mxu1 %v7996_v21  ;;  %5746 = vmatprep.subr.bf16.mxu0 %v8001_v62 }
 0x922   :  { %5951 = vmatprep.subr.bf16.mxu1 %v8001_v62 }
 0x924   :  { %5747 = vmatpush1.bf16.msra.mxu0 %v7999_v24 }
 0x925   :  { %5952 = vmatpush1.bf16.msra.mxu1 %v7999_v24  ;;  %5748 = vmatprep.subr.bf16.mxu0 %v8004_v61 }
 0x926   :  { %5953 = vmatprep.subr.bf16.mxu1 %v8004_v61 }
 0x928   :  { %5749 = vmatpush1.bf16.msra.mxu0 %v8002_v59 }
 0x929   :  { %5954 = vmatpush1.bf16.msra.mxu1 %v8002_v59  ;;  %5750 = vmatprep.subr.bf16.mxu0 %v8007_v27 }
 0x92a   :  { %5955 = vmatprep.subr.bf16.mxu1 %v8007_v27 }
 0x92c   :  { %5751 = vmatpush1.bf16.msra.mxu0 %v8005_v23 }
 0x92d   :  { %5956 = vmatpush1.bf16.msra.mxu1 %v8005_v23  ;;  %5752 = vmatprep.subr.bf16.mxu0 %v8010_v38 }
 0x92e   :  { %5957 = vmatprep.subr.bf16.mxu1 %v8010_v38 }
 0x930   :  { %5753 = vmatpush1.bf16.msra.mxu0 %v8008_v7 }
 0x931   :  { %5958 = vmatpush1.bf16.msra.mxu1 %v8008_v7  ;;  %5763 = vmatprep.subr.bf16.mxu0 %v8013_v46 }
 0x932   :  { %5968 = vmatprep.subr.bf16.mxu1 %v8013_v46 }
 0x933   :  { %5755 = vmatmul.mubr.bf16.vlgmr.msra.gmra.mrb[216].mxu0 %v4723_v33 }
 0x934   :  { %5960 = vmatmul.mubr.bf16.vlgmr.msra.gmra.mrb[216].mxu1 %v4724_v22  ;;  %5764 = vmatpush1.bf16.msra.mxu0 %v8011_v15 }
 0x935   :  { %5969 = vmatpush1.bf16.msra.mxu1 %v8011_v15  ;;  %5765 = vmatprep.subr.bf16.mxu0 %v8016_v11 }
 0x936   :  { %5970 = vmatprep.subr.bf16.mxu1 %v8016_v11  ;;  %5795 = vmatprep.mubr.bf16.mxu0 %v11197_v14 }
 0x937   :  { %6000 = vmatprep.mubr.bf16.mxu1 %v11197_v14  ;;  %v8107_v14 = vmov 1966171168  }
 0x938   :  { %5766 = vmatpush1.bf16.msra.mxu0 %v8014_v51 }
 0x939   :  { %5971 = vmatpush1.bf16.msra.mxu1 %v8014_v51  ;;  %5767 = vmatprep.subr.bf16.mxu0 %v8019_v26 }
 0x93a   :  { %5972 = vmatprep.subr.bf16.mxu1 %v8019_v26 }
 0x93c   :  { %5768 = vmatpush1.bf16.msra.mxu0 %v8017_v0 }
 0x93d   :  { %5973 = vmatpush1.bf16.msra.mxu1 %v8017_v0  ;;  %5769 = vmatprep.subr.bf16.mxu0 %v8022_v56  ;;  %v6053_v0 = vunpack.c.l.s4 %v8107_v14 }
 0x93e   :  { %5974 = vmatprep.subr.bf16.mxu1 %v8022_v56  ;;  %v6055_v56 = vlaneseq }
 0x940   :  { %5770 = vmatpush1.bf16.msra.mxu0 %v8020_v47 }
 0x941   :  { %5975 = vmatpush1.bf16.msra.mxu1 %v8020_v47  ;;  %5771 = vmatprep.subr.bf16.mxu0 %v8025_v31  ;;  %v6054_v47 = vunpack.c.0.s8 %v6053_v0 }
 0x942   :  { %5976 = vmatprep.subr.bf16.mxu1 %v8025_v31  ;;  %v6056_v31 = vshrl.u32 %v6055_v56, 7 }
 0x944   :  { %5772 = vmatpush1.bf16.msra.mxu0 %v8023_v16 }
 0x945   :  { %5977 = vmatpush1.bf16.msra.mxu1 %v8023_v16  ;;  %5773 = vmatprep.subr.bf16.mxu0 %v8028_v20 }
 0x946   :  { %5978 = vmatprep.subr.bf16.mxu1 %v8028_v20  ;;  %v6057_v20 = vsub.s32 %v6054_v47, %v6056_v31 }
 0x948   :  { %5774 = vmatpush1.bf16.msra.mxu0 %v8026_v35 }
 0x949   :  { %5979 = vmatpush1.bf16.msra.mxu1 %v8026_v35  ;;  %5775 = vmatprep.subr.bf16.mxu0 %v8031_v2 }
 0x94a   :  { %5980 = vmatprep.subr.bf16.mxu1 %v8031_v2 }
 0x94c   :  { %5776 = vmatpush1.bf16.msra.mxu0 %v8029_v4 }
 0x94d   :  { %5981 = vmatpush1.bf16.msra.mxu1 %v8029_v4  ;;  %5777 = vmatprep.subr.bf16.mxu0 %v8034_v9 }
 0x94e   :  { %5982 = vmatprep.subr.bf16.mxu1 %v8034_v9  ;;  %v6781_v9 = vld [vmem:[%s11151_s9 + $0x6] ss:$8 sm:$0x3] }
 0x950   :  { %5778 = vmatpush1.bf16.msra.mxu0 %v8032_v57 }
 0x951   :  { %5983 = vmatpush1.bf16.msra.mxu1 %v8032_v57  ;;  %7070 = vmatprep.subr.bf16.mxu0 %v8035_v34 }
 0x952   :  { %7092 = vmatprep.subr.bf16.mxu1 %v8035_v34  ;;  %v6782_v34 = vld [vmem:[%s11151_s9 + $0x7] ss:$8 sm:$0x3] }
 0x953   :  { %5796 = vmatmul.mubr.bf16.vlgmr.msra.gmra.mrb[216].mxu0 %v4731_v50  ;;  %v6071_v50 = vsub.s32 0, %v6056_v31 }
 0x954   :  { %6001 = vmatmul.mubr.bf16.vlgmr.msra.gmra.mrb[216].mxu1 %v4732_v43  ;;  %7071 = vmatpush3.bf16.msra.mxu0 %v8036_v44  ;;  %v6075_v43 = vsub.s32 1, %v6056_v31 }
 0x955   :  { %7093 = vmatpush3.bf16.msra.mxu1 %v8036_v44  ;;  %7072 = vmatprep.subr.bf16.mxu0 %v8037_v49 }
 0x956   :  { %7094 = vmatprep.subr.bf16.mxu1 %v8037_v49 }
 0x958   :  { %7073 = vmatpush3.bf16.msra.mxu0 %v8038_v18 }
 0x959   :  { %7095 = vmatpush3.bf16.msra.mxu1 %v8038_v18  ;;  %7074 = vmatprep.subr.bf16.mxu0 %v8039_v5 }
 0x95a   :  { %7096 = vmatprep.subr.bf16.mxu1 %v8039_v5  ;;  %v6087_v5 = vrot.slane %v6782_v34, %v6071_v50 }
 0x95c   :  { %7075 = vmatpush3.bf16.msra.mxu0 %v8040_v13 }
 0x95d   :  { %7097 = vmatpush3.bf16.msra.mxu1 %v8040_v13  ;;  %7076 = vmatprep.subr.bf16.mxu0 %v8041_v52  ;;  %v6091_v13 = vrot.slane %v6782_v34, %v6075_v43 }
 0x95e   :  { %7098 = vmatprep.subr.bf16.mxu1 %v8041_v52 }
 0x960   :  { %7077 = vmatpush3.bf16.msra.mxu0 %v8042_v54 }
 0x961   :  { %7099 = vmatpush3.bf16.msra.mxu1 %v8042_v54  ;;  %7078 = vmatprep.subr.bf16.mxu0 %v8043_v10 }
 0x962   :  { %7100 = vmatprep.subr.bf16.mxu1 %v8043_v10 }
 0x964   :  { %7079 = vmatpush3.bf16.msra.mxu0 %v8044_v6 }
 0x965   :  { %7101 = vmatpush3.bf16.msra.mxu1 %v8044_v6  ;;  %7080 = vmatprep.subr.bf16.mxu0 %v8045_v60 }
 0x966   :  { %7102 = vmatprep.subr.bf16.mxu1 %v8045_v60  ;;  %v6103_v60 = vstv %s6783_s28 }
 0x968   :  { %7081 = vmatpush3.bf16.msra.mxu0 %v8046_v37 }
 0x969   :  { %7103 = vmatpush3.bf16.msra.mxu1 %v8046_v37  ;;  %7082 = vmatprep.subr.bf16.mxu0 %v8047_v45 }
 0x96a   :  { %7104 = vmatprep.subr.bf16.mxu1 %v8047_v45 }
 0x96c   :  { %7083 = vmatpush3.bf16.msra.mxu0 %v8048_v1 }
 0x96d   :  { %7105 = vmatpush3.bf16.msra.mxu1 %v8048_v1  ;;  %7084 = vmatprep.subr.bf16.mxu0 %v8049_v28 }
 0x96e   :  { %7106 = vmatprep.subr.bf16.mxu1 %v8049_v28 }
 0x970   :  { %7085 = vmatpush3.bf16.msra.mxu0 %v8050_v19 }
 0x971   :  { %7107 = vmatpush3.bf16.msra.mxu1 %v8050_v19 }
 0xa26   :  { %v5797_v58 = vpop.f32.mrb[216].mxu0 }
 0xa27   :  { %v6017_v12 = vsel %vm4620_vm2, %v5797_v58, 0.0  ;;  %v6002_v30 = vpop.f32.mrb[216].mxu1  ;;  %v5799_v55 = vpop.f32.mrb[217].mxu0 }
 0xa28   :  { %v6018_v3 = vsel %vm4620_vm2, %v6002_v30, 0.0  ;;  %v6020_v48 = vsel %vm4620_vm2, %v5799_v55, 0.0  ;;  %v6004_v40 = vpop.f32.mrb[217].mxu1  ;;  %v5801_v8 = vpop.f32.mrb[218].mxu0 }
 0xa29   :  { %v6019_v32 = vadd.f32 %v6018_v3, %v6017_v12  ;;  %v6021_v42 = vsel %vm4620_vm2, %v6004_v40, 0.0  ;;  %v6006_v53 = vpop.f32.mrb[218].mxu1  ;;  %v5802_v63 = vpop.f32.mrb[219].mxu0 }
 0xa2a   :  { %v6022_v39 = vadd.f32 %v6021_v42, %v6020_v48  ;;  %v6007_v29 = vpop.f32.mrb[219].mxu1 }
 0xa2b   :  { %v6023_v17 = vmul.f32 0.5, %v6019_v32  ;;  %v6148_v29 = vld [vmem:[%s11150_s8] sm:$0x1] }
 0xa2c   :  { %v6024_v36 = vmul.f32 0.5, %v6022_v39 }
 0xa2d   :  { %v6025_v25 = vsub.f32 %v5797_v58, %v6023_v17  ;;  %v6027_v41 = vsub.f32 %v6002_v30, %v6023_v17 }
 0xa2e   :  { %v6026_v21 = vsub.f32 %v5799_v55, %v6024_v36  ;;  %v6028_v62 = vsub.f32 %v6004_v40, %v6024_v36 }
 0xa2f   :  { %v6029_v24 = vmul.f32 %v6025_v25, %v6025_v25  ;;  %v6031_v61 = vmul.f32 %v6027_v41, %v6027_v41 }
 0xa30   :  { %v6030_v59 = vmul.f32 %v6026_v21, %v6026_v21  ;;  %v6032_v27 = vmul.f32 %v6028_v62, %v6028_v62 }
 0xa31   :  { %v6037_v23 = vsel %vm4620_vm2, %v6029_v24, 0.0  ;;  %v6038_v38 = vsel %vm4620_vm2, %v6031_v61, 0.0 }
 0xa32   :  { %v6039_v7 = vadd.f32 %v6038_v38, %v6037_v23  ;;  %v6040_v46 = vsel %vm4620_vm2, %v6030_v59, 0.0  ;;  %v6041_v15 = vsel %vm4620_vm2, %v6032_v27, 0.0 }
 0xa33   :  { %v6042_v33 = vadd.f32 %v6041_v15, %v6040_v46 }
 0xa34   :  { %v6043_v11 = vmul.f32 0.5, %v6039_v7 }
 0xa35   :  { %v6044_v22 = vmul.f32 0.5, %v6042_v33 }
 0xa36   :  { %v6045_v51 = vadd.f32 1e-05, %v6043_v11 }
 0xa37   :  { %v6046_v26 = vadd.f32 1e-05, %v6044_v22 }
 0xa38   :  { %8057 = vrsqrt.f32 %v6045_v51 }
 0xa39   :  { %8059 = vrsqrt.f32 %v6046_v26 }
 0xa42   :  { %v8058_v16 = vpop.eup %8057 }
 0xa43   :  { %v8060_v35 = vpop.eup %8059 }
 0xa44   :  { %v6051_v2 = vcombine.low %v8058_v16, %v8060_v35 }
 0xa46   :  { %v6058_v4 = vrot.slane %v6051_v2, %v6057_v20 }
 0xa48   :  { %v6065_v57 = vrot.slane %v6058_v4, %v6057_v20 }
 0xa4a   :  { %v6067_v44 = vmul.f32 %v6781_v9, %v6065_v57 }
 0xa4c   :  { %v6072_v49 = vrot.slane %v6067_v44, %v6071_v50  ;;  %v6076_v18 = vrot.slane %v6067_v44, %v6075_v43 }
 0xa4e   :  { %v6079_v52 = vmul.f32 %v6072_v49, %v6025_v25  ;;  %v6080_v54 = vmul.f32 %v6076_v18, %v6026_v21  ;;  %v6081_v10 = vmul.f32 %v6072_v49, %v6027_v41  ;;  %v6082_v6 = vmul.f32 %v6076_v18, %v6028_v62 }
 0xa50   :  { %v6094_v37 = vadd.f32 %v6087_v5, %v6079_v52  ;;  %v6096_v45 = vadd.f32 %v6087_v5, %v6081_v10  ;;  %v6097_v1 = vadd.f32 %v6091_v13, %v6082_v6  ;;  %v6095_v28 = vadd.f32 %v6091_v13, %v6080_v54 }
 0xa52   :  { %vm6100_vm3 = vcmp.gt.f32.partialorder %v6095_v28, 0.0  ;;  %v6105_v19 = vmul.f32 %v6103_v60, %v6095_v28  ;;  %vm6102_vm6 = vcmp.gt.f32.partialorder %v6097_v1, 0.0  ;;  %v6107_v58 = vmul.f32 %v6103_v60, %v6097_v1 }
 0xa53   :  { %vm6099_vm7 = vcmp.gt.f32.partialorder %v6094_v37, 0.0  ;;  %v6104_v12 = vmul.f32 %v6103_v60, %v6094_v37  ;;  %vm6101_vm8 = vcmp.gt.f32.partialorder %v6096_v45, 0.0  ;;  %v6106_v30 = vmul.f32 %v6103_v60, %v6096_v45 }
 0xa54   :  { %v6109_v55 = vsel %vm6100_vm3, %v6095_v28, %v6105_v19  ;;  %v6111_v3 = vsel %vm6102_vm6, %v6097_v1, %v6107_v58 }
 0xa55   :  { %v6113_v48 = vpack.c.bf16 %v6109_v55, %v6109_v55  ;;  %v6115_v40 = vpack.c.bf16 %v6111_v3, %v6111_v3  ;;  %v6108_v8 = vsel %vm6099_vm7, %v6094_v37, %v6104_v12  ;;  %v6110_v32 = vsel %vm6101_vm8, %v6096_v45, %v6106_v30 }
 0xa56   :  { %v6112_v42 = vpack.c.bf16 %v6108_v8, %v6108_v8  ;;  %v6114_v53 = vpack.c.bf16 %v6110_v32, %v6110_v32 }
 0xa57   :  { %6277 = vmatprep.mubr.bf16.mxu0 %v6113_v48  ;;  %6317 = vmatprep.mubr.bf16.mxu1 %v6115_v40 }
 0xa58   :  { %6278 = vmatmul.mubr.bf16.vlgmr.msra.gmra.mrb[220].mxu0 %v6112_v42  ;;  %6318 = vmatmul.mubr.bf16.vlgmr.msra.gmra.mrb[220].mxu1 %v6114_v53 }
 0xb2b   :  { %v7086_v63 = vpop.f32.mrb[220].mxu0  ;;  %v7108_v39 = vpop.f32.mrb[220].mxu1 }
 0xb2c   :  { %v7087_v17 = vpop.f32.mrb[221].mxu0  ;;  %v7109_v36 = vpop.f32.mrb[221].mxu1 }
 0xb2d   :  { %v7088_v25 = vadd.f32 %v7087_v17, %v7086_v63  ;;  %v7110_v41 = vadd.f32 %v7109_v36, %v7108_v39  ;;  %v7089_v21 = vpop.f32.mrb[222].mxu0  ;;  %v7111_v62 = vpop.f32.mrb[222].mxu1 }
 0xb2e   :  { %v7090_v24 = vpop.f32.mrb[223].mxu0  ;;  %v7112_v61 = vpop.f32.mrb[223].mxu1 }
 0xb2f   :  { %v6280_v59 = vadd.f32 %v7088_v25, %v6148_v29  ;;  %v6320_v27 = vadd.f32 %v7110_v41, %v6148_v29 }
 0xb31   :  { %6325 = vst [vmem:[#allocation5] sm:$0x1] %v6280_v59  ;;  %6326 = vst [vmem:[#allocation5 + $0x1] sm:$0x1] %v6320_v27 }
 0xb32   :  { %8084 = shalt.err (!%p8081_p9)
}
 0xb33   :  { %s8085_s17 = scalar_lea.hbm %s11153_s11, 32 }
 0xb34   :  { %p8086_p10 = scmp.ne.s32.totalorder %s11153_s11, %s8085_s17  ;;  %p8089_p11 = scmp.lt.u32.totalorder %s8085_s17, %s11153_s11 }
 0xb36   :  { %p8091_p12 = pnand %p8089_p11, %p8086_p10 }
 0xb38   :  { %8094 = shalt.err (!%p8091_p12)
}
 0xb39   :  { %s8109_s21 = smov 16   ;;  %s8110_s5 = smov 1  }
 0xb3a   :  { %6338 = dma.vmem_to_hbm [thread:$0]  %s6333_s15, 32, %s11153_s11, [#allocation3], %s8109_s21, %s8109_s21, %s8110_s5  }
 0xb3b   :  { %8097 = dma.done.wait [#allocation3], 32  }
 0xb3c   :  { %8098 = vsyncadd [#allocation3], 4294967264 }
 0xb3d   :  { %6342 = vsyncpa [#allocation3], 1 }
 0xb3e   :  { %6343 = vsyncpa [#allocation4], 1 }

</bundles_post_ra>
